<compile_context>
chip_gen: v5e
topology: v5e:2x2
jax: 0.10.0
libtpu: 0.0.40
codegen_flags: <defaults>
</compile_context>

<pallas_src>
import functools

import jax
import jax.numpy as jnp
from jax.experimental import pallas as pl
from jax.experimental.pallas import tpu as pltpu


def _round_up(x, m):
    return (x + m - 1) // m * m


# ---------------------------------------------------------------------------
# Pallas kernel: fused  out = relu?(A @ W + b)   (bf16 MXU feed, f32 accumulate)
# ---------------------------------------------------------------------------
def _mm_bias_act_kernel(a_ref, w_ref, b_ref, o_ref, *, apply_relu):
    acc = jnp.dot(a_ref[...], w_ref[...], preferred_element_type=jnp.float32)
    acc = acc + b_ref[...]                       # (1, TN) f32, broadcast over rows
    if apply_relu:
        acc = jnp.maximum(acc, 0.0)
    o_ref[...] = acc.astype(o_ref.dtype)


# Rows / cols per block.  Worst case here: bf16 A block 1024 x 1664 x 2B ~= 3.3 MiB;
# with double buffering of A + out plus the resident W/bias this stays well below
# the default scoped-VMEM limit on v5e/v6e/v7x, while keeping grid steps few
# enough that the ~0.35 us/step overhead stays amortized for these small matmuls.
_TM_MAX = 1024
_TN_MAX = 512


def matmul_bias_act(a, w_p, b_p, *, apply_relu, n_out, out_dtype):
    """a: (M, K); w_p: (Kp, Np) bf16 pre-padded; b_p: (1, Np) f32 pre-padded.
    Returns relu?(a @ w + b)[:, :n_out] with f32 accumulation."""
    M, K = a.shape
    Kp, Np = w_p.shape
    assert K <= Kp and n_out <= Np

    TM = min(_TM_MAX, _round_up(M, 8))
    Mp = _round_up(M, TM)
    TN = min(_TN_MAX, Np)          # Np is always a multiple of 128

    a = a.astype(jnp.bfloat16)
    if Mp != M or Kp != K:
        # Zero-pad K so padded A columns hit the zero rows of W (exact zeros).
        a = jnp.pad(a, ((0, Mp - M), (0, Kp - K)))

    flops = 2 * Mp * Kp * Np
    bytes_accessed = (Mp * Kp * 2 + Kp * Np * 2 + Np * 4
                      + Mp * Np * jnp.dtype(out_dtype).itemsize)

    kernel = functools.partial(_mm_bias_act_kernel, apply_relu=apply_relu)
    out = pl.pallas_call(
        kernel,
        out_shape=jax.ShapeDtypeStruct((Mp, Np), out_dtype),
        grid=(Mp // TM, Np // TN),
        in_specs=[
            pl.BlockSpec((TM, Kp), lambda i, j: (i, 0)),    # A tile marches over M
            pl.BlockSpec((Kp, TN), lambda i, j: (0, j)),    # W tile per N block
            pl.BlockSpec((1, TN), lambda i, j: (0, j)),     # bias tile per N block
        ],
        out_specs=pl.BlockSpec((TM, TN), lambda i, j: (i, j)),
        compiler_params=pltpu.CompilerParams(
            dimension_semantics=("parallel", "parallel")),
        cost_estimate=pl.CostEstimate(flops=flops, transcendentals=0,
                                      bytes_accessed=bytes_accessed),
    )(a, w_p, b_p)
    return out[:M, :n_out]


# ---------------------------------------------------------------------------
# im2col glue on NHWC activations (pure indexing, no compute — fuses in XLA)
# ---------------------------------------------------------------------------
def _im2col_nhwc(x, kh, kw, sh, sw):
    """x: (B, H, W, C) -> (B*OH*OW, kh*kw*C) with patch ordering (kh, kw, C)."""
    B, H, W, C = x.shape
    OH = (H - kh) // sh + 1
    OW = (W - kw) // sw + 1
    cols = []
    for i in range(kh):
        for j in range(kw):
            cols.append(x[:, i:i + sh * OH:sh, j:j + sw * OW:sw, :])  # (B,OH,OW,C)
    p = jnp.stack(cols, axis=3)                    # (B, OH, OW, kh*kw, C)
    return p.reshape(B * OH * OW, kh * kw * C), OH, OW


def conv2d_relu_nhwc(x, w_p, b_p, stride, kernel_hw, n_out):
    """PyTorch-semantics Conv2d (valid padding) + ReLU on NHWC activations."""
    B = x.shape[0]
    kh, kw = kernel_hw
    patches, OH, OW = _im2col_nhwc(x, kh, kw, stride[0], stride[1])
    y = matmul_bias_act(patches, w_p, b_p, apply_relu=True,
                        n_out=n_out, out_dtype=jnp.bfloat16)
    return y.reshape(B, OH, OW, n_out)


# ---------------------------------------------------------------------------
# Full forward pass of CNNEmbeddingNetwork
# ---------------------------------------------------------------------------
def cnn_embedding_forward(x_nchw, params, embedding_size):
    """x_nchw: (B, C, 84, 84) f32 (PyTorch layout) -> (B, embedding_size) f32."""
    x = jnp.transpose(x_nchw, (0, 2, 3, 1)).astype(jnp.bfloat16)   # NHWC, once
    x = conv2d_relu_nhwc(x, params["w1"], params["b1"], (4, 4), (8, 8), 32)
    x = conv2d_relu_nhwc(x, params["w2"], params["b2"], (2, 2), (4, 4), 64)
    x = conv2d_relu_nhwc(x, params["w3"], params["b3"], (1, 1), (3, 3), 32)
    flat = x.reshape(x.shape[0], -1)   # NHWC flatten; wl was pre-permuted to match
    return matmul_bias_act(flat, params["wl"], params["bl"], apply_relu=False,
                           n_out=embedding_size, out_dtype=jnp.float32)


# ---------------------------------------------------------------------------
# Parameter init (PyTorch layout) + one-time preprocessing for the kernels
# ---------------------------------------------------------------------------
def init_raw_params(key, in_channels, embedding_size):
    ks = jax.random.split(key, 8)
    s = 0.05
    return {
        "w1": s * jax.random.normal(ks[0], (32, in_channels, 8, 8), jnp.float32),
        "b1": s * jax.random.normal(ks[1], (32,), jnp.float32),
        "w2": s * jax.random.normal(ks[2], (64, 32, 4, 4), jnp.float32),
        "b2": s * jax.random.normal(ks[3], (64,), jnp.float32),
        "w3": s * jax.random.normal(ks[4], (32, 64, 3, 3), jnp.float32),
        "b3": s * jax.random.normal(ks[5], (32,), jnp.float32),
        "wl": s * jax.random.normal(ks[6], (embedding_size, 32 * 7 * 7), jnp.float32),
        "bl": s * jax.random.normal(ks[7], (embedding_size,), jnp.float32),
    }


def _prep_conv_w(w):
    # (O, C, kh, kw) -> (kh*kw*C, O) so rows match the NHWC im2col order (kh, kw, C)
    O, C, kh, kw = w.shape
    k = kh * kw * C
    w2 = jnp.transpose(w, (2, 3, 1, 0)).reshape(k, O)
    return jnp.pad(w2, ((0, _round_up(k, 128) - k),
                        (0, _round_up(O, 128) - O))).astype(jnp.bfloat16)


def _prep_bias(b):
    n = b.shape[0]
    return jnp.pad(b.astype(jnp.float32), (0, _round_up(n, 128) - n)).reshape(1, -1)


def _prep_linear_w(wl):
    # PyTorch flattens NCHW -> (C, H, W); activations here are NHWC-flattened
    # (H, W, C), so permute the weight rows once at init.
    E, K = wl.shape                                   # K = 32*7*7
    w2 = wl.reshape(E, 32, 7, 7).transpose(2, 3, 1, 0).reshape(K, E)
    return jnp.pad(w2, ((0, _round_up(K, 128) - K),
                        (0, _round_up(E, 128) - E))).astype(jnp.bfloat16)


def preprocess_params(raw):
    return {
        "w1": _prep_conv_w(raw["w1"]), "b1": _prep_bias(raw["b1"]),
        "w2": _prep_conv_w(raw["w2"]), "b2": _prep_bias(raw["b2"]),
        "w3": _prep_conv_w(raw["w3"]), "b3": _prep_bias(raw["b3"]),
        "wl": _prep_linear_w(raw["wl"]), "bl": _prep_bias(raw["bl"]),
    }


# ---------------------------------------------------------------------------
# Pure-JAX f32 reference (PyTorch semantics) for correctness checking
# ---------------------------------------------------------------------------
def reference_forward(x_nchw, raw):
    y = x_nchw
    for wn, bn, stride in (("w1", "b1", (4, 4)),
                           ("w2", "b2", (2, 2)),
                           ("w3", "b3", (1, 1))):
        y = jax.lax.conv_general_dilated(
            y, raw[wn], window_strides=stride, padding="VALID",
            dimension_numbers=("NCHW", "OIHW", "NCHW"))
        y = jnp.maximum(y + raw[bn][None, :, None, None], 0.0)
    flat = y.reshape(y.shape[0], -1)                  # NCHW flatten, like torch
    return flat @ raw["wl"].T + raw["bl"]


if __name__ == "__main__":
    # Shapes implied by the module: Linear(32*7*7, E) forces 84x84 spatial input.
    batch = 2
    in_channels = 4
    embedding_size = 32

    key = jax.random.PRNGKey(0)
    k_x, k_p = jax.random.split(key)
    x = jax.random.normal(k_x, (batch, in_channels, 84, 84), jnp.float32)
    raw = init_raw_params(k_p, in_channels, embedding_size)
    params = preprocess_params(raw)

    fwd = jax.jit(cnn_embedding_forward, static_argnums=(2,))
    out = jax.block_until_ready(fwd(x, params, embedding_size))

    assert out.shape == (batch, embedding_size), out.shape
    assert out.dtype == jnp.float32
    assert bool(jnp.all(jnp.isfinite(out)))

    ref = reference_forward(x, raw)
    max_err = float(jnp.max(jnp.abs(out - ref)))
    # Generous tolerance: kernel path carries bf16 activations/weights.
    assert bool(jnp.allclose(out, ref, atol=1e-1, rtol=1e-1)), max_err

    print("KERNEL_OK")
</pallas_src>

<mosaic_0001>
module attributes {stable_mosaic.version = 11 : i64} {
  func.func @_mm_bias_act_kernel(%arg0: i32, %arg1: i32, %arg2: memref<800x256xbf16, #tpu.memory_space<vmem>>, %arg3: memref<256x128xbf16, #tpu.memory_space<vmem>>, %arg4: memref<1x128xf32, #tpu.memory_space<vmem>>, %arg5: memref<800x128xbf16, #tpu.memory_space<vmem>>) attributes {dimension_semantics = [#tpu.dimension_semantics<parallel>, #tpu.dimension_semantics<parallel>], iteration_bounds = array<i64: 1, 1>, scalar_prefetch = 0 : i64, scratch_operands = 0 : i64, tpu.core_type = #tpu.core_type<tc>, window_params = [{transform_indices = @transform_0, window_bounds = array<i64: 800, 256>}, {transform_indices = @transform_1, window_bounds = array<i64: 256, 128>}, {transform_indices = @transform_2, window_bounds = array<i64: 1, 128>}, {transform_indices = @transform_3, window_bounds = array<i64: 800, 128>}]} {
    %c0 = arith.constant 0 : index
    %c0_0 = arith.constant 0 : index
    %0 = vector.load %arg2[%c0, %c0_0] : memref<800x256xbf16, #tpu.memory_space<vmem>>, vector<800x256xbf16>
    %c0_1 = arith.constant 0 : index
    %c0_2 = arith.constant 0 : index
    %1 = vector.load %arg3[%c0_1, %c0_2] : memref<256x128xbf16, #tpu.memory_space<vmem>>, vector<256x128xbf16>
    %cst = arith.constant dense<0.000000e+00> : vector<800x128xf32>
    %2 = tpu.matmul %0, %1, %cst {dimension_numbers = #tpu.dot_dimension_numbers<[1], [0], [0], [1], [0, 0, 1, 1], [], []>} : vector<800x256xbf16>, vector<256x128xbf16>, vector<800x128xf32> -> vector<800x128xf32>
    %c0_3 = arith.constant 0 : index
    %c0_4 = arith.constant 0 : index
    %3 = vector.load %arg4[%c0_3, %c0_4] : memref<1x128xf32, #tpu.memory_space<vmem>>, vector<1x128xf32>
    %4 = vector.broadcast %3 : vector<1x128xf32> to vector<800x128xf32>
    %5 = arith.addf %2, %4 : vector<800x128xf32>
    %cst_5 = arith.constant 0.000000e+00 : f32
    %6 = vector.broadcast %cst_5 : f32 to vector<800x128xf32>
    %7 = arith.maximumf %5, %6 : vector<800x128xf32>
    %8 = arith.truncf %7 : vector<800x128xf32> to vector<800x128xbf16>
    %c0_6 = arith.constant 0 : index
    %c0_7 = arith.constant 0 : index
    %9 = vector.load %arg5[%c0_6, %c0_7] : memref<800x128xbf16, #tpu.memory_space<vmem>>, vector<800x128xbf16>
    tpu.vector_store %arg5[%c0_6, %c0_7], %8 {strides = array<i32>} : memref<800x128xbf16, #tpu.memory_space<vmem>>, vector<800x128xbf16>,
    return
  }
  func.func @transform_0(%arg0: i32, %arg1: i32) -> (i32, i32) {
    %c0_i32 = arith.constant 0 : i32
    %c0_i32_0 = arith.constant 0 : i32
    return %arg0, %c0_i32 : i32, i32
  }
  func.func @transform_1(%arg0: i32, %arg1: i32) -> (i32, i32) {
    %c0_i32 = arith.constant 0 : i32
    %c0_i32_0 = arith.constant 0 : i32
    return %c0_i32, %arg1 : i32, i32
  }
  func.func @transform_2(%arg0: i32, %arg1: i32) -> (i32, i32) {
    %c0_i32 = arith.constant 0 : i32
    %c0_i32_0 = arith.constant 0 : i32
    return %c0_i32, %arg1 : i32, i32
  }
  func.func @transform_3(%arg0: i32, %arg1: i32) -> (i32, i32) {
    %c0_i32 = arith.constant 0 : i32
    return %arg0, %arg1 : i32, i32
  }
}

module attributes {stable_mosaic.version = 11 : i64} {
  func.func @_mm_bias_act_kernel(%arg0: i32, %arg1: i32, %arg2: memref<168x512xbf16, #tpu.memory_space<vmem>>, %arg3: memref<512x128xbf16, #tpu.memory_space<vmem>>, %arg4: memref<1x128xf32, #tpu.memory_space<vmem>>, %arg5: memref<168x128xbf16, #tpu.memory_space<vmem>>) attributes {dimension_semantics = [#tpu.dimension_semantics<parallel>, #tpu.dimension_semantics<parallel>], iteration_bounds = array<i64: 1, 1>, scalar_prefetch = 0 : i64, scratch_operands = 0 : i64, tpu.core_type = #tpu.core_type<tc>, window_params = [{transform_indices = @transform_0, window_bounds = array<i64: 168, 512>}, {transform_indices = @transform_1, window_bounds = array<i64: 512, 128>}, {transform_indices = @transform_2, window_bounds = array<i64: 1, 128>}, {transform_indices = @transform_3, window_bounds = array<i64: 168, 128>}]} {
    %c0 = arith.constant 0 : index
    %c0_0 = arith.constant 0 : index
    %0 = vector.load %arg2[%c0, %c0_0] : memref<168x512xbf16, #tpu.memory_space<vmem>>, vector<168x512xbf16>
    %c0_1 = arith.constant 0 : index
    %c0_2 = arith.constant 0 : index
    %1 = vector.load %arg3[%c0_1, %c0_2] : memref<512x128xbf16, #tpu.memory_space<vmem>>, vector<512x128xbf16>
    %cst = arith.constant dense<0.000000e+00> : vector<168x128xf32>
    %2 = tpu.matmul %0, %1, %cst {dimension_numbers = #tpu.dot_dimension_numbers<[1], [0], [0], [1], [0, 0, 1, 1], [], []>} : vector<168x512xbf16>, vector<512x128xbf16>, vector<168x128xf32> -> vector<168x128xf32>
    %c0_3 = arith.constant 0 : index
    %c0_4 = arith.constant 0 : index
    %3 = vector.load %arg4[%c0_3, %c0_4] : memref<1x128xf32, #tpu.memory_space<vmem>>, vector<1x128xf32>
    %4 = vector.broadcast %3 : vector<1x128xf32> to vector<168x128xf32>
    %5 = arith.addf %2, %4 : vector<168x128xf32>
    %cst_5 = arith.constant 0.000000e+00 : f32
    %6 = vector.broadcast %cst_5 : f32 to vector<168x128xf32>
    %7 = arith.maximumf %5, %6 : vector<168x128xf32>
    %8 = arith.truncf %7 : vector<168x128xf32> to vector<168x128xbf16>
    %c0_6 = arith.constant 0 : index
    %c0_7 = arith.constant 0 : index
    %9 = vector.load %arg5[%c0_6, %c0_7] : memref<168x128xbf16, #tpu.memory_space<vmem>>, vector<168x128xbf16>
    tpu.vector_store %arg5[%c0_6, %c0_7], %8 {strides = array<i32>} : memref<168x128xbf16, #tpu.memory_space<vmem>>, vector<168x128xbf16>,
    return
  }
  func.func @transform_0(%arg0: i32, %arg1: i32) -> (i32, i32) {
    %c0_i32 = arith.constant 0 : i32
    %c0_i32_0 = arith.constant 0 : i32
    return %arg0, %c0_i32 : i32, i32
  }
  func.func @transform_1(%arg0: i32, %arg1: i32) -> (i32, i32) {
    %c0_i32 = arith.constant 0 : i32
    %c0_i32_0 = arith.constant 0 : i32
    return %c0_i32, %arg1 : i32, i32
  }
  func.func @transform_2(%arg0: i32, %arg1: i32) -> (i32, i32) {
    %c0_i32 = arith.constant 0 : i32
    %c0_i32_0 = arith.constant 0 : i32
    return %c0_i32, %arg1 : i32, i32
  }
  func.func @transform_3(%arg0: i32, %arg1: i32) -> (i32, i32) {
    %c0_i32 = arith.constant 0 : i32
    return %arg0, %arg1 : i32, i32
  }
}

module attributes {stable_mosaic.version = 11 : i64} {
  func.func @_mm_bias_act_kernel(%arg0: i32, %arg1: i32, %arg2: memref<104x640xbf16, #tpu.memory_space<vmem>>, %arg3: memref<640x128xbf16, #tpu.memory_space<vmem>>, %arg4: memref<1x128xf32, #tpu.memory_space<vmem>>, %arg5: memref<104x128xbf16, #tpu.memory_space<vmem>>) attributes {dimension_semantics = [#tpu.dimension_semantics<parallel>, #tpu.dimension_semantics<parallel>], iteration_bounds = array<i64: 1, 1>, scalar_prefetch = 0 : i64, scratch_operands = 0 : i64, tpu.core_type = #tpu.core_type<tc>, window_params = [{transform_indices = @transform_0, window_bounds = array<i64: 104, 640>}, {transform_indices = @transform_1, window_bounds = array<i64: 640, 128>}, {transform_indices = @transform_2, window_bounds = array<i64: 1, 128>}, {transform_indices = @transform_3, window_bounds = array<i64: 104, 128>}]} {
    %c0 = arith.constant 0 : index
    %c0_0 = arith.constant 0 : index
    %0 = vector.load %arg2[%c0, %c0_0] : memref<104x640xbf16, #tpu.memory_space<vmem>>, vector<104x640xbf16>
    %c0_1 = arith.constant 0 : index
    %c0_2 = arith.constant 0 : index
    %1 = vector.load %arg3[%c0_1, %c0_2] : memref<640x128xbf16, #tpu.memory_space<vmem>>, vector<640x128xbf16>
    %cst = arith.constant dense<0.000000e+00> : vector<104x128xf32>
    %2 = tpu.matmul %0, %1, %cst {dimension_numbers = #tpu.dot_dimension_numbers<[1], [0], [0], [1], [0, 0, 1, 1], [], []>} : vector<104x640xbf16>, vector<640x128xbf16>, vector<104x128xf32> -> vector<104x128xf32>
    %c0_3 = arith.constant 0 : index
    %c0_4 = arith.constant 0 : index
    %3 = vector.load %arg4[%c0_3, %c0_4] : memref<1x128xf32, #tpu.memory_space<vmem>>, vector<1x128xf32>
    %4 = vector.broadcast %3 : vector<1x128xf32> to vector<104x128xf32>
    %5 = arith.addf %2, %4 : vector<104x128xf32>
    %cst_5 = arith.constant 0.000000e+00 : f32
    %6 = vector.broadcast %cst_5 : f32 to vector<104x128xf32>
    %7 = arith.maximumf %5, %6 : vector<104x128xf32>
    %8 = arith.truncf %7 : vector<104x128xf32> to vector<104x128xbf16>
    %c0_6 = arith.constant 0 : index
    %c0_7 = arith.constant 0 : index
    %9 = vector.load %arg5[%c0_6, %c0_7] : memref<104x128xbf16, #tpu.memory_space<vmem>>, vector<104x128xbf16>
    tpu.vector_store %arg5[%c0_6, %c0_7], %8 {strides = array<i32>} : memref<104x128xbf16, #tpu.memory_space<vmem>>, vector<104x128xbf16>,
    return
  }
  func.func @transform_0(%arg0: i32, %arg1: i32) -> (i32, i32) {
    %c0_i32 = arith.constant 0 : i32
    %c0_i32_0 = arith.constant 0 : i32
    return %arg0, %c0_i32 : i32, i32
  }
  func.func @transform_1(%arg0: i32, %arg1: i32) -> (i32, i32) {
    %c0_i32 = arith.constant 0 : i32
    %c0_i32_0 = arith.constant 0 : i32
    return %c0_i32, %arg1 : i32, i32
  }
  func.func @transform_2(%arg0: i32, %arg1: i32) -> (i32, i32) {
    %c0_i32 = arith.constant 0 : i32
    %c0_i32_0 = arith.constant 0 : i32
    return %c0_i32, %arg1 : i32, i32
  }
  func.func @transform_3(%arg0: i32, %arg1: i32) -> (i32, i32) {
    %c0_i32 = arith.constant 0 : i32
    return %arg0, %arg1 : i32, i32
  }
}

module attributes {stable_mosaic.version = 11 : i64} {
  func.func @_mm_bias_act_kernel(%arg0: i32, %arg1: i32, %arg2: memref<8x1664xbf16, #tpu.memory_space<vmem>>, %arg3: memref<1664x128xbf16, #tpu.memory_space<vmem>>, %arg4: memref<1x128xf32, #tpu.memory_space<vmem>>, %arg5: memref<8x128xf32, #tpu.memory_space<vmem>>) attributes {dimension_semantics = [#tpu.dimension_semantics<parallel>, #tpu.dimension_semantics<parallel>], iteration_bounds = array<i64: 1, 1>, scalar_prefetch = 0 : i64, scratch_operands = 0 : i64, tpu.core_type = #tpu.core_type<tc>, window_params = [{transform_indices = @transform_0, window_bounds = array<i64: 8, 1664>}, {transform_indices = @transform_1, window_bounds = array<i64: 1664, 128>}, {transform_indices = @transform_2, window_bounds = array<i64: 1, 128>}, {transform_indices = @transform_3, window_bounds = array<i64: 8, 128>}]} {
    %c0 = arith.constant 0 : index
    %c0_0 = arith.constant 0 : index
    %0 = vector.load %arg2[%c0, %c0_0] : memref<8x1664xbf16, #tpu.memory_space<vmem>>, vector<8x1664xbf16>
    %c0_1 = arith.constant 0 : index
    %c0_2 = arith.constant 0 : index
    %1 = vector.load %arg3[%c0_1, %c0_2] : memref<1664x128xbf16, #tpu.memory_space<vmem>>, vector<1664x128xbf16>
    %cst = arith.constant dense<0.000000e+00> : vector<8x128xf32>
    %2 = tpu.matmul %0, %1, %cst {dimension_numbers = #tpu.dot_dimension_numbers<[1], [0], [0], [1], [0, 0, 1, 1], [], []>} : vector<8x1664xbf16>, vector<1664x128xbf16>, vector<8x128xf32> -> vector<8x128xf32>
    %c0_3 = arith.constant 0 : index
    %c0_4 = arith.constant 0 : index
    %3 = vector.load %arg4[%c0_3, %c0_4] : memref<1x128xf32, #tpu.memory_space<vmem>>, vector<1x128xf32>
    %4 = vector.broadcast %3 : vector<1x128xf32> to vector<8x128xf32>
    %5 = arith.addf %2, %4 : vector<8x128xf32>
    %c0_5 = arith.constant 0 : index
    %c0_6 = arith.constant 0 : index
    %6 = vector.load %arg5[%c0_5, %c0_6] : memref<8x128xf32, #tpu.memory_space<vmem>>, vector<8x128xf32>
    tpu.vector_store %arg5[%c0_5, %c0_6], %5 {strides = array<i32>} : memref<8x128xf32, #tpu.memory_space<vmem>>, vector<8x128xf32>,
    return
  }
  func.func @transform_0(%arg0: i32, %arg1: i32) -> (i32, i32) {
    %c0_i32 = arith.constant 0 : i32
    %c0_i32_0 = arith.constant 0 : i32
    return %arg0, %c0_i32 : i32, i32
  }
  func.func @transform_1(%arg0: i32, %arg1: i32) -> (i32, i32) {
    %c0_i32 = arith.constant 0 : i32
    %c0_i32_0 = arith.constant 0 : i32
    return %c0_i32, %arg1 : i32, i32
  }
  func.func @transform_2(%arg0: i32, %arg1: i32) -> (i32, i32) {
    %c0_i32 = arith.constant 0 : i32
    %c0_i32_0 = arith.constant 0 : i32
    return %c0_i32, %arg1 : i32, i32
  }
  func.func @transform_3(%arg0: i32, %arg1: i32) -> (i32, i32) {
    %c0_i32 = arith.constant 0 : i32
    return %arg0, %arg1 : i32, i32
  }
}

</mosaic_0001>

<bundles_post_ra>
// kernel: cnn_embedding_forward.4
= control target key start
LH: loop header
LB: loop body
LE: loop exit
PB: predicated region body
PF: predicated region fallthrough
CT: control target
= control target key end

     0   :  { %s3393_s1 = inlined_call_operand.vmem [shape: bf16[256,128], index: 1, kind: input, shape index: {}]   ;;  %s3394_s2 = inlined_call_operand.vmem [shape: f32[1,128], index: 2, kind: input, shape index: {}]   ;;  %s3395_s0 = inlined_call_operand.vmem [shape: bf16[800,256], index: 0, kind: input, shape index: {}]   ;;  %s3396_s3 = inlined_call_operand.vmem [shape: bf16[800,128], index: 3, kind: output, shape index: {}]  }
   0x1   :  { %v2139_v0 = vld [vmem:[%s3393_s1 + $0x38] sm:$0xff]  ;;  %v2138_v2 = vld [vmem:[%s3393_s1 + $0x30] sm:$0xff]  ;;  %v2137_v4 = vld [vmem:[%s3393_s1 + $0x28] sm:$0xff] }
   0x2   :  { %v2147_v1 = vld [vmem:[%s3393_s1 + $0x78] sm:$0xff]  ;;  %746 = vmatpush.bf16.msra.mxu0 %v2139_v0  ;;  %2447 = vmatpush.bf16.msra.mxu2 %v2139_v0  ;;  %v2146_v3 = vld [vmem:[%s3393_s1 + $0x70] sm:$0xff]  ;;  %v2145_v5 = vld [vmem:[%s3393_s1 + $0x68] sm:$0xff] }
   0x3   :  { %1005 = vmatpush.bf16.msra.mxu1 %v2147_v1  ;;  %2455 = vmatpush.bf16.msra.mxu3 %v2147_v1  ;;  %v2136_v6 = vld [vmem:[%s3393_s1 + $0x20] sm:$0xff]  ;;  %v2135_v8 = vld [vmem:[%s3393_s1 + $0x18] sm:$0xff]  ;;  %v2134_v10 = vld [vmem:[%s3393_s1 + $0x10] sm:$0xff] }
   0x4   :  { %v2144_v7 = vld [vmem:[%s3393_s1 + $0x60] sm:$0xff]  ;;  %v2143_v9 = vld [vmem:[%s3393_s1 + $0x58] sm:$0xff]  ;;  %v2142_v11 = vld [vmem:[%s3393_s1 + $0x50] sm:$0xff] }
   0x5   :  { %v2133_v12 = vld [vmem:[%s3393_s1 + $0x8] sm:$0xff]  ;;  %v2132_v14 = vld [vmem:[%s3393_s1] sm:$0xff]  ;;  %v1770_v18 = vld [vmem:[%s3395_s0 + $0x190] sm:$0xf] }
   0x6   :  { %747 = vmatpush.bf16.msra.mxu0 %v2138_v2  ;;  %2448 = vmatpush.bf16.msra.mxu2 %v2138_v2  ;;  %v2141_v13 = vld [vmem:[%s3393_s1 + $0x48] sm:$0xff]  ;;  %v2140_v15 = vld [vmem:[%s3393_s1 + $0x40] sm:$0xff]  ;;  %v2083_v19 = vld [vmem:[%s3395_s0 + $0x194] sm:$0xf0] }
   0x7   :  { %1006 = vmatpush.bf16.msra.mxu1 %v2146_v3  ;;  %2456 = vmatpush.bf16.msra.mxu3 %v2146_v3  ;;  %v1570_v16 = vld [vmem:[%s3395_s0] sm:$0xf]  ;;  %v2033_v17 = vld [vmem:[%s3395_s0 + $0x4] sm:$0xf0]  ;;  %v2032_v20 = vld [vmem:[%s3395_s0 + $0x4] sm:$0xf]  ;;  %v1771_v25 = vor.u32 %v2083_v19, %v1770_v18 }
   0x8   :  { %v1572_v21 = vld [vmem:[%s3395_s0 + $0x8] sm:$0xf0]  ;;  %v2082_v22 = vld [vmem:[%s3395_s0 + $0x194] sm:$0xf]  ;;  %v1772_v23 = vld [vmem:[%s3395_s0 + $0x198] sm:$0xf0]  ;;  %v1571_v24 = vor.u32 %v2033_v17, %v1570_v16 }
   0x9   :  { %v1575_v26 = vor.u32 %v2032_v20, %v1572_v21  ;;  %v1775_v27 = vor.u32 %v2082_v22, %v1772_v23  ;;  %v1578_v28 = vld [vmem:[%s3395_s0 + $0x10] sm:$0xf]  ;;  %v2035_v29 = vld [vmem:[%s3395_s0 + $0x14] sm:$0xf0]  ;;  %v1778_v30 = vld [vmem:[%s3395_s0 + $0x1a0] sm:$0xf] }
   0xa   :  { %748 = vmatpush.bf16.msra.mxu0 %v2137_v4  ;;  %2449 = vmatpush.bf16.msra.mxu2 %v2137_v4  ;;  %v2085_v31 = vld [vmem:[%s3395_s0 + $0x1a4] sm:$0xf0]  ;;  %v2034_v32 = vld [vmem:[%s3395_s0 + $0x14] sm:$0xf]  ;;  %v1580_v33 = vld [vmem:[%s3395_s0 + $0x18] sm:$0xf0]  ;;  %v1579_v36 = vor.u32 %v2035_v29, %v1578_v28 }
   0xb   :  { %1007 = vmatpush.bf16.msra.mxu1 %v2145_v5  ;;  %2457 = vmatpush.bf16.msra.mxu3 %v2145_v5  ;;  %v2084_v34 = vld [vmem:[%s3395_s0 + $0x1a4] sm:$0xf]  ;;  %v1780_v35 = vld [vmem:[%s3395_s0 + $0x1a8] sm:$0xf0]  ;;  %v1779_v37 = vor.u32 %v2085_v31, %v1778_v30  ;;  %v1583_v38 = vor.u32 %v2034_v32, %v1580_v33  ;;  %v1586_v40 = vld [vmem:[%s3395_s0 + $0x20] sm:$0xf] }
   0xc   :  { %v1783_v39 = vor.u32 %v2084_v34, %v1780_v35  ;;  %v2037_v41 = vld [vmem:[%s3395_s0 + $0x24] sm:$0xf0]  ;;  %v1786_v42 = vld [vmem:[%s3395_s0 + $0x1b0] sm:$0xf]  ;;  %v2087_v43 = vld [vmem:[%s3395_s0 + $0x1b4] sm:$0xf0] }
   0xd   :  { %v2036_v44 = vld [vmem:[%s3395_s0 + $0x24] sm:$0xf]  ;;  %v1588_v45 = vld [vmem:[%s3395_s0 + $0x28] sm:$0xf0]  ;;  %v2086_v46 = vld [vmem:[%s3395_s0 + $0x1b4] sm:$0xf]  ;;  %v1587_v48 = vor.u32 %v2037_v41, %v1586_v40  ;;  %v1787_v49 = vor.u32 %v2087_v43, %v1786_v42 }
   0xe   :  { %749 = vmatpush.bf16.msra.mxu0 %v2136_v6  ;;  %2450 = vmatpush.bf16.msra.mxu2 %v2136_v6  ;;  %v1788_v47 = vld [vmem:[%s3395_s0 + $0x1b8] sm:$0xf0]  ;;  %v1591_v50 = vor.u32 %v2036_v44, %v1588_v45  ;;  %v1594_v52 = vld [vmem:[%s3395_s0 + $0x30] sm:$0xf]  ;;  %v2039_v53 = vld [vmem:[%s3395_s0 + $0x34] sm:$0xf0] }
   0xf   :  { %1008 = vmatpush.bf16.msra.mxu1 %v2144_v7  ;;  %2458 = vmatpush.bf16.msra.mxu3 %v2144_v7  ;;  %v1791_v51 = vor.u32 %v2086_v46, %v1788_v47  ;;  %v1794_v54 = vld [vmem:[%s3395_s0 + $0x1c0] sm:$0xf]  ;;  %v2089_v55 = vld [vmem:[%s3395_s0 + $0x1c4] sm:$0xf0]  ;;  %v2038_v56 = vld [vmem:[%s3395_s0 + $0x34] sm:$0xf]  ;;  %v1595_v60 = vor.u32 %v2039_v53, %v1594_v52 }
  0x10   :  { %v1596_v57 = vld [vmem:[%s3395_s0 + $0x38] sm:$0xf0]  ;;  %v2088_v58 = vld [vmem:[%s3395_s0 + $0x1c4] sm:$0xf]  ;;  %v1796_v59 = vld [vmem:[%s3395_s0 + $0x1c8] sm:$0xf0]  ;;  %v1795_v61 = vor.u32 %v2089_v55, %v1794_v54 }
  0x11   :  { %v1599_v62 = vor.u32 %v2038_v56, %v1596_v57  ;;  %v1799_v63 = vor.u32 %v2088_v58, %v1796_v59  ;;  %v1602_v0 = vld [vmem:[%s3395_s0 + $0x40] sm:$0xf]  ;;  %v2041_v1 = vld [vmem:[%s3395_s0 + $0x44] sm:$0xf0]  ;;  %v1802_v2 = vld [vmem:[%s3395_s0 + $0x1d0] sm:$0xf] }
  0x12   :  { %750 = vmatpush.bf16.msra.mxu0 %v2135_v8  ;;  %2451 = vmatpush.bf16.msra.mxu2 %v2135_v8  ;;  %v2091_v3 = vld [vmem:[%s3395_s0 + $0x1d4] sm:$0xf0]  ;;  %v2040_v4 = vld [vmem:[%s3395_s0 + $0x44] sm:$0xf]  ;;  %v1604_v5 = vld [vmem:[%s3395_s0 + $0x48] sm:$0xf0]  ;;  %v1603_v8 = vor.u32 %v2041_v1, %v1602_v0 }
  0x13   :  { %1009 = vmatpush.bf16.msra.mxu1 %v2143_v9  ;;  %2459 = vmatpush.bf16.msra.mxu3 %v2143_v9  ;;  %v2090_v6 = vld [vmem:[%s3395_s0 + $0x1d4] sm:$0xf]  ;;  %v1804_v7 = vld [vmem:[%s3395_s0 + $0x1d8] sm:$0xf0]  ;;  %v1803_v9 = vor.u32 %v2091_v3, %v1802_v2  ;;  %v2092_v18 = vld [vmem:[%s3395_s0 + $0x1e4] sm:$0xf] }
  0x14   :  { %v2042_v16 = vld [vmem:[%s3395_s0 + $0x54] sm:$0xf]  ;;  %v1612_v17 = vld [vmem:[%s3395_s0 + $0x58] sm:$0xf0]  ;;  %v1812_v19 = vld [vmem:[%s3395_s0 + $0x1e8] sm:$0xf0] }
  0x15   :  { %v1615_v22 = vor.u32 %v2042_v16, %v1612_v17  ;;  %v1815_v23 = vor.u32 %v2092_v18, %v1812_v19  ;;  %v2044_v28 = vld [vmem:[%s3395_s0 + $0x64] sm:$0xf]  ;;  %v1620_v29 = vld [vmem:[%s3395_s0 + $0x68] sm:$0xf0]  ;;  %v2094_v30 = vld [vmem:[%s3395_s0 + $0x1f4] sm:$0xf] }
  0x16   :  { %751 = vmatpush.bf16.msra.mxu0 %v2134_v10  ;;  %2452 = vmatpush.bf16.msra.mxu2 %v2134_v10  ;;  %v1607_v10 = vor.u32 %v2040_v4, %v1604_v5  ;;  %v1820_v31 = vld [vmem:[%s3395_s0 + $0x1f8] sm:$0xf0]  ;;  %v1623_v34 = vor.u32 %v2044_v28, %v1620_v29  ;;  %v2046_v40 = vld [vmem:[%s3395_s0 + $0x74] sm:$0xf]  ;;  %v2096_v42 = vld [vmem:[%s3395_s0 + $0x204] sm:$0xf] }
  0x17   :  { %1010 = vmatpush.bf16.msra.mxu1 %v2142_v11  ;;  %2460 = vmatpush.bf16.msra.mxu3 %v2142_v11  ;;  %v1807_v11 = vor.u32 %v2090_v6, %v1804_v7  ;;  %v1823_v35 = vor.u32 %v2094_v30, %v1820_v31  ;;  %v1628_v41 = vld [vmem:[%s3395_s0 + $0x78] sm:$0xf0]  ;;  %v1828_v43 = vld [vmem:[%s3395_s0 + $0x208] sm:$0xf0]  ;;  %v2048_v52 = vld [vmem:[%s3395_s0 + $0x84] sm:$0xf] }
  0x18   :  { %v1631_v46 = vor.u32 %v2046_v40, %v1628_v41  ;;  %v1831_v47 = vor.u32 %v2096_v42, %v1828_v43  ;;  %v1636_v53 = vld [vmem:[%s3395_s0 + $0x88] sm:$0xf0]  ;;  %v2098_v54 = vld [vmem:[%s3395_s0 + $0x214] sm:$0xf]  ;;  %v1836_v55 = vld [vmem:[%s3395_s0 + $0x218] sm:$0xf0] }
  0x19   :  { %v1639_v59 = vor.u32 %v2048_v52, %v1636_v53  ;;  %v2100_v16 = vld [vmem:[%s3395_s0 + $0x224] sm:$0xf]  ;;  %v1844_v17 = vld [vmem:[%s3395_s0 + $0x228] sm:$0xf0]  ;;  %v1650_v42 = vld [vmem:[%s3395_s0 + $0xa0] sm:$0xf] }
  0x1a   :  { %752 = vmatpush.bf16.msra.mxu0 %v2133_v12  ;;  %2453 = vmatpush.bf16.msra.mxu2 %v2133_v12  ;;  %v1610_v12 = vld [vmem:[%s3395_s0 + $0x50] sm:$0xf]  ;;  %v2053_v43 = vld [vmem:[%s3395_s0 + $0xa4] sm:$0xf0] }
  0x1b   :  { %1011 = vmatpush.bf16.msra.mxu1 %v2141_v13  ;;  %2461 = vmatpush.bf16.msra.mxu3 %v2141_v13  ;;  %v2043_v13 = vld [vmem:[%s3395_s0 + $0x54] sm:$0xf0]  ;;  %v1651_v53 = vor.u32 %v2053_v43, %v1650_v42 }
  0x1c   :  { %v1611_v20 = vor.u32 %v2043_v13, %v1610_v12  ;;  %v2050_v12 = vld [vmem:[%s3395_s0 + $0x94] sm:$0xf]  ;;  %v1644_v13 = vld [vmem:[%s3395_s0 + $0x98] sm:$0xf0] }
  0x1e   :  { %753 = vmatpush.bf16.msra.mxu0 %v2132_v14  ;;  %2454 = vmatpush.bf16.msra.mxu2 %v2132_v14  ;;  %v1810_v14 = vld [vmem:[%s3395_s0 + $0x1e0] sm:$0xf] }
  0x1f   :  { %1012 = vmatpush.bf16.msra.mxu1 %v2140_v15  ;;  %2462 = vmatpush.bf16.msra.mxu3 %v2140_v15  ;;  %v2093_v15 = vld [vmem:[%s3395_s0 + $0x1e4] sm:$0xf0] }
  0x20   :  { %v1811_v21 = vor.u32 %v2093_v15, %v1810_v14 }
  0x21   :  { %754 = vmatmul.bf16.vlgmr.msra.gmra.mxu0 %v1571_v24  ;;  %879 = vmatmul.bf16.vlgmr.msra.gmra.mxu2 %v1771_v25  ;;  %v1618_v24 = vld [vmem:[%s3395_s0 + $0x60] sm:$0xf]  ;;  %v2045_v25 = vld [vmem:[%s3395_s0 + $0x64] sm:$0xf0] }
  0x22   :  { %1013 = vmatmul.bf16.vlgmr.msra.gmra.mxu1 %v1575_v26  ;;  %1138 = vmatmul.bf16.vlgmr.msra.gmra.mxu3 %v1775_v27  ;;  %v1818_v26 = vld [vmem:[%s3395_s0 + $0x1f0] sm:$0xf]  ;;  %v2095_v27 = vld [vmem:[%s3395_s0 + $0x1f4] sm:$0xf0]  ;;  %v1619_v32 = vor.u32 %v2045_v25, %v1618_v24 }
  0x23   :  { %v1819_v33 = vor.u32 %v2095_v27, %v1818_v26  ;;  %v1647_v26 = vor.u32 %v2050_v12, %v1644_v13  ;;  %v1847_v27 = vor.u32 %v2100_v16, %v1844_v17  ;;  %v1658_v13 = vld [vmem:[%s3395_s0 + $0xb0] sm:$0xf]  ;;  %v2105_v16 = vld [vmem:[%s3395_s0 + $0x244] sm:$0xf0]  ;;  %v2054_v17 = vld [vmem:[%s3395_s0 + $0xb4] sm:$0xf] }
  0x31   :  { %759 = vmatmul.bf16.gmra.mxu0 %v1579_v36  ;;  %884 = vmatmul.bf16.gmra.mxu2 %v1779_v37  ;;  %v1626_v36 = vld [vmem:[%s3395_s0 + $0x70] sm:$0xf]  ;;  %v2047_v37 = vld [vmem:[%s3395_s0 + $0x74] sm:$0xf0] }
  0x32   :  { %1018 = vmatmul.bf16.gmra.mxu1 %v1583_v38  ;;  %1143 = vmatmul.bf16.gmra.mxu3 %v1783_v39  ;;  %v1826_v38 = vld [vmem:[%s3395_s0 + $0x200] sm:$0xf]  ;;  %v2097_v39 = vld [vmem:[%s3395_s0 + $0x204] sm:$0xf0]  ;;  %v1627_v44 = vor.u32 %v2047_v37, %v1626_v36 }
  0x33   :  { %v1827_v45 = vor.u32 %v2097_v39, %v1826_v38 }
  0x41   :  { %764 = vmatmul.bf16.gmra.mxu0 %v1587_v48  ;;  %889 = vmatmul.bf16.gmra.mxu2 %v1787_v49  ;;  %v1634_v48 = vld [vmem:[%s3395_s0 + $0x80] sm:$0xf]  ;;  %v2049_v49 = vld [vmem:[%s3395_s0 + $0x84] sm:$0xf0] }
  0x42   :  { %1023 = vmatmul.bf16.gmra.mxu1 %v1591_v50  ;;  %1148 = vmatmul.bf16.gmra.mxu3 %v1791_v51  ;;  %v1834_v50 = vld [vmem:[%s3395_s0 + $0x210] sm:$0xf]  ;;  %v2099_v51 = vld [vmem:[%s3395_s0 + $0x214] sm:$0xf0]  ;;  %v1635_v56 = vor.u32 %v2049_v49, %v1634_v48 }
  0x43   :  { %v1835_v57 = vor.u32 %v2099_v51, %v1834_v50  ;;  %v2102_v50 = vld [vmem:[%s3395_s0 + $0x234] sm:$0xf]  ;;  %v1852_v51 = vld [vmem:[%s3395_s0 + $0x238] sm:$0xf0] }
  0x51   :  { %769 = vmatmul.bf16.gmra.mxu0 %v1595_v60  ;;  %894 = vmatmul.bf16.gmra.mxu2 %v1795_v61  ;;  %v1839_v60 = vor.u32 %v2098_v54, %v1836_v55  ;;  %v2752_v61 = vld [vmem:[%s3394_s2] ss:$0 sm:$0xff] }
  0x52   :  { %1028 = vmatmul.bf16.gmra.mxu1 %v1599_v62  ;;  %1153 = vmatmul.bf16.gmra.mxu3 %v1799_v63 }
  0x61   :  { %774 = vmatmul.bf16.gmra.mxu0 %v1603_v8  ;;  %899 = vmatmul.bf16.gmra.mxu2 %v1803_v9  ;;  %v1642_v8 = vld [vmem:[%s3395_s0 + $0x90] sm:$0xf]  ;;  %v2051_v9 = vld [vmem:[%s3395_s0 + $0x94] sm:$0xf0] }
  0x62   :  { %1033 = vmatmul.bf16.gmra.mxu1 %v1607_v10  ;;  %1158 = vmatmul.bf16.gmra.mxu3 %v1807_v11  ;;  %v1842_v10 = vld [vmem:[%s3395_s0 + $0x220] sm:$0xf]  ;;  %v2101_v11 = vld [vmem:[%s3395_s0 + $0x224] sm:$0xf0]  ;;  %v1643_v19 = vor.u32 %v2051_v9, %v1642_v8 }
  0x63   :  { %v1843_v24 = vor.u32 %v2101_v11, %v1842_v10 }
  0x71   :  { %779 = vmatmul.bf16.gmra.mxu0 %v1611_v20  ;;  %904 = vmatmul.bf16.gmra.mxu2 %v1811_v21 }
  0x72   :  { %1038 = vmatmul.bf16.gmra.mxu1 %v1615_v22  ;;  %1163 = vmatmul.bf16.gmra.mxu3 %v1815_v23 }
  0x81   :  { %784 = vmatmul.bf16.gmra.mxu0 %v1619_v32  ;;  %909 = vmatmul.bf16.gmra.mxu2 %v1819_v33 }
  0x82   :  { %1043 = vmatmul.bf16.gmra.mxu1 %v1623_v34  ;;  %1168 = vmatmul.bf16.gmra.mxu3 %v1823_v35 }
  0x91   :  { %789 = vmatmul.bf16.gmra.mxu0 %v1627_v44  ;;  %914 = vmatmul.bf16.gmra.mxu2 %v1827_v45  ;;  %v1850_v44 = vld [vmem:[%s3395_s0 + $0x230] sm:$0xf]  ;;  %v2103_v45 = vld [vmem:[%s3395_s0 + $0x234] sm:$0xf0] }
  0x92   :  { %1048 = vmatmul.bf16.gmra.mxu1 %v1631_v46  ;;  %1173 = vmatmul.bf16.gmra.mxu3 %v1831_v47  ;;  %v2052_v46 = vld [vmem:[%s3395_s0 + $0xa4] sm:$0xf]  ;;  %v1652_v47 = vld [vmem:[%s3395_s0 + $0xa8] sm:$0xf0] }
  0x9e   :  { %v755_v58 = vpop.f32.mrf.mxu0 }
  0x9f   :  { %v1014_v62 = vpop.f32.mrf.mxu1  ;;  %v756_v63 = vadd.f32 %v2752_v61, %v755_v58  ;;  %v1851_v58 = vor.u32 %v2103_v45, %v1850_v44 }
  0xa1   :  { %794 = vmatmul.bf16.gmra.mxu0 %v1635_v56  ;;  %919 = vmatmul.bf16.gmra.mxu2 %v1835_v57  ;;  %v1015_v3 = vadd.f32 %v1014_v62, %v756_v63  ;;  %v1855_v62 = vor.u32 %v2102_v50, %v1852_v51  ;;  %v2107_v50 = vld [vmem:[%s3395_s0 + $0x254] sm:$0xf0]  ;;  %v2056_v51 = vld [vmem:[%s3395_s0 + $0xc4] sm:$0xf] }
  0xa2   :  { %1053 = vmatmul.bf16.gmra.mxu1 %v1639_v59  ;;  %1178 = vmatmul.bf16.gmra.mxu3 %v1839_v60  ;;  %v1655_v60 = vor.u32 %v2052_v46, %v1652_v47  ;;  %v1666_v47 = vld [vmem:[%s3395_s0 + $0xc0] sm:$0xf] }
  0xa3   :  { %v1264_v14 = vmax.f32 %v1015_v3, 0.0 }
  0xa4   :  { %v880_v0 = vpop.f32.mrf.mxu2 }
  0xa5   :  { %v1139_v1 = vpop.f32.mrf.mxu3  ;;  %v881_v6 = vadd.f32 %v2752_v61, %v880_v0 }
  0xa6   :  { %v757_v2 = vpop.f32.mrf.mxu0 }
  0xa7   :  { %v758_v4 = vadd.f32 %v2752_v61, %v757_v2  ;;  %v1016_v5 = vpop.f32.mrf.mxu1  ;;  %v1140_v20 = vadd.f32 %v1139_v1, %v881_v6 }
  0xa9   :  { %v1017_v7 = vadd.f32 %v1016_v5, %v758_v4  ;;  %v1314_v30 = vmax.f32 %v1140_v20, 0.0 }
  0xab   :  { %v1265_v15 = vmax.f32 %v1017_v7, 0.0 }
  0xac   :  { %v882_v18 = vpop.f32.mrf.mxu2 }
  0xad   :  { %v2151_v21 = vpack.c.bf16 %v1265_v15, %v1264_v14  ;;  %v883_v22 = vadd.f32 %v2752_v61, %v882_v18  ;;  %v1141_v23 = vpop.f32.mrf.mxu3  ;;  %v2055_v14 = vld [vmem:[%s3395_s0 + $0xb4] sm:$0xf0]  ;;  %v1858_v15 = vld [vmem:[%s3395_s0 + $0x240] sm:$0xf]  ;;  %v1660_v18 = vld [vmem:[%s3395_s0 + $0xb8] sm:$0xf0] }
  0xae   :  { %v760_v25 = vpop.f32.mrf.mxu0 }
  0xaf   :  { %2152 = vst [vmem:[%s3396_s3] sm:$0xff] %v2151_v21   ;;  %v1142_v28 = vadd.f32 %v1141_v23, %v883_v22  ;;  %v1019_v29 = vpop.f32.mrf.mxu1  ;;  %v761_v33 = vadd.f32 %v2752_v61, %v760_v25  ;;  %v2104_v21 = vld [vmem:[%s3395_s0 + $0x244] sm:$0xf]  ;;  %v1860_v22 = vld [vmem:[%s3395_s0 + $0x248] sm:$0xf0] }
  0xb1   :  { %v1315_v31 = vmax.f32 %v1142_v28, 0.0  ;;  %799 = vmatmul.bf16.gmra.mxu0 %v1643_v19  ;;  %924 = vmatmul.bf16.gmra.mxu2 %v1843_v24  ;;  %v1020_v37 = vadd.f32 %v1019_v29, %v761_v33  ;;  %v1659_v24 = vor.u32 %v2055_v14, %v1658_v13  ;;  %v1859_v29 = vor.u32 %v2105_v16, %v1858_v15 }
  0xb2   :  { %1058 = vmatmul.bf16.gmra.mxu1 %v1647_v26  ;;  %1183 = vmatmul.bf16.gmra.mxu3 %v1847_v27 }
  0xb3   :  { %v2276_v32 = vpack.c.bf16 %v1315_v31, %v1314_v30  ;;  %v1266_v48 = vmax.f32 %v1020_v37, 0.0  ;;  %v1663_v31 = vor.u32 %v2054_v17, %v1660_v18  ;;  %v1674_v18 = vld [vmem:[%s3395_s0 + $0xd0] sm:$0xf] }
  0xb4   :  { %v885_v34 = vpop.f32.mrf.mxu2 }
  0xb5   :  { %2422 = vst [vmem:[%s3396_s3 + $0xc8] sm:$0xff] %v2276_v32   ;;  %v1144_v35 = vpop.f32.mrf.mxu3  ;;  %v886_v40 = vadd.f32 %v2752_v61, %v885_v34  ;;  %v1863_v32 = vor.u32 %v2104_v21, %v1860_v22  ;;  %v2109_v21 = vld [vmem:[%s3395_s0 + $0x264] sm:$0xf0]  ;;  %v2058_v22 = vld [vmem:[%s3395_s0 + $0xd4] sm:$0xf] }
  0xb6   :  { %v762_v36 = vpop.f32.mrf.mxu0 }
  0xb7   :  { %v763_v38 = vadd.f32 %v2752_v61, %v762_v36  ;;  %v1021_v39 = vpop.f32.mrf.mxu1  ;;  %v1145_v54 = vadd.f32 %v1144_v35, %v886_v40 }
  0xb9   :  { %v1022_v41 = vadd.f32 %v1021_v39, %v763_v38  ;;  %v1316_v1 = vmax.f32 %v1145_v54, 0.0 }
  0xbb   :  { %v1267_v49 = vmax.f32 %v1022_v41, 0.0 }
  0xbc   :  { %v887_v52 = vpop.f32.mrf.mxu2 }
  0xbd   :  { %v2156_v55 = vpack.c.bf16 %v1267_v49, %v1266_v48  ;;  %v888_v56 = vadd.f32 %v2752_v61, %v887_v52  ;;  %v1146_v57 = vpop.f32.mrf.mxu3  ;;  %v2057_v48 = vld [vmem:[%s3395_s0 + $0xc4] sm:$0xf0]  ;;  %v1866_v49 = vld [vmem:[%s3395_s0 + $0x250] sm:$0xf]  ;;  %v1668_v52 = vld [vmem:[%s3395_s0 + $0xc8] sm:$0xf0] }
  0xbe   :  { %v765_v59 = vpop.f32.mrf.mxu0 }
  0xbf   :  { %2398 = vst [vmem:[%s3396_s3 + $0x8] sm:$0xff] %v2156_v55   ;;  %v1147_v63 = vadd.f32 %v1146_v57, %v888_v56  ;;  %v1024_v0 = vpop.f32.mrf.mxu1  ;;  %v766_v4 = vadd.f32 %v2752_v61, %v765_v59  ;;  %v2106_v55 = vld [vmem:[%s3395_s0 + $0x254] sm:$0xf]  ;;  %v1868_v56 = vld [vmem:[%s3395_s0 + $0x258] sm:$0xf0] }
  0xc1   :  { %v1317_v2 = vmax.f32 %v1147_v63, 0.0  ;;  %804 = vmatmul.bf16.gmra.mxu0 %v1651_v53  ;;  %929 = vmatmul.bf16.gmra.mxu2 %v1851_v58  ;;  %v1025_v8 = vadd.f32 %v1024_v0, %v766_v4  ;;  %v1667_v58 = vor.u32 %v2057_v48, %v1666_v47  ;;  %v1867_v0 = vor.u32 %v2107_v50, %v1866_v49 }
  0xc2   :  { %1063 = vmatmul.bf16.gmra.mxu1 %v1655_v60  ;;  %1188 = vmatmul.bf16.gmra.mxu3 %v1855_v62 }
  0xc3   :  { %v2281_v3 = vpack.c.bf16 %v1317_v2, %v1316_v1  ;;  %v1268_v19 = vmax.f32 %v1025_v8, 0.0  ;;  %v1671_v2 = vor.u32 %v2056_v51, %v1668_v52  ;;  %v1682_v52 = vld [vmem:[%s3395_s0 + $0xe0] sm:$0xf] }
  0xc4   :  { %v890_v5 = vpop.f32.mrf.mxu2 }
  0xc5   :  { %2423 = vst [vmem:[%s3396_s3 + $0xd0] sm:$0xff] %v2281_v3   ;;  %v1149_v6 = vpop.f32.mrf.mxu3  ;;  %v891_v11 = vadd.f32 %v2752_v61, %v890_v5  ;;  %v1871_v3 = vor.u32 %v2106_v55, %v1868_v56  ;;  %v2111_v55 = vld [vmem:[%s3395_s0 + $0x274] sm:$0xf0]  ;;  %v2060_v56 = vld [vmem:[%s3395_s0 + $0xe4] sm:$0xf] }
  0xc6   :  { %v767_v7 = vpop.f32.mrf.mxu0 }
  0xc7   :  { %v768_v9 = vadd.f32 %v2752_v61, %v767_v7  ;;  %v1026_v10 = vpop.f32.mrf.mxu1  ;;  %v1150_v25 = vadd.f32 %v1149_v6, %v891_v11 }
  0xc9   :  { %v1027_v12 = vadd.f32 %v1026_v10, %v768_v9  ;;  %v1318_v35 = vmax.f32 %v1150_v25, 0.0 }
  0xcb   :  { %v1269_v20 = vmax.f32 %v1027_v12, 0.0 }
  0xcc   :  { %v892_v23 = vpop.f32.mrf.mxu2 }
  0xcd   :  { %v2161_v26 = vpack.c.bf16 %v1269_v20, %v1268_v19  ;;  %v893_v27 = vadd.f32 %v2752_v61, %v892_v23  ;;  %v1151_v28 = vpop.f32.mrf.mxu3  ;;  %v2059_v19 = vld [vmem:[%s3395_s0 + $0xd4] sm:$0xf0]  ;;  %v1874_v20 = vld [vmem:[%s3395_s0 + $0x260] sm:$0xf]  ;;  %v1676_v23 = vld [vmem:[%s3395_s0 + $0xd8] sm:$0xf0] }
  0xce   :  { %v770_v30 = vpop.f32.mrf.mxu0 }
  0xcf   :  { %2399 = vst [vmem:[%s3396_s3 + $0x10] sm:$0xff] %v2161_v26   ;;  %v1152_v33 = vadd.f32 %v1151_v28, %v893_v27  ;;  %v1029_v34 = vpop.f32.mrf.mxu1  ;;  %v771_v38 = vadd.f32 %v2752_v61, %v770_v30  ;;  %v2108_v26 = vld [vmem:[%s3395_s0 + $0x264] sm:$0xf]  ;;  %v1876_v27 = vld [vmem:[%s3395_s0 + $0x268] sm:$0xf0] }
  0xd1   :  { %v1319_v36 = vmax.f32 %v1152_v33, 0.0  ;;  %809 = vmatmul.bf16.gmra.mxu0 %v1659_v24  ;;  %934 = vmatmul.bf16.gmra.mxu2 %v1859_v29  ;;  %v1030_v42 = vadd.f32 %v1029_v34, %v771_v38  ;;  %v1675_v29 = vor.u32 %v2059_v19, %v1674_v18  ;;  %v1875_v34 = vor.u32 %v2109_v21, %v1874_v20 }
  0xd2   :  { %1068 = vmatmul.bf16.gmra.mxu1 %v1663_v31  ;;  %1193 = vmatmul.bf16.gmra.mxu3 %v1863_v32 }
  0xd3   :  { %v2286_v37 = vpack.c.bf16 %v1319_v36, %v1318_v35  ;;  %v1270_v53 = vmax.f32 %v1030_v42, 0.0  ;;  %v1679_v36 = vor.u32 %v2058_v22, %v1676_v23  ;;  %v1690_v23 = vld [vmem:[%s3395_s0 + $0xf0] sm:$0xf] }
  0xd4   :  { %v895_v39 = vpop.f32.mrf.mxu2 }
  0xd5   :  { %2424 = vst [vmem:[%s3396_s3 + $0xd8] sm:$0xff] %v2286_v37   ;;  %v1154_v40 = vpop.f32.mrf.mxu3  ;;  %v896_v45 = vadd.f32 %v2752_v61, %v895_v39  ;;  %v1879_v37 = vor.u32 %v2108_v26, %v1876_v27  ;;  %v2113_v26 = vld [vmem:[%s3395_s0 + $0x284] sm:$0xf0]  ;;  %v2062_v27 = vld [vmem:[%s3395_s0 + $0xf4] sm:$0xf] }
  0xd6   :  { %v772_v41 = vpop.f32.mrf.mxu0 }
  0xd7   :  { %v773_v43 = vadd.f32 %v2752_v61, %v772_v41  ;;  %v1031_v44 = vpop.f32.mrf.mxu1  ;;  %v1155_v59 = vadd.f32 %v1154_v40, %v896_v45 }
  0xd9   :  { %v1032_v46 = vadd.f32 %v1031_v44, %v773_v43  ;;  %v1320_v6 = vmax.f32 %v1155_v59, 0.0 }
  0xdb   :  { %v1271_v54 = vmax.f32 %v1032_v46, 0.0 }
  0xdc   :  { %v897_v57 = vpop.f32.mrf.mxu2 }
  0xdd   :  { %v2166_v60 = vpack.c.bf16 %v1271_v54, %v1270_v53  ;;  %v898_v62 = vadd.f32 %v2752_v61, %v897_v57  ;;  %v1156_v63 = vpop.f32.mrf.mxu3  ;;  %v2061_v53 = vld [vmem:[%s3395_s0 + $0xe4] sm:$0xf0]  ;;  %v1882_v54 = vld [vmem:[%s3395_s0 + $0x270] sm:$0xf]  ;;  %v1684_v57 = vld [vmem:[%s3395_s0 + $0xe8] sm:$0xf0] }
  0xde   :  { %v775_v1 = vpop.f32.mrf.mxu0 }
  0xdf   :  { %2400 = vst [vmem:[%s3396_s3 + $0x18] sm:$0xff] %v2166_v60   ;;  %v1157_v4 = vadd.f32 %v1156_v63, %v898_v62  ;;  %v1034_v5 = vpop.f32.mrf.mxu1  ;;  %v776_v9 = vadd.f32 %v2752_v61, %v775_v1  ;;  %v2110_v60 = vld [vmem:[%s3395_s0 + $0x274] sm:$0xf]  ;;  %v1884_v62 = vld [vmem:[%s3395_s0 + $0x278] sm:$0xf0] }
  0xe1   :  { %v1321_v7 = vmax.f32 %v1157_v4, 0.0  ;;  %814 = vmatmul.bf16.gmra.mxu0 %v1667_v58  ;;  %939 = vmatmul.bf16.gmra.mxu2 %v1867_v0  ;;  %v1035_v13 = vadd.f32 %v1034_v5, %v776_v9  ;;  %v1683_v0 = vor.u32 %v2061_v53, %v1682_v52  ;;  %v1883_v5 = vor.u32 %v2111_v55, %v1882_v54 }
  0xe2   :  { %1073 = vmatmul.bf16.gmra.mxu1 %v1671_v2  ;;  %1198 = vmatmul.bf16.gmra.mxu3 %v1871_v3 }
  0xe3   :  { %v2291_v8 = vpack.c.bf16 %v1321_v7, %v1320_v6  ;;  %v1272_v24 = vmax.f32 %v1035_v13, 0.0  ;;  %v1687_v7 = vor.u32 %v2060_v56, %v1684_v57  ;;  %v1698_v57 = vld [vmem:[%s3395_s0 + $0x100] sm:$0xf] }
  0xe4   :  { %v900_v10 = vpop.f32.mrf.mxu2 }
  0xe5   :  { %2425 = vst [vmem:[%s3396_s3 + $0xe0] sm:$0xff] %v2291_v8   ;;  %v1159_v11 = vpop.f32.mrf.mxu3  ;;  %v901_v16 = vadd.f32 %v2752_v61, %v900_v10  ;;  %v1887_v8 = vor.u32 %v2110_v60, %v1884_v62  ;;  %v2115_v60 = vld [vmem:[%s3395_s0 + $0x294] sm:$0xf0]  ;;  %v2064_v62 = vld [vmem:[%s3395_s0 + $0x104] sm:$0xf] }
  0xe6   :  { %v777_v12 = vpop.f32.mrf.mxu0 }
  0xe7   :  { %v778_v14 = vadd.f32 %v2752_v61, %v777_v12  ;;  %v1036_v15 = vpop.f32.mrf.mxu1  ;;  %v1160_v30 = vadd.f32 %v1159_v11, %v901_v16 }
  0xe9   :  { %v1037_v17 = vadd.f32 %v1036_v15, %v778_v14  ;;  %v1322_v40 = vmax.f32 %v1160_v30, 0.0 }
  0xeb   :  { %v1273_v25 = vmax.f32 %v1037_v17, 0.0 }
  0xec   :  { %v902_v28 = vpop.f32.mrf.mxu2 }
  0xed   :  { %v2171_v31 = vpack.c.bf16 %v1273_v25, %v1272_v24  ;;  %v903_v32 = vadd.f32 %v2752_v61, %v902_v28  ;;  %v1161_v33 = vpop.f32.mrf.mxu3  ;;  %v2063_v24 = vld [vmem:[%s3395_s0 + $0xf4] sm:$0xf0]  ;;  %v1890_v25 = vld [vmem:[%s3395_s0 + $0x280] sm:$0xf]  ;;  %v1692_v28 = vld [vmem:[%s3395_s0 + $0xf8] sm:$0xf0] }
  0xee   :  { %v780_v35 = vpop.f32.mrf.mxu0 }
  0xef   :  { %2401 = vst [vmem:[%s3396_s3 + $0x20] sm:$0xff] %v2171_v31   ;;  %v1162_v38 = vadd.f32 %v1161_v33, %v903_v32  ;;  %v1039_v39 = vpop.f32.mrf.mxu1  ;;  %v781_v43 = vadd.f32 %v2752_v61, %v780_v35  ;;  %v2112_v31 = vld [vmem:[%s3395_s0 + $0x284] sm:$0xf]  ;;  %v1892_v32 = vld [vmem:[%s3395_s0 + $0x288] sm:$0xf0] }
  0xf1   :  { %v1323_v41 = vmax.f32 %v1162_v38, 0.0  ;;  %819 = vmatmul.bf16.gmra.mxu0 %v1675_v29  ;;  %944 = vmatmul.bf16.gmra.mxu2 %v1875_v34  ;;  %v1040_v47 = vadd.f32 %v1039_v39, %v781_v43  ;;  %v1691_v34 = vor.u32 %v2063_v24, %v1690_v23  ;;  %v1891_v39 = vor.u32 %v2113_v26, %v1890_v25 }
  0xf2   :  { %1078 = vmatmul.bf16.gmra.mxu1 %v1679_v36  ;;  %1203 = vmatmul.bf16.gmra.mxu3 %v1879_v37 }
  0xf3   :  { %v2296_v42 = vpack.c.bf16 %v1323_v41, %v1322_v40  ;;  %v1274_v58 = vmax.f32 %v1040_v47, 0.0  ;;  %v1695_v41 = vor.u32 %v2062_v27, %v1692_v28  ;;  %v1706_v28 = vld [vmem:[%s3395_s0 + $0x110] sm:$0xf] }
  0xf4   :  { %v905_v44 = vpop.f32.mrf.mxu2 }
  0xf5   :  { %2426 = vst [vmem:[%s3396_s3 + $0xe8] sm:$0xff] %v2296_v42   ;;  %v1164_v45 = vpop.f32.mrf.mxu3  ;;  %v906_v50 = vadd.f32 %v2752_v61, %v905_v44  ;;  %v1895_v42 = vor.u32 %v2112_v31, %v1892_v32  ;;  %v2117_v31 = vld [vmem:[%s3395_s0 + $0x2a4] sm:$0xf0]  ;;  %v2066_v32 = vld [vmem:[%s3395_s0 + $0x114] sm:$0xf] }
  0xf6   :  { %v782_v46 = vpop.f32.mrf.mxu0 }
  0xf7   :  { %v783_v48 = vadd.f32 %v2752_v61, %v782_v46  ;;  %v1041_v49 = vpop.f32.mrf.mxu1  ;;  %v1165_v1 = vadd.f32 %v1164_v45, %v906_v50 }
  0xf9   :  { %v1042_v51 = vadd.f32 %v1041_v49, %v783_v48  ;;  %v1324_v11 = vmax.f32 %v1165_v1, 0.0 }
  0xfb   :  { %v1275_v59 = vmax.f32 %v1042_v51, 0.0 }
  0xfc   :  { %v907_v63 = vpop.f32.mrf.mxu2 }
  0xfd   :  { %v2176_v2 = vpack.c.bf16 %v1275_v59, %v1274_v58  ;;  %v908_v3 = vadd.f32 %v2752_v61, %v907_v63  ;;  %v1166_v4 = vpop.f32.mrf.mxu3  ;;  %v2065_v58 = vld [vmem:[%s3395_s0 + $0x104] sm:$0xf0]  ;;  %v1898_v59 = vld [vmem:[%s3395_s0 + $0x290] sm:$0xf]  ;;  %v1700_v63 = vld [vmem:[%s3395_s0 + $0x108] sm:$0xf0] }
  0xfe   :  { %v785_v6 = vpop.f32.mrf.mxu0 }
  0xff   :  { %2402 = vst [vmem:[%s3396_s3 + $0x28] sm:$0xff] %v2176_v2   ;;  %v1167_v9 = vadd.f32 %v1166_v4, %v908_v3  ;;  %v1044_v10 = vpop.f32.mrf.mxu1  ;;  %v786_v14 = vadd.f32 %v2752_v61, %v785_v6  ;;  %v2114_v2 = vld [vmem:[%s3395_s0 + $0x294] sm:$0xf]  ;;  %v1900_v3 = vld [vmem:[%s3395_s0 + $0x298] sm:$0xf0] }
 0x101   :  { %v1325_v12 = vmax.f32 %v1167_v9, 0.0  ;;  %824 = vmatmul.bf16.gmra.mxu0 %v1683_v0  ;;  %949 = vmatmul.bf16.gmra.mxu2 %v1883_v5  ;;  %v1045_v18 = vadd.f32 %v1044_v10, %v786_v14  ;;  %v1699_v5 = vor.u32 %v2065_v58, %v1698_v57  ;;  %v1899_v10 = vor.u32 %v2115_v60, %v1898_v59 }
 0x102   :  { %1083 = vmatmul.bf16.gmra.mxu1 %v1687_v7  ;;  %1208 = vmatmul.bf16.gmra.mxu3 %v1887_v8 }
 0x103   :  { %v2301_v13 = vpack.c.bf16 %v1325_v12, %v1324_v11  ;;  %v1276_v29 = vmax.f32 %v1045_v18, 0.0  ;;  %v1703_v12 = vor.u32 %v2064_v62, %v1700_v63  ;;  %v1714_v63 = vld [vmem:[%s3395_s0 + $0x120] sm:$0xf] }
 0x104   :  { %v910_v15 = vpop.f32.mrf.mxu2 }
 0x105   :  { %2427 = vst [vmem:[%s3396_s3 + $0xf0] sm:$0xff] %v2301_v13   ;;  %v1169_v16 = vpop.f32.mrf.mxu3  ;;  %v911_v21 = vadd.f32 %v2752_v61, %v910_v15  ;;  %v1903_v13 = vor.u32 %v2114_v2, %v1900_v3  ;;  %v2119_v2 = vld [vmem:[%s3395_s0 + $0x2b4] sm:$0xf0]  ;;  %v2068_v3 = vld [vmem:[%s3395_s0 + $0x124] sm:$0xf] }
 0x106   :  { %v787_v17 = vpop.f32.mrf.mxu0 }
 0x107   :  { %v788_v19 = vadd.f32 %v2752_v61, %v787_v17  ;;  %v1046_v20 = vpop.f32.mrf.mxu1  ;;  %v1170_v35 = vadd.f32 %v1169_v16, %v911_v21 }
 0x109   :  { %v1047_v22 = vadd.f32 %v1046_v20, %v788_v19  ;;  %v1326_v45 = vmax.f32 %v1170_v35, 0.0 }
 0x10b   :  { %v1277_v30 = vmax.f32 %v1047_v22, 0.0 }
 0x10c   :  { %v912_v33 = vpop.f32.mrf.mxu2 }
 0x10d   :  { %v2181_v36 = vpack.c.bf16 %v1277_v30, %v1276_v29  ;;  %v913_v37 = vadd.f32 %v2752_v61, %v912_v33  ;;  %v1171_v38 = vpop.f32.mrf.mxu3  ;;  %v2067_v29 = vld [vmem:[%s3395_s0 + $0x114] sm:$0xf0]  ;;  %v1906_v30 = vld [vmem:[%s3395_s0 + $0x2a0] sm:$0xf]  ;;  %v1708_v33 = vld [vmem:[%s3395_s0 + $0x118] sm:$0xf0] }
 0x10e   :  { %v790_v40 = vpop.f32.mrf.mxu0 }
 0x10f   :  { %2403 = vst [vmem:[%s3396_s3 + $0x30] sm:$0xff] %v2181_v36   ;;  %v1172_v43 = vadd.f32 %v1171_v38, %v913_v37  ;;  %v1049_v44 = vpop.f32.mrf.mxu1  ;;  %v791_v48 = vadd.f32 %v2752_v61, %v790_v40  ;;  %v2116_v36 = vld [vmem:[%s3395_s0 + $0x2a4] sm:$0xf]  ;;  %v1908_v37 = vld [vmem:[%s3395_s0 + $0x2a8] sm:$0xf0] }
 0x111   :  { %v1327_v46 = vmax.f32 %v1172_v43, 0.0  ;;  %829 = vmatmul.bf16.gmra.mxu0 %v1691_v34  ;;  %954 = vmatmul.bf16.gmra.mxu2 %v1891_v39  ;;  %v1050_v52 = vadd.f32 %v1049_v44, %v791_v48  ;;  %v1707_v39 = vor.u32 %v2067_v29, %v1706_v28  ;;  %v1907_v44 = vor.u32 %v2117_v31, %v1906_v30 }
 0x112   :  { %1088 = vmatmul.bf16.gmra.mxu1 %v1695_v41  ;;  %1213 = vmatmul.bf16.gmra.mxu3 %v1895_v42 }
 0x113   :  { %v2306_v47 = vpack.c.bf16 %v1327_v46, %v1326_v45  ;;  %v1278_v0 = vmax.f32 %v1050_v52, 0.0  ;;  %v1711_v46 = vor.u32 %v2066_v32, %v1708_v33  ;;  %v1722_v33 = vld [vmem:[%s3395_s0 + $0x130] sm:$0xf] }
 0x114   :  { %v915_v49 = vpop.f32.mrf.mxu2 }
 0x115   :  { %2428 = vst [vmem:[%s3396_s3 + $0xf8] sm:$0xff] %v2306_v47   ;;  %v1174_v50 = vpop.f32.mrf.mxu3  ;;  %v916_v55 = vadd.f32 %v2752_v61, %v915_v49  ;;  %v1911_v47 = vor.u32 %v2116_v36, %v1908_v37  ;;  %v2121_v36 = vld [vmem:[%s3395_s0 + $0x2c4] sm:$0xf0]  ;;  %v2070_v37 = vld [vmem:[%s3395_s0 + $0x134] sm:$0xf] }
 0x116   :  { %v792_v51 = vpop.f32.mrf.mxu0 }
 0x117   :  { %v793_v53 = vadd.f32 %v2752_v61, %v792_v51  ;;  %v1051_v54 = vpop.f32.mrf.mxu1  ;;  %v1175_v6 = vadd.f32 %v1174_v50, %v916_v55 }
 0x119   :  { %v1052_v56 = vadd.f32 %v1051_v54, %v793_v53  ;;  %v1328_v16 = vmax.f32 %v1175_v6, 0.0 }
 0x11b   :  { %v1279_v1 = vmax.f32 %v1052_v56, 0.0 }
 0x11c   :  { %v917_v4 = vpop.f32.mrf.mxu2 }
 0x11d   :  { %v2186_v7 = vpack.c.bf16 %v1279_v1, %v1278_v0  ;;  %v918_v8 = vadd.f32 %v2752_v61, %v917_v4  ;;  %v1176_v9 = vpop.f32.mrf.mxu3  ;;  %v2069_v0 = vld [vmem:[%s3395_s0 + $0x124] sm:$0xf0]  ;;  %v1914_v1 = vld [vmem:[%s3395_s0 + $0x2b0] sm:$0xf]  ;;  %v1716_v4 = vld [vmem:[%s3395_s0 + $0x128] sm:$0xf0] }
 0x11e   :  { %v795_v11 = vpop.f32.mrf.mxu0 }
 0x11f   :  { %2404 = vst [vmem:[%s3396_s3 + $0x38] sm:$0xff] %v2186_v7   ;;  %v1177_v14 = vadd.f32 %v1176_v9, %v918_v8  ;;  %v1054_v15 = vpop.f32.mrf.mxu1  ;;  %v796_v19 = vadd.f32 %v2752_v61, %v795_v11  ;;  %v2118_v7 = vld [vmem:[%s3395_s0 + $0x2b4] sm:$0xf]  ;;  %v1916_v8 = vld [vmem:[%s3395_s0 + $0x2b8] sm:$0xf0] }
 0x121   :  { %v1329_v17 = vmax.f32 %v1177_v14, 0.0  ;;  %834 = vmatmul.bf16.gmra.mxu0 %v1699_v5  ;;  %959 = vmatmul.bf16.gmra.mxu2 %v1899_v10  ;;  %v1055_v23 = vadd.f32 %v1054_v15, %v796_v19  ;;  %v1715_v10 = vor.u32 %v2069_v0, %v1714_v63  ;;  %v1915_v15 = vor.u32 %v2119_v2, %v1914_v1 }
 0x122   :  { %1093 = vmatmul.bf16.gmra.mxu1 %v1703_v12  ;;  %1218 = vmatmul.bf16.gmra.mxu3 %v1903_v13 }
 0x123   :  { %v2311_v18 = vpack.c.bf16 %v1329_v17, %v1328_v16  ;;  %v1280_v34 = vmax.f32 %v1055_v23, 0.0  ;;  %v1719_v17 = vor.u32 %v2068_v3, %v1716_v4  ;;  %v1730_v4 = vld [vmem:[%s3395_s0 + $0x140] sm:$0xf] }
 0x124   :  { %v920_v20 = vpop.f32.mrf.mxu2 }
 0x125   :  { %2429 = vst [vmem:[%s3396_s3 + $0x100] sm:$0xff] %v2311_v18   ;;  %v1179_v21 = vpop.f32.mrf.mxu3  ;;  %v921_v26 = vadd.f32 %v2752_v61, %v920_v20  ;;  %v1919_v18 = vor.u32 %v2118_v7, %v1916_v8  ;;  %v2123_v7 = vld [vmem:[%s3395_s0 + $0x2d4] sm:$0xf0]  ;;  %v2072_v8 = vld [vmem:[%s3395_s0 + $0x144] sm:$0xf] }
 0x126   :  { %v797_v22 = vpop.f32.mrf.mxu0 }
 0x127   :  { %v798_v24 = vadd.f32 %v2752_v61, %v797_v22  ;;  %v1056_v25 = vpop.f32.mrf.mxu1  ;;  %v1180_v40 = vadd.f32 %v1179_v21, %v921_v26 }
 0x129   :  { %v1057_v27 = vadd.f32 %v1056_v25, %v798_v24  ;;  %v1330_v50 = vmax.f32 %v1180_v40, 0.0 }
 0x12b   :  { %v1281_v35 = vmax.f32 %v1057_v27, 0.0 }
 0x12c   :  { %v922_v38 = vpop.f32.mrf.mxu2 }
 0x12d   :  { %v2191_v41 = vpack.c.bf16 %v1281_v35, %v1280_v34  ;;  %v923_v42 = vadd.f32 %v2752_v61, %v922_v38  ;;  %v1181_v43 = vpop.f32.mrf.mxu3  ;;  %v2071_v34 = vld [vmem:[%s3395_s0 + $0x134] sm:$0xf0]  ;;  %v1922_v35 = vld [vmem:[%s3395_s0 + $0x2c0] sm:$0xf]  ;;  %v1724_v38 = vld [vmem:[%s3395_s0 + $0x138] sm:$0xf0] }
 0x12e   :  { %v800_v45 = vpop.f32.mrf.mxu0 }
 0x12f   :  { %2405 = vst [vmem:[%s3396_s3 + $0x40] sm:$0xff] %v2191_v41   ;;  %v1182_v48 = vadd.f32 %v1181_v43, %v923_v42  ;;  %v1059_v49 = vpop.f32.mrf.mxu1  ;;  %v801_v53 = vadd.f32 %v2752_v61, %v800_v45  ;;  %v2120_v41 = vld [vmem:[%s3395_s0 + $0x2c4] sm:$0xf]  ;;  %v1924_v42 = vld [vmem:[%s3395_s0 + $0x2c8] sm:$0xf0] }
 0x131   :  { %v1331_v51 = vmax.f32 %v1182_v48, 0.0  ;;  %839 = vmatmul.bf16.gmra.mxu0 %v1707_v39  ;;  %964 = vmatmul.bf16.gmra.mxu2 %v1907_v44  ;;  %v1060_v57 = vadd.f32 %v1059_v49, %v801_v53  ;;  %v1723_v44 = vor.u32 %v2071_v34, %v1722_v33  ;;  %v1923_v49 = vor.u32 %v2121_v36, %v1922_v35 }
 0x132   :  { %1098 = vmatmul.bf16.gmra.mxu1 %v1711_v46  ;;  %1223 = vmatmul.bf16.gmra.mxu3 %v1911_v47 }
 0x133   :  { %v2316_v52 = vpack.c.bf16 %v1331_v51, %v1330_v50  ;;  %v1282_v5 = vmax.f32 %v1060_v57, 0.0  ;;  %v1727_v51 = vor.u32 %v2070_v37, %v1724_v38  ;;  %v1738_v38 = vld [vmem:[%s3395_s0 + $0x150] sm:$0xf] }
 0x134   :  { %v925_v54 = vpop.f32.mrf.mxu2 }
 0x135   :  { %2430 = vst [vmem:[%s3396_s3 + $0x108] sm:$0xff] %v2316_v52   ;;  %v1184_v55 = vpop.f32.mrf.mxu3  ;;  %v926_v60 = vadd.f32 %v2752_v61, %v925_v54  ;;  %v1927_v52 = vor.u32 %v2120_v41, %v1924_v42  ;;  %v2125_v41 = vld [vmem:[%s3395_s0 + $0x2e4] sm:$0xf0]  ;;  %v2074_v42 = vld [vmem:[%s3395_s0 + $0x154] sm:$0xf] }
 0x136   :  { %v802_v56 = vpop.f32.mrf.mxu0 }
 0x137   :  { %v803_v58 = vadd.f32 %v2752_v61, %v802_v56  ;;  %v1061_v59 = vpop.f32.mrf.mxu1  ;;  %v1185_v11 = vadd.f32 %v1184_v55, %v926_v60 }
 0x139   :  { %v1062_v62 = vadd.f32 %v1061_v59, %v803_v58  ;;  %v1332_v21 = vmax.f32 %v1185_v11, 0.0 }
 0x13b   :  { %v1283_v6 = vmax.f32 %v1062_v62, 0.0 }
 0x13c   :  { %v927_v9 = vpop.f32.mrf.mxu2 }
 0x13d   :  { %v2196_v12 = vpack.c.bf16 %v1283_v6, %v1282_v5  ;;  %v928_v13 = vadd.f32 %v2752_v61, %v927_v9  ;;  %v1186_v14 = vpop.f32.mrf.mxu3  ;;  %v2073_v5 = vld [vmem:[%s3395_s0 + $0x144] sm:$0xf0]  ;;  %v1930_v6 = vld [vmem:[%s3395_s0 + $0x2d0] sm:$0xf]  ;;  %v1732_v9 = vld [vmem:[%s3395_s0 + $0x148] sm:$0xf0] }
 0x13e   :  { %v805_v16 = vpop.f32.mrf.mxu0 }
 0x13f   :  { %2406 = vst [vmem:[%s3396_s3 + $0x48] sm:$0xff] %v2196_v12   ;;  %v1187_v19 = vadd.f32 %v1186_v14, %v928_v13  ;;  %v1064_v20 = vpop.f32.mrf.mxu1  ;;  %v806_v24 = vadd.f32 %v2752_v61, %v805_v16  ;;  %v2122_v12 = vld [vmem:[%s3395_s0 + $0x2d4] sm:$0xf]  ;;  %v1932_v13 = vld [vmem:[%s3395_s0 + $0x2d8] sm:$0xf0] }
 0x141   :  { %v1333_v22 = vmax.f32 %v1187_v19, 0.0  ;;  %844 = vmatmul.bf16.gmra.mxu0 %v1715_v10  ;;  %969 = vmatmul.bf16.gmra.mxu2 %v1915_v15  ;;  %v1065_v28 = vadd.f32 %v1064_v20, %v806_v24  ;;  %v1731_v15 = vor.u32 %v2073_v5, %v1730_v4  ;;  %v1931_v20 = vor.u32 %v2123_v7, %v1930_v6 }
 0x142   :  { %1103 = vmatmul.bf16.gmra.mxu1 %v1719_v17  ;;  %1228 = vmatmul.bf16.gmra.mxu3 %v1919_v18 }
 0x143   :  { %v2321_v23 = vpack.c.bf16 %v1333_v22, %v1332_v21  ;;  %v1284_v39 = vmax.f32 %v1065_v28, 0.0  ;;  %v1735_v22 = vor.u32 %v2072_v8, %v1732_v9  ;;  %v1746_v9 = vld [vmem:[%s3395_s0 + $0x160] sm:$0xf] }
 0x144   :  { %v930_v25 = vpop.f32.mrf.mxu2 }
 0x145   :  { %2431 = vst [vmem:[%s3396_s3 + $0x110] sm:$0xff] %v2321_v23   ;;  %v1189_v26 = vpop.f32.mrf.mxu3  ;;  %v931_v31 = vadd.f32 %v2752_v61, %v930_v25  ;;  %v1935_v23 = vor.u32 %v2122_v12, %v1932_v13  ;;  %v2127_v12 = vld [vmem:[%s3395_s0 + $0x2f4] sm:$0xf0]  ;;  %v2076_v13 = vld [vmem:[%s3395_s0 + $0x164] sm:$0xf] }
 0x146   :  { %v807_v27 = vpop.f32.mrf.mxu0 }
 0x147   :  { %v808_v29 = vadd.f32 %v2752_v61, %v807_v27  ;;  %v1066_v30 = vpop.f32.mrf.mxu1  ;;  %v1190_v45 = vadd.f32 %v1189_v26, %v931_v31 }
 0x149   :  { %v1067_v32 = vadd.f32 %v1066_v30, %v808_v29  ;;  %v1334_v55 = vmax.f32 %v1190_v45, 0.0 }
 0x14b   :  { %v1285_v40 = vmax.f32 %v1067_v32, 0.0 }
 0x14c   :  { %v932_v43 = vpop.f32.mrf.mxu2 }
 0x14d   :  { %v2201_v46 = vpack.c.bf16 %v1285_v40, %v1284_v39  ;;  %v933_v47 = vadd.f32 %v2752_v61, %v932_v43  ;;  %v1191_v48 = vpop.f32.mrf.mxu3  ;;  %v2075_v39 = vld [vmem:[%s3395_s0 + $0x154] sm:$0xf0]  ;;  %v1938_v40 = vld [vmem:[%s3395_s0 + $0x2e0] sm:$0xf]  ;;  %v1740_v43 = vld [vmem:[%s3395_s0 + $0x158] sm:$0xf0] }
 0x14e   :  { %v810_v50 = vpop.f32.mrf.mxu0 }
 0x14f   :  { %2407 = vst [vmem:[%s3396_s3 + $0x50] sm:$0xff] %v2201_v46   ;;  %v1192_v53 = vadd.f32 %v1191_v48, %v933_v47  ;;  %v1069_v54 = vpop.f32.mrf.mxu1  ;;  %v811_v58 = vadd.f32 %v2752_v61, %v810_v50  ;;  %v2124_v46 = vld [vmem:[%s3395_s0 + $0x2e4] sm:$0xf]  ;;  %v1940_v47 = vld [vmem:[%s3395_s0 + $0x2e8] sm:$0xf0] }
 0x151   :  { %v1335_v56 = vmax.f32 %v1192_v53, 0.0  ;;  %849 = vmatmul.bf16.gmra.mxu0 %v1723_v44  ;;  %974 = vmatmul.bf16.gmra.mxu2 %v1923_v49  ;;  %v1070_v63 = vadd.f32 %v1069_v54, %v811_v58  ;;  %v1739_v49 = vor.u32 %v2075_v39, %v1738_v38  ;;  %v1939_v54 = vor.u32 %v2125_v41, %v1938_v40 }
 0x152   :  { %1108 = vmatmul.bf16.gmra.mxu1 %v1727_v51  ;;  %1233 = vmatmul.bf16.gmra.mxu3 %v1927_v52 }
 0x153   :  { %v2326_v57 = vpack.c.bf16 %v1335_v56, %v1334_v55  ;;  %v1286_v10 = vmax.f32 %v1070_v63, 0.0  ;;  %v1743_v56 = vor.u32 %v2074_v42, %v1740_v43  ;;  %v1754_v43 = vld [vmem:[%s3395_s0 + $0x170] sm:$0xf] }
 0x154   :  { %v935_v59 = vpop.f32.mrf.mxu2 }
 0x155   :  { %2432 = vst [vmem:[%s3396_s3 + $0x118] sm:$0xff] %v2326_v57   ;;  %v1194_v60 = vpop.f32.mrf.mxu3  ;;  %v936_v2 = vadd.f32 %v2752_v61, %v935_v59  ;;  %v1943_v57 = vor.u32 %v2124_v46, %v1940_v47  ;;  %v2129_v46 = vld [vmem:[%s3395_s0 + $0x304] sm:$0xf0]  ;;  %v2078_v47 = vld [vmem:[%s3395_s0 + $0x174] sm:$0xf] }
 0x156   :  { %v812_v62 = vpop.f32.mrf.mxu0 }
 0x157   :  { %v813_v0 = vadd.f32 %v2752_v61, %v812_v62  ;;  %v1071_v1 = vpop.f32.mrf.mxu1  ;;  %v1195_v16 = vadd.f32 %v1194_v60, %v936_v2 }
 0x159   :  { %v1072_v3 = vadd.f32 %v1071_v1, %v813_v0  ;;  %v1336_v26 = vmax.f32 %v1195_v16, 0.0 }
 0x15b   :  { %v1287_v11 = vmax.f32 %v1072_v3, 0.0 }
 0x15c   :  { %v937_v14 = vpop.f32.mrf.mxu2 }
 0x15d   :  { %v2206_v17 = vpack.c.bf16 %v1287_v11, %v1286_v10  ;;  %v938_v18 = vadd.f32 %v2752_v61, %v937_v14  ;;  %v1196_v19 = vpop.f32.mrf.mxu3  ;;  %v2077_v10 = vld [vmem:[%s3395_s0 + $0x164] sm:$0xf0]  ;;  %v1946_v11 = vld [vmem:[%s3395_s0 + $0x2f0] sm:$0xf]  ;;  %v1748_v14 = vld [vmem:[%s3395_s0 + $0x168] sm:$0xf0] }
 0x15e   :  { %v815_v21 = vpop.f32.mrf.mxu0 }
 0x15f   :  { %2408 = vst [vmem:[%s3396_s3 + $0x58] sm:$0xff] %v2206_v17   ;;  %v1197_v24 = vadd.f32 %v1196_v19, %v938_v18  ;;  %v1074_v25 = vpop.f32.mrf.mxu1  ;;  %v816_v29 = vadd.f32 %v2752_v61, %v815_v21  ;;  %v2126_v17 = vld [vmem:[%s3395_s0 + $0x2f4] sm:$0xf]  ;;  %v1948_v18 = vld [vmem:[%s3395_s0 + $0x2f8] sm:$0xf0] }
 0x161   :  { %v1337_v27 = vmax.f32 %v1197_v24, 0.0  ;;  %854 = vmatmul.bf16.gmra.mxu0 %v1731_v15  ;;  %979 = vmatmul.bf16.gmra.mxu2 %v1931_v20  ;;  %v1075_v33 = vadd.f32 %v1074_v25, %v816_v29  ;;  %v1747_v20 = vor.u32 %v2077_v10, %v1746_v9  ;;  %v1947_v25 = vor.u32 %v2127_v12, %v1946_v11 }
 0x162   :  { %1113 = vmatmul.bf16.gmra.mxu1 %v1735_v22  ;;  %1238 = vmatmul.bf16.gmra.mxu3 %v1935_v23 }
 0x163   :  { %v2331_v28 = vpack.c.bf16 %v1337_v27, %v1336_v26  ;;  %v1288_v44 = vmax.f32 %v1075_v33, 0.0  ;;  %v1751_v27 = vor.u32 %v2076_v13, %v1748_v14  ;;  %v1762_v14 = vld [vmem:[%s3395_s0 + $0x180] sm:$0xf] }
 0x164   :  { %v940_v30 = vpop.f32.mrf.mxu2 }
 0x165   :  { %2433 = vst [vmem:[%s3396_s3 + $0x120] sm:$0xff] %v2331_v28   ;;  %v1199_v31 = vpop.f32.mrf.mxu3  ;;  %v941_v36 = vadd.f32 %v2752_v61, %v940_v30  ;;  %v1951_v28 = vor.u32 %v2126_v17, %v1948_v18  ;;  %v2131_v17 = vld [vmem:[%s3395_s0 + $0x314] sm:$0xf0]  ;;  %v2080_v18 = vld [vmem:[%s3395_s0 + $0x184] sm:$0xf] }
 0x166   :  { %v817_v32 = vpop.f32.mrf.mxu0 }
 0x167   :  { %v818_v34 = vadd.f32 %v2752_v61, %v817_v32  ;;  %v1076_v35 = vpop.f32.mrf.mxu1  ;;  %v1200_v50 = vadd.f32 %v1199_v31, %v941_v36 }
 0x169   :  { %v1077_v37 = vadd.f32 %v1076_v35, %v818_v34  ;;  %v1338_v60 = vmax.f32 %v1200_v50, 0.0 }
 0x16b   :  { %v1289_v45 = vmax.f32 %v1077_v37, 0.0 }
 0x16c   :  { %v942_v48 = vpop.f32.mrf.mxu2 }
 0x16d   :  { %v2211_v51 = vpack.c.bf16 %v1289_v45, %v1288_v44  ;;  %v943_v52 = vadd.f32 %v2752_v61, %v942_v48  ;;  %v1201_v53 = vpop.f32.mrf.mxu3  ;;  %v3196_v61 = vld [vmem:[%s3394_s2] ss:$0 sm:$0xff]  ;;  %v2079_v44 = vld [vmem:[%s3395_s0 + $0x174] sm:$0xf0]  ;;  %v1756_v48 = vld [vmem:[%s3395_s0 + $0x178] sm:$0xf0] }
 0x16e   :  { %v820_v55 = vpop.f32.mrf.mxu0  ;;  %v1954_v45 = vld [vmem:[%s3395_s0 + $0x300] sm:$0xf] }
 0x16f   :  { %2409 = vst [vmem:[%s3396_s3 + $0x60] sm:$0xff] %v2211_v51   ;;  %v1202_v58 = vadd.f32 %v1201_v53, %v943_v52  ;;  %v1079_v59 = vpop.f32.mrf.mxu1  ;;  %v821_v0 = vadd.f32 %v3196_v61, %v820_v55  ;;  %v2128_v51 = vld [vmem:[%s3395_s0 + $0x304] sm:$0xf]  ;;  %v1956_v52 = vld [vmem:[%s3395_s0 + $0x308] sm:$0xf0] }
 0x171   :  { %v1339_v62 = vmax.f32 %v1202_v58, 0.0  ;;  %859 = vmatmul.bf16.gmra.mxu0 %v1739_v49  ;;  %984 = vmatmul.bf16.gmra.mxu2 %v1939_v54  ;;  %v1080_v4 = vadd.f32 %v1079_v59, %v821_v0  ;;  %v1755_v54 = vor.u32 %v2079_v44, %v1754_v43  ;;  %v1955_v59 = vor.u32 %v2129_v46, %v1954_v45 }
 0x172   :  { %1118 = vmatmul.bf16.gmra.mxu1 %v1743_v56  ;;  %1243 = vmatmul.bf16.gmra.mxu3 %v1943_v57 }
 0x173   :  { %v2336_v63 = vpack.c.bf16 %v1339_v62, %v1338_v60  ;;  %v1290_v15 = vmax.f32 %v1080_v4, 0.0  ;;  %v1759_v62 = vor.u32 %v2078_v47, %v1756_v48 }
 0x174   :  { %v945_v1 = vpop.f32.mrf.mxu2 }
 0x175   :  { %2434 = vst [vmem:[%s3396_s3 + $0x128] sm:$0xff] %v2336_v63   ;;  %v1204_v2 = vpop.f32.mrf.mxu3  ;;  %v946_v7 = vadd.f32 %v3196_v61, %v945_v1  ;;  %v1959_v63 = vor.u32 %v2128_v51, %v1956_v52 }
 0x176   :  { %v822_v3 = vpop.f32.mrf.mxu0 }
 0x177   :  { %v823_v5 = vadd.f32 %v3196_v61, %v822_v3  ;;  %v1081_v6 = vpop.f32.mrf.mxu1  ;;  %v1205_v21 = vadd.f32 %v1204_v2, %v946_v7 }
 0x179   :  { %v1082_v8 = vadd.f32 %v1081_v6, %v823_v5  ;;  %v1340_v31 = vmax.f32 %v1205_v21, 0.0 }
 0x17b   :  { %v1291_v16 = vmax.f32 %v1082_v8, 0.0 }
 0x17c   :  { %v947_v19 = vpop.f32.mrf.mxu2 }
 0x17d   :  { %v2216_v22 = vpack.c.bf16 %v1291_v16, %v1290_v15  ;;  %v948_v23 = vadd.f32 %v3196_v61, %v947_v19  ;;  %v1206_v24 = vpop.f32.mrf.mxu3  ;;  %v2081_v15 = vld [vmem:[%s3395_s0 + $0x184] sm:$0xf0]  ;;  %v1962_v16 = vld [vmem:[%s3395_s0 + $0x310] sm:$0xf]  ;;  %v1764_v19 = vld [vmem:[%s3395_s0 + $0x188] sm:$0xf0] }
 0x17e   :  { %v825_v26 = vpop.f32.mrf.mxu0 }
 0x17f   :  { %2410 = vst [vmem:[%s3396_s3 + $0x68] sm:$0xff] %v2216_v22   ;;  %v1207_v29 = vadd.f32 %v1206_v24, %v948_v23  ;;  %v1084_v30 = vpop.f32.mrf.mxu1  ;;  %v826_v34 = vadd.f32 %v3196_v61, %v825_v26  ;;  %v2130_v22 = vld [vmem:[%s3395_s0 + $0x314] sm:$0xf]  ;;  %v1964_v23 = vld [vmem:[%s3395_s0 + $0x318] sm:$0xf0] }
 0x181   :  { %v1341_v32 = vmax.f32 %v1207_v29, 0.0  ;;  %864 = vmatmul.bf16.gmra.mxu0 %v1747_v20  ;;  %989 = vmatmul.bf16.gmra.mxu2 %v1947_v25  ;;  %v1085_v38 = vadd.f32 %v1084_v30, %v826_v34  ;;  %v1763_v25 = vor.u32 %v2081_v15, %v1762_v14  ;;  %v1963_v30 = vor.u32 %v2131_v17, %v1962_v16 }
 0x182   :  { %1123 = vmatmul.bf16.gmra.mxu1 %v1751_v27  ;;  %1248 = vmatmul.bf16.gmra.mxu3 %v1951_v28 }
 0x183   :  { %v2341_v33 = vpack.c.bf16 %v1341_v32, %v1340_v31  ;;  %v1292_v49 = vmax.f32 %v1085_v38, 0.0  ;;  %v1767_v32 = vor.u32 %v2080_v18, %v1764_v19 }
 0x184   :  { %v950_v35 = vpop.f32.mrf.mxu2 }
 0x185   :  { %2435 = vst [vmem:[%s3396_s3 + $0x130] sm:$0xff] %v2341_v33   ;;  %v1209_v36 = vpop.f32.mrf.mxu3  ;;  %v951_v41 = vadd.f32 %v3196_v61, %v950_v35  ;;  %v1967_v33 = vor.u32 %v2130_v22, %v1964_v23 }
 0x186   :  { %v827_v37 = vpop.f32.mrf.mxu0 }
 0x187   :  { %v828_v39 = vadd.f32 %v3196_v61, %v827_v37  ;;  %v1086_v40 = vpop.f32.mrf.mxu1  ;;  %v1210_v55 = vadd.f32 %v1209_v36, %v951_v41 }
 0x189   :  { %v1087_v42 = vadd.f32 %v1086_v40, %v828_v39  ;;  %v1342_v2 = vmax.f32 %v1210_v55, 0.0 }
 0x18b   :  { %v1293_v50 = vmax.f32 %v1087_v42, 0.0 }
 0x18c   :  { %v952_v53 = vpop.f32.mrf.mxu2 }
 0x18d   :  { %v2221_v56 = vpack.c.bf16 %v1293_v50, %v1292_v49  ;;  %v953_v57 = vadd.f32 %v3196_v61, %v952_v53  ;;  %v1211_v58 = vpop.f32.mrf.mxu3 }
 0x18e   :  { %v830_v60 = vpop.f32.mrf.mxu0 }
 0x18f   :  { %2411 = vst [vmem:[%s3396_s3 + $0x70] sm:$0xff] %v2221_v56   ;;  %v1212_v0 = vadd.f32 %v1211_v58, %v953_v57  ;;  %v1089_v1 = vpop.f32.mrf.mxu1  ;;  %v831_v5 = vadd.f32 %v3196_v61, %v830_v60 }
 0x191   :  { %v1343_v3 = vmax.f32 %v1212_v0, 0.0  ;;  %869 = vmatmul.bf16.gmra.mxu0 %v1755_v54  ;;  %994 = vmatmul.bf16.gmra.mxu2 %v1955_v59  ;;  %v1090_v9 = vadd.f32 %v1089_v1, %v831_v5 }
 0x192   :  { %1128 = vmatmul.bf16.gmra.mxu1 %v1759_v62  ;;  %1253 = vmatmul.bf16.gmra.mxu3 %v1959_v63 }
 0x193   :  { %v2346_v4 = vpack.c.bf16 %v1343_v3, %v1342_v2  ;;  %v1294_v20 = vmax.f32 %v1090_v9, 0.0 }
 0x194   :  { %v955_v6 = vpop.f32.mrf.mxu2 }
 0x195   :  { %2436 = vst [vmem:[%s3396_s3 + $0x138] sm:$0xff] %v2346_v4   ;;  %v1214_v7 = vpop.f32.mrf.mxu3  ;;  %v956_v12 = vadd.f32 %v3196_v61, %v955_v6 }
 0x196   :  { %v832_v8 = vpop.f32.mrf.mxu0 }
 0x197   :  { %v833_v10 = vadd.f32 %v3196_v61, %v832_v8  ;;  %v1091_v11 = vpop.f32.mrf.mxu1  ;;  %v1215_v26 = vadd.f32 %v1214_v7, %v956_v12 }
 0x199   :  { %v1092_v13 = vadd.f32 %v1091_v11, %v833_v10  ;;  %v1344_v36 = vmax.f32 %v1215_v26, 0.0 }
 0x19b   :  { %v1295_v21 = vmax.f32 %v1092_v13, 0.0 }
 0x19c   :  { %v957_v24 = vpop.f32.mrf.mxu2 }
 0x19d   :  { %v2226_v27 = vpack.c.bf16 %v1295_v21, %v1294_v20  ;;  %v958_v28 = vadd.f32 %v3196_v61, %v957_v24  ;;  %v1216_v29 = vpop.f32.mrf.mxu3 }
 0x19e   :  { %v835_v31 = vpop.f32.mrf.mxu0 }
 0x19f   :  { %2412 = vst [vmem:[%s3396_s3 + $0x78] sm:$0xff] %v2226_v27   ;;  %v1217_v34 = vadd.f32 %v1216_v29, %v958_v28  ;;  %v1094_v35 = vpop.f32.mrf.mxu1  ;;  %v836_v39 = vadd.f32 %v3196_v61, %v835_v31 }
 0x1a1   :  { %v1345_v37 = vmax.f32 %v1217_v34, 0.0  ;;  %874 = vmatmul.bf16.gmra.mxu0 %v1763_v25  ;;  %999 = vmatmul.bf16.gmra.mxu2 %v1963_v30  ;;  %v1095_v43 = vadd.f32 %v1094_v35, %v836_v39 }
 0x1a2   :  { %1133 = vmatmul.bf16.gmra.mxu1 %v1767_v32  ;;  %1258 = vmatmul.bf16.gmra.mxu3 %v1967_v33 }
 0x1a3   :  { %v2351_v38 = vpack.c.bf16 %v1345_v37, %v1344_v36  ;;  %v1296_v48 = vmax.f32 %v1095_v43, 0.0 }
 0x1a4   :  { %v960_v40 = vpop.f32.mrf.mxu2 }
 0x1a5   :  { %2437 = vst [vmem:[%s3396_s3 + $0x140] sm:$0xff] %v2351_v38   ;;  %v1219_v41 = vpop.f32.mrf.mxu3  ;;  %v961_v46 = vadd.f32 %v3196_v61, %v960_v40 }
 0x1a6   :  { %v837_v42 = vpop.f32.mrf.mxu0 }
 0x1a7   :  { %v838_v44 = vadd.f32 %v3196_v61, %v837_v42  ;;  %v1096_v45 = vpop.f32.mrf.mxu1  ;;  %v1220_v51 = vadd.f32 %v1219_v41, %v961_v46 }
 0x1a9   :  { %v1097_v47 = vadd.f32 %v1096_v45, %v838_v44  ;;  %v1346_v58 = vmax.f32 %v1220_v51, 0.0 }
 0x1ab   :  { %v1297_v49 = vmax.f32 %v1097_v47, 0.0 }
 0x1ac   :  { %v962_v50 = vpop.f32.mrf.mxu2 }
 0x1ad   :  { %v2231_v52 = vpack.c.bf16 %v1297_v49, %v1296_v48  ;;  %v963_v53 = vadd.f32 %v3196_v61, %v962_v50  ;;  %v1221_v54 = vpop.f32.mrf.mxu3 }
 0x1ae   :  { %v840_v55 = vpop.f32.mrf.mxu0 }
 0x1af   :  { %2413 = vst [vmem:[%s3396_s3 + $0x80] sm:$0xff] %v2231_v52   ;;  %v1222_v56 = vadd.f32 %v1221_v54, %v963_v53  ;;  %v1099_v57 = vpop.f32.mrf.mxu1  ;;  %v841_v62 = vadd.f32 %v3196_v61, %v840_v55 }
 0x1b1   :  { %v1347_v59 = vmax.f32 %v1222_v56, 0.0  ;;  %v1100_v2 = vadd.f32 %v1099_v57, %v841_v62 }
 0x1b3   :  { %v2356_v60 = vpack.c.bf16 %v1347_v59, %v1346_v58  ;;  %v1298_v7 = vmax.f32 %v1100_v2, 0.0 }
 0x1b4   :  { %v965_v63 = vpop.f32.mrf.mxu2 }
 0x1b5   :  { %2438 = vst [vmem:[%s3396_s3 + $0x148] sm:$0xff] %v2356_v60   ;;  %v1224_v0 = vpop.f32.mrf.mxu3  ;;  %v966_v5 = vadd.f32 %v3196_v61, %v965_v63 }
 0x1b6   :  { %v842_v1 = vpop.f32.mrf.mxu0 }
 0x1b7   :  { %v843_v3 = vadd.f32 %v3196_v61, %v842_v1  ;;  %v1101_v4 = vpop.f32.mrf.mxu1  ;;  %v1225_v10 = vadd.f32 %v1224_v0, %v966_v5 }
 0x1b9   :  { %v1102_v6 = vadd.f32 %v1101_v4, %v843_v3  ;;  %v1348_v17 = vmax.f32 %v1225_v10, 0.0 }
 0x1bb   :  { %v1299_v8 = vmax.f32 %v1102_v6, 0.0 }
 0x1bc   :  { %v967_v9 = vpop.f32.mrf.mxu2 }
 0x1bd   :  { %v2236_v11 = vpack.c.bf16 %v1299_v8, %v1298_v7  ;;  %v968_v12 = vadd.f32 %v3196_v61, %v967_v9  ;;  %v1226_v13 = vpop.f32.mrf.mxu3 }
 0x1be   :  { %v845_v14 = vpop.f32.mrf.mxu0 }
 0x1bf   :  { %2414 = vst [vmem:[%s3396_s3 + $0x88] sm:$0xff] %v2236_v11   ;;  %v1227_v15 = vadd.f32 %v1226_v13, %v968_v12  ;;  %v1104_v16 = vpop.f32.mrf.mxu1  ;;  %v846_v20 = vadd.f32 %v3196_v61, %v845_v14 }
 0x1c1   :  { %v1349_v18 = vmax.f32 %v1227_v15, 0.0  ;;  %v1105_v24 = vadd.f32 %v1104_v16, %v846_v20 }
 0x1c3   :  { %v2361_v19 = vpack.c.bf16 %v1349_v18, %v1348_v17  ;;  %v1300_v29 = vmax.f32 %v1105_v24, 0.0 }
 0x1c4   :  { %v970_v21 = vpop.f32.mrf.mxu2 }
 0x1c5   :  { %2439 = vst [vmem:[%s3396_s3 + $0x150] sm:$0xff] %v2361_v19   ;;  %v1229_v22 = vpop.f32.mrf.mxu3  ;;  %v971_v27 = vadd.f32 %v3196_v61, %v970_v21 }
 0x1c6   :  { %v847_v23 = vpop.f32.mrf.mxu0 }
 0x1c7   :  { %v848_v25 = vadd.f32 %v3196_v61, %v847_v23  ;;  %v1106_v26 = vpop.f32.mrf.mxu1  ;;  %v1230_v32 = vadd.f32 %v1229_v22, %v971_v27 }
 0x1c9   :  { %v1107_v28 = vadd.f32 %v1106_v26, %v848_v25  ;;  %v1350_v39 = vmax.f32 %v1230_v32, 0.0 }
 0x1cb   :  { %v1301_v30 = vmax.f32 %v1107_v28, 0.0 }
 0x1cc   :  { %v972_v31 = vpop.f32.mrf.mxu2 }
 0x1cd   :  { %v2241_v33 = vpack.c.bf16 %v1301_v30, %v1300_v29  ;;  %v973_v34 = vadd.f32 %v3196_v61, %v972_v31  ;;  %v1231_v35 = vpop.f32.mrf.mxu3 }
 0x1ce   :  { %v850_v36 = vpop.f32.mrf.mxu0 }
 0x1cf   :  { %2415 = vst [vmem:[%s3396_s3 + $0x90] sm:$0xff] %v2241_v33   ;;  %v1232_v37 = vadd.f32 %v1231_v35, %v973_v34  ;;  %v1109_v38 = vpop.f32.mrf.mxu1  ;;  %v851_v42 = vadd.f32 %v3196_v61, %v850_v36 }
 0x1d1   :  { %v1351_v40 = vmax.f32 %v1232_v37, 0.0  ;;  %v1110_v46 = vadd.f32 %v1109_v38, %v851_v42 }
 0x1d3   :  { %v2366_v41 = vpack.c.bf16 %v1351_v40, %v1350_v39  ;;  %v1302_v51 = vmax.f32 %v1110_v46, 0.0 }
 0x1d4   :  { %v975_v43 = vpop.f32.mrf.mxu2 }
 0x1d5   :  { %2440 = vst [vmem:[%s3396_s3 + $0x158] sm:$0xff] %v2366_v41   ;;  %v1234_v44 = vpop.f32.mrf.mxu3  ;;  %v976_v49 = vadd.f32 %v3196_v61, %v975_v43 }
 0x1d6   :  { %v852_v45 = vpop.f32.mrf.mxu0 }
 0x1d7   :  { %v853_v47 = vadd.f32 %v3196_v61, %v852_v45  ;;  %v1111_v48 = vpop.f32.mrf.mxu1  ;;  %v1235_v54 = vadd.f32 %v1234_v44, %v976_v49 }
 0x1d9   :  { %v1112_v50 = vadd.f32 %v1111_v48, %v853_v47  ;;  %v1352_v62 = vmax.f32 %v1235_v54, 0.0 }
 0x1db   :  { %v1303_v52 = vmax.f32 %v1112_v50, 0.0 }
 0x1dc   :  { %v977_v53 = vpop.f32.mrf.mxu2 }
 0x1dd   :  { %v2246_v55 = vpack.c.bf16 %v1303_v52, %v1302_v51  ;;  %v978_v56 = vadd.f32 %v3196_v61, %v977_v53  ;;  %v1236_v57 = vpop.f32.mrf.mxu3 }
 0x1de   :  { %v855_v58 = vpop.f32.mrf.mxu0 }
 0x1df   :  { %2416 = vst [vmem:[%s3396_s3 + $0x98] sm:$0xff] %v2246_v55   ;;  %v1237_v59 = vadd.f32 %v1236_v57, %v978_v56  ;;  %v1114_v60 = vpop.f32.mrf.mxu1  ;;  %v856_v1 = vadd.f32 %v3196_v61, %v855_v58 }
 0x1e1   :  { %v1353_v63 = vmax.f32 %v1237_v59, 0.0  ;;  %v1115_v5 = vadd.f32 %v1114_v60, %v856_v1 }
 0x1e3   :  { %v2371_v0 = vpack.c.bf16 %v1353_v63, %v1352_v62  ;;  %v1304_v10 = vmax.f32 %v1115_v5, 0.0 }
 0x1e4   :  { %v980_v2 = vpop.f32.mrf.mxu2 }
 0x1e5   :  { %2441 = vst [vmem:[%s3396_s3 + $0x160] sm:$0xff] %v2371_v0   ;;  %v1239_v3 = vpop.f32.mrf.mxu3  ;;  %v981_v8 = vadd.f32 %v3196_v61, %v980_v2 }
 0x1e6   :  { %v857_v4 = vpop.f32.mrf.mxu0 }
 0x1e7   :  { %v858_v6 = vadd.f32 %v3196_v61, %v857_v4  ;;  %v1116_v7 = vpop.f32.mrf.mxu1  ;;  %v1240_v13 = vadd.f32 %v1239_v3, %v981_v8 }
 0x1e9   :  { %v1117_v9 = vadd.f32 %v1116_v7, %v858_v6  ;;  %v1354_v20 = vmax.f32 %v1240_v13, 0.0 }
 0x1eb   :  { %v1305_v11 = vmax.f32 %v1117_v9, 0.0 }
 0x1ec   :  { %v982_v12 = vpop.f32.mrf.mxu2 }
 0x1ed   :  { %v2251_v14 = vpack.c.bf16 %v1305_v11, %v1304_v10  ;;  %v983_v15 = vadd.f32 %v3196_v61, %v982_v12  ;;  %v1241_v16 = vpop.f32.mrf.mxu3 }
 0x1ee   :  { %v860_v17 = vpop.f32.mrf.mxu0 }
 0x1ef   :  { %2417 = vst [vmem:[%s3396_s3 + $0xa0] sm:$0xff] %v2251_v14   ;;  %v1242_v18 = vadd.f32 %v1241_v16, %v983_v15  ;;  %v1119_v19 = vpop.f32.mrf.mxu1  ;;  %v861_v23 = vadd.f32 %v3196_v61, %v860_v17 }
 0x1f1   :  { %v1355_v21 = vmax.f32 %v1242_v18, 0.0  ;;  %v1120_v27 = vadd.f32 %v1119_v19, %v861_v23 }
 0x1f3   :  { %v2376_v22 = vpack.c.bf16 %v1355_v21, %v1354_v20  ;;  %v1306_v32 = vmax.f32 %v1120_v27, 0.0 }
 0x1f4   :  { %v985_v24 = vpop.f32.mrf.mxu2 }
 0x1f5   :  { %2442 = vst [vmem:[%s3396_s3 + $0x168] sm:$0xff] %v2376_v22   ;;  %v1244_v25 = vpop.f32.mrf.mxu3  ;;  %v986_v30 = vadd.f32 %v3196_v61, %v985_v24 }
 0x1f6   :  { %v862_v26 = vpop.f32.mrf.mxu0 }
 0x1f7   :  { %v863_v28 = vadd.f32 %v3196_v61, %v862_v26  ;;  %v1121_v29 = vpop.f32.mrf.mxu1  ;;  %v1245_v35 = vadd.f32 %v1244_v25, %v986_v30 }
 0x1f9   :  { %v1122_v31 = vadd.f32 %v1121_v29, %v863_v28  ;;  %v1356_v42 = vmax.f32 %v1245_v35, 0.0 }
 0x1fb   :  { %v1307_v33 = vmax.f32 %v1122_v31, 0.0 }
 0x1fc   :  { %v987_v34 = vpop.f32.mrf.mxu2 }
 0x1fd   :  { %v2256_v36 = vpack.c.bf16 %v1307_v33, %v1306_v32  ;;  %v988_v37 = vadd.f32 %v3196_v61, %v987_v34  ;;  %v1246_v38 = vpop.f32.mrf.mxu3 }
 0x1fe   :  { %v865_v39 = vpop.f32.mrf.mxu0 }
 0x1ff   :  { %2418 = vst [vmem:[%s3396_s3 + $0xa8] sm:$0xff] %v2256_v36   ;;  %v1247_v40 = vadd.f32 %v1246_v38, %v988_v37  ;;  %v1124_v41 = vpop.f32.mrf.mxu1  ;;  %v866_v45 = vadd.f32 %v3196_v61, %v865_v39 }
 0x201   :  { %v1357_v43 = vmax.f32 %v1247_v40, 0.0  ;;  %v1125_v49 = vadd.f32 %v1124_v41, %v866_v45 }
 0x203   :  { %v2381_v44 = vpack.c.bf16 %v1357_v43, %v1356_v42  ;;  %v1308_v54 = vmax.f32 %v1125_v49, 0.0 }
 0x204   :  { %v990_v46 = vpop.f32.mrf.mxu2 }
 0x205   :  { %2443 = vst [vmem:[%s3396_s3 + $0x170] sm:$0xff] %v2381_v44   ;;  %v1249_v47 = vpop.f32.mrf.mxu3  ;;  %v991_v52 = vadd.f32 %v3196_v61, %v990_v46 }
 0x206   :  { %v867_v48 = vpop.f32.mrf.mxu0 }
 0x207   :  { %v868_v50 = vadd.f32 %v3196_v61, %v867_v48  ;;  %v1126_v51 = vpop.f32.mrf.mxu1  ;;  %v1250_v57 = vadd.f32 %v1249_v47, %v991_v52 }
 0x209   :  { %v1127_v53 = vadd.f32 %v1126_v51, %v868_v50  ;;  %v1358_v1 = vmax.f32 %v1250_v57, 0.0 }
 0x20b   :  { %v1309_v55 = vmax.f32 %v1127_v53, 0.0 }
 0x20c   :  { %v992_v56 = vpop.f32.mrf.mxu2 }
 0x20d   :  { %v2261_v58 = vpack.c.bf16 %v1309_v55, %v1308_v54  ;;  %v993_v59 = vadd.f32 %v3196_v61, %v992_v56  ;;  %v1251_v60 = vpop.f32.mrf.mxu3 }
 0x20e   :  { %v870_v62 = vpop.f32.mrf.mxu0 }
 0x20f   :  { %2419 = vst [vmem:[%s3396_s3 + $0xb0] sm:$0xff] %v2261_v58   ;;  %v1252_v63 = vadd.f32 %v1251_v60, %v993_v59  ;;  %v1129_v0 = vpop.f32.mrf.mxu1  ;;  %v871_v4 = vadd.f32 %v3196_v61, %v870_v62 }
 0x211   :  { %v1359_v2 = vmax.f32 %v1252_v63, 0.0  ;;  %v1130_v8 = vadd.f32 %v1129_v0, %v871_v4 }
 0x213   :  { %v2386_v3 = vpack.c.bf16 %v1359_v2, %v1358_v1  ;;  %v1310_v13 = vmax.f32 %v1130_v8, 0.0 }
 0x214   :  { %v995_v5 = vpop.f32.mrf.mxu2 }
 0x215   :  { %2444 = vst [vmem:[%s3396_s3 + $0x178] sm:$0xff] %v2386_v3   ;;  %v1254_v6 = vpop.f32.mrf.mxu3  ;;  %v996_v11 = vadd.f32 %v3196_v61, %v995_v5 }
 0x216   :  { %v872_v7 = vpop.f32.mrf.mxu0 }
 0x217   :  { %v873_v9 = vadd.f32 %v3196_v61, %v872_v7  ;;  %v1131_v10 = vpop.f32.mrf.mxu1  ;;  %v1255_v16 = vadd.f32 %v1254_v6, %v996_v11 }
 0x219   :  { %v1132_v12 = vadd.f32 %v1131_v10, %v873_v9  ;;  %v1360_v23 = vmax.f32 %v1255_v16, 0.0 }
 0x21b   :  { %v1311_v14 = vmax.f32 %v1132_v12, 0.0 }
 0x21c   :  { %v997_v15 = vpop.f32.mrf.mxu2 }
 0x21d   :  { %v2266_v17 = vpack.c.bf16 %v1311_v14, %v1310_v13  ;;  %v998_v18 = vadd.f32 %v3196_v61, %v997_v15  ;;  %v1256_v19 = vpop.f32.mrf.mxu3 }
 0x21e   :  { %v875_v20 = vpop.f32.mrf.mxu0 }
 0x21f   :  { %2420 = vst [vmem:[%s3396_s3 + $0xb8] sm:$0xff] %v2266_v17   ;;  %v1257_v21 = vadd.f32 %v1256_v19, %v998_v18  ;;  %v1134_v22 = vpop.f32.mrf.mxu1  ;;  %v876_v26 = vadd.f32 %v3196_v61, %v875_v20 }
 0x221   :  { %v1361_v24 = vmax.f32 %v1257_v21, 0.0  ;;  %v1135_v30 = vadd.f32 %v1134_v22, %v876_v26 }
 0x223   :  { %v2391_v25 = vpack.c.bf16 %v1361_v24, %v1360_v23  ;;  %v1312_v35 = vmax.f32 %v1135_v30, 0.0 }
 0x224   :  { %v1000_v27 = vpop.f32.mrf.mxu2 }
 0x225   :  { %2445 = vst [vmem:[%s3396_s3 + $0x180] sm:$0xff] %v2391_v25   ;;  %v1259_v28 = vpop.f32.mrf.mxu3  ;;  %v1001_v33 = vadd.f32 %v3196_v61, %v1000_v27 }
 0x226   :  { %v877_v29 = vpop.f32.mrf.mxu0 }
 0x227   :  { %v878_v31 = vadd.f32 %v3196_v61, %v877_v29  ;;  %v1136_v32 = vpop.f32.mrf.mxu1  ;;  %v1260_v38 = vadd.f32 %v1259_v28, %v1001_v33 }
 0x229   :  { %v1137_v34 = vadd.f32 %v1136_v32, %v878_v31  ;;  %v1362_v43 = vmax.f32 %v1260_v38, 0.0 }
 0x22b   :  { %v1313_v36 = vmax.f32 %v1137_v34, 0.0 }
 0x22c   :  { %v1002_v37 = vpop.f32.mrf.mxu2 }
 0x22d   :  { %v2271_v39 = vpack.c.bf16 %v1313_v36, %v1312_v35  ;;  %v1003_v40 = vadd.f32 %v3196_v61, %v1002_v37  ;;  %v1261_v41 = vpop.f32.mrf.mxu3 }
 0x22f   :  { %2421 = vst [vmem:[%s3396_s3 + $0xc0] sm:$0xff] %v2271_v39   ;;  %v1262_v42 = vadd.f32 %v1261_v41, %v1003_v40 }
 0x231   :  { %v1363_v44 = vmax.f32 %v1262_v42, 0.0 }
 0x233   :  { %v2396_v45 = vpack.c.bf16 %v1363_v44, %v1362_v43 }
 0x235   :  { %2446 = vst [vmem:[%s3396_s3 + $0x188] sm:$0xff] %v2396_v45  }

// kernel: cnn_embedding_forward.5
= control target key start
LH: loop header
LB: loop body
LE: loop exit
PB: predicated region body
PF: predicated region fallthrough
CT: control target
= control target key end

     0   :  { %s1690_s1 = inlined_call_operand.vmem [shape: bf16[512,128], index: 1, kind: input, shape index: {}]   ;;  %s1691_s2 = inlined_call_operand.vmem [shape: f32[1,128], index: 2, kind: input, shape index: {}]   ;;  %s1692_s0 = inlined_call_operand.vmem [shape: bf16[168,512], index: 0, kind: input, shape index: {}]   ;;  %s1693_s3 = inlined_call_operand.vmem [shape: bf16[168,128], index: 3, kind: output, shape index: {}]  }
   0x1   :  { %v1184_v0 = vld [vmem:[%s1690_s1 + $0x38] sm:$0xff]  ;;  %v1183_v4 = vld [vmem:[%s1690_s1 + $0x30] sm:$0xff]  ;;  %v1182_v8 = vld [vmem:[%s1690_s1 + $0x28] sm:$0xff] }
   0x2   :  { %v1192_v1 = vld [vmem:[%s1690_s1 + $0x78] sm:$0xff]  ;;  %530 = vmatpush.bf16.msra.mxu0 %v1184_v0  ;;  %v1191_v5 = vld [vmem:[%s1690_s1 + $0x70] sm:$0xff]  ;;  %v1190_v9 = vld [vmem:[%s1690_s1 + $0x68] sm:$0xff] }
   0x3   :  { %v1200_v2 = vld [vmem:[%s1690_s1 + $0xb8] sm:$0xff]  ;;  %593 = vmatpush.bf16.msra.mxu1 %v1192_v1  ;;  %v1199_v6 = vld [vmem:[%s1690_s1 + $0xb0] sm:$0xff]  ;;  %v1198_v10 = vld [vmem:[%s1690_s1 + $0xa8] sm:$0xff] }
   0x4   :  { %v1208_v3 = vld [vmem:[%s1690_s1 + $0xf8] sm:$0xff]  ;;  %656 = vmatpush.bf16.msra.mxu2 %v1200_v2  ;;  %v1207_v7 = vld [vmem:[%s1690_s1 + $0xf0] sm:$0xff]  ;;  %v1206_v11 = vld [vmem:[%s1690_s1 + $0xe8] sm:$0xff] }
   0x5   :  { %719 = vmatpush.bf16.msra.mxu3 %v1208_v3  ;;  %v1181_v12 = vld [vmem:[%s1690_s1 + $0x20] sm:$0xff]  ;;  %v1180_v16 = vld [vmem:[%s1690_s1 + $0x18] sm:$0xff]  ;;  %v1179_v20 = vld [vmem:[%s1690_s1 + $0x10] sm:$0xff] }
   0x6   :  { %531 = vmatpush.bf16.msra.mxu0 %v1183_v4  ;;  %v1189_v13 = vld [vmem:[%s1690_s1 + $0x60] sm:$0xff]  ;;  %v1188_v17 = vld [vmem:[%s1690_s1 + $0x58] sm:$0xff]  ;;  %v1187_v21 = vld [vmem:[%s1690_s1 + $0x50] sm:$0xff] }
   0x7   :  { %594 = vmatpush.bf16.msra.mxu1 %v1191_v5  ;;  %v1197_v14 = vld [vmem:[%s1690_s1 + $0xa0] sm:$0xff]  ;;  %v1196_v18 = vld [vmem:[%s1690_s1 + $0x98] sm:$0xff]  ;;  %v1195_v22 = vld [vmem:[%s1690_s1 + $0x90] sm:$0xff] }
   0x8   :  { %657 = vmatpush.bf16.msra.mxu2 %v1199_v6  ;;  %v1205_v15 = vld [vmem:[%s1690_s1 + $0xe0] sm:$0xff]  ;;  %v1204_v19 = vld [vmem:[%s1690_s1 + $0xd8] sm:$0xff]  ;;  %v1203_v23 = vld [vmem:[%s1690_s1 + $0xd0] sm:$0xff] }
   0x9   :  { %720 = vmatpush.bf16.msra.mxu3 %v1207_v7  ;;  %v1178_v24 = vld [vmem:[%s1690_s1 + $0x8] sm:$0xff]  ;;  %v1177_v28 = vld [vmem:[%s1690_s1] sm:$0xff]  ;;  %v1139_v33 = vld [vmem:[%s1692_s0 + $0xc] sm:$0xf0] }
   0xa   :  { %532 = vmatpush.bf16.msra.mxu0 %v1182_v8  ;;  %v1186_v25 = vld [vmem:[%s1690_s1 + $0x48] sm:$0xff]  ;;  %v1185_v29 = vld [vmem:[%s1690_s1 + $0x40] sm:$0xff]  ;;  %v853_v35 = vld [vmem:[%s1692_s0 + $0x10] sm:$0xf0] }
   0xb   :  { %595 = vmatpush.bf16.msra.mxu1 %v1190_v9  ;;  %v1194_v26 = vld [vmem:[%s1690_s1 + $0x88] sm:$0xff]  ;;  %v1193_v30 = vld [vmem:[%s1690_s1 + $0x80] sm:$0xff]  ;;  %v1140_v37 = vld [vmem:[%s1692_s0 + $0x14] sm:$0xf0] }
   0xc   :  { %658 = vmatpush.bf16.msra.mxu2 %v1198_v10  ;;  %v1202_v27 = vld [vmem:[%s1690_s1 + $0xc8] sm:$0xff]  ;;  %v1201_v31 = vld [vmem:[%s1690_s1 + $0xc0] sm:$0xff]  ;;  %v861_v39 = vld [vmem:[%s1692_s0 + $0x18] sm:$0xf0] }
   0xd   :  { %721 = vmatpush.bf16.msra.mxu3 %v1206_v11  ;;  %v851_v32 = vld [vmem:[%s1692_s0] sm:$0xf]  ;;  %v1137_v34 = vld [vmem:[%s1692_s0 + $0x4] sm:$0xf]  ;;  %v859_v36 = vld [vmem:[%s1692_s0 + $0x8] sm:$0xf] }
   0xe   :  { %533 = vmatpush.bf16.msra.mxu0 %v1181_v12  ;;  %v1138_v38 = vld [vmem:[%s1692_s0 + $0xc] sm:$0xf]  ;;  %v852_v40 = vor.u32 %v1139_v33, %v851_v32  ;;  %v856_v41 = vor.u32 %v1137_v34, %v853_v35  ;;  %v860_v42 = vor.u32 %v1140_v37, %v859_v36  ;;  %v867_v44 = vld [vmem:[%s1692_s0 + $0x20] sm:$0xf]  ;;  %v1143_v45 = vld [vmem:[%s1692_s0 + $0x2c] sm:$0xf0] }
   0xf   :  { %596 = vmatpush.bf16.msra.mxu1 %v1189_v13  ;;  %v864_v43 = vor.u32 %v1138_v38, %v861_v39  ;;  %v1141_v46 = vld [vmem:[%s1692_s0 + $0x24] sm:$0xf]  ;;  %v869_v47 = vld [vmem:[%s1692_s0 + $0x30] sm:$0xf0]  ;;  %v875_v48 = vld [vmem:[%s1692_s0 + $0x28] sm:$0xf]  ;;  %v868_v52 = vor.u32 %v1143_v45, %v867_v44 }
  0x10   :  { %659 = vmatpush.bf16.msra.mxu2 %v1197_v14  ;;  %v1144_v49 = vld [vmem:[%s1692_s0 + $0x34] sm:$0xf0]  ;;  %v1142_v50 = vld [vmem:[%s1692_s0 + $0x2c] sm:$0xf]  ;;  %v877_v51 = vld [vmem:[%s1692_s0 + $0x38] sm:$0xf0]  ;;  %v872_v53 = vor.u32 %v1141_v46, %v869_v47 }
  0x11   :  { %722 = vmatpush.bf16.msra.mxu3 %v1205_v15  ;;  %v876_v54 = vor.u32 %v1144_v49, %v875_v48  ;;  %v880_v55 = vor.u32 %v1142_v50, %v877_v51  ;;  %v883_v56 = vld [vmem:[%s1692_s0 + $0x40] sm:$0xf]  ;;  %v1147_v57 = vld [vmem:[%s1692_s0 + $0x4c] sm:$0xf0]  ;;  %v1145_v58 = vld [vmem:[%s1692_s0 + $0x44] sm:$0xf] }
  0x12   :  { %534 = vmatpush.bf16.msra.mxu0 %v1180_v16  ;;  %v885_v59 = vld [vmem:[%s1692_s0 + $0x50] sm:$0xf0]  ;;  %v891_v60 = vld [vmem:[%s1692_s0 + $0x48] sm:$0xf]  ;;  %v1148_v61 = vld [vmem:[%s1692_s0 + $0x54] sm:$0xf0]  ;;  %v884_v0 = vor.u32 %v1147_v57, %v883_v56 }
  0x13   :  { %597 = vmatpush.bf16.msra.mxu1 %v1188_v17  ;;  %v1146_v62 = vld [vmem:[%s1692_s0 + $0x4c] sm:$0xf]  ;;  %v893_v63 = vld [vmem:[%s1692_s0 + $0x58] sm:$0xf0]  ;;  %v888_v1 = vor.u32 %v1145_v58, %v885_v59  ;;  %v892_v2 = vor.u32 %v1148_v61, %v891_v60  ;;  %v899_v4 = vld [vmem:[%s1692_s0 + $0x60] sm:$0xf] }
  0x14   :  { %660 = vmatpush.bf16.msra.mxu2 %v1196_v18  ;;  %v896_v3 = vor.u32 %v1146_v62, %v893_v63  ;;  %v1151_v5 = vld [vmem:[%s1692_s0 + $0x6c] sm:$0xf0]  ;;  %v1149_v6 = vld [vmem:[%s1692_s0 + $0x64] sm:$0xf]  ;;  %v901_v7 = vld [vmem:[%s1692_s0 + $0x70] sm:$0xf0] }
  0x15   :  { %723 = vmatpush.bf16.msra.mxu3 %v1204_v19  ;;  %v907_v8 = vld [vmem:[%s1692_s0 + $0x68] sm:$0xf]  ;;  %v1152_v9 = vld [vmem:[%s1692_s0 + $0x74] sm:$0xf0]  ;;  %v1150_v10 = vld [vmem:[%s1692_s0 + $0x6c] sm:$0xf]  ;;  %v900_v12 = vor.u32 %v1151_v5, %v899_v4  ;;  %v904_v13 = vor.u32 %v1149_v6, %v901_v7 }
  0x16   :  { %535 = vmatpush.bf16.msra.mxu0 %v1179_v20  ;;  %v909_v11 = vld [vmem:[%s1692_s0 + $0x78] sm:$0xf0]  ;;  %v908_v14 = vor.u32 %v1152_v9, %v907_v8  ;;  %v915_v16 = vld [vmem:[%s1692_s0 + $0x80] sm:$0xf]  ;;  %v1155_v17 = vld [vmem:[%s1692_s0 + $0x8c] sm:$0xf0] }
  0x17   :  { %598 = vmatpush.bf16.msra.mxu1 %v1187_v21  ;;  %v912_v15 = vor.u32 %v1150_v10, %v909_v11  ;;  %v1153_v18 = vld [vmem:[%s1692_s0 + $0x84] sm:$0xf]  ;;  %v917_v19 = vld [vmem:[%s1692_s0 + $0x90] sm:$0xf0]  ;;  %v923_v20 = vld [vmem:[%s1692_s0 + $0x88] sm:$0xf] }
  0x18   :  { %661 = vmatpush.bf16.msra.mxu2 %v1195_v22  ;;  %v1156_v21 = vld [vmem:[%s1692_s0 + $0x94] sm:$0xf0]  ;;  %v1154_v22 = vld [vmem:[%s1692_s0 + $0x8c] sm:$0xf]  ;;  %v939_v32 = vld [vmem:[%s1692_s0 + $0xa8] sm:$0xf] }
  0x19   :  { %724 = vmatpush.bf16.msra.mxu3 %v1203_v23  ;;  %v925_v23 = vld [vmem:[%s1692_s0 + $0x98] sm:$0xf0]  ;;  %v1160_v33 = vld [vmem:[%s1692_s0 + $0xb4] sm:$0xf0]  ;;  %v1158_v34 = vld [vmem:[%s1692_s0 + $0xac] sm:$0xf] }
  0x1a   :  { %536 = vmatpush.bf16.msra.mxu0 %v1178_v24  ;;  %v916_v24 = vor.u32 %v1155_v17, %v915_v16  ;;  %v941_v35 = vld [vmem:[%s1692_s0 + $0xb8] sm:$0xf0]  ;;  %v940_v38 = vor.u32 %v1160_v33, %v939_v32  ;;  %v955_v44 = vld [vmem:[%s1692_s0 + $0xc8] sm:$0xf]  ;;  %v1164_v45 = vld [vmem:[%s1692_s0 + $0xd4] sm:$0xf0] }
  0x1b   :  { %599 = vmatpush.bf16.msra.mxu1 %v1186_v25  ;;  %v920_v25 = vor.u32 %v1153_v18, %v917_v19  ;;  %v944_v39 = vor.u32 %v1158_v34, %v941_v35  ;;  %v1162_v46 = vld [vmem:[%s1692_s0 + $0xcc] sm:$0xf]  ;;  %v957_v47 = vld [vmem:[%s1692_s0 + $0xd8] sm:$0xf0]  ;;  %v956_v50 = vor.u32 %v1164_v45, %v955_v44  ;;  %v971_v56 = vld [vmem:[%s1692_s0 + $0xe8] sm:$0xf] }
  0x1c   :  { %662 = vmatpush.bf16.msra.mxu2 %v1194_v26  ;;  %v924_v26 = vor.u32 %v1156_v21, %v923_v20  ;;  %v960_v51 = vor.u32 %v1162_v46, %v957_v47  ;;  %v1168_v57 = vld [vmem:[%s1692_s0 + $0xf4] sm:$0xf0]  ;;  %v1166_v58 = vld [vmem:[%s1692_s0 + $0xec] sm:$0xf]  ;;  %v973_v59 = vld [vmem:[%s1692_s0 + $0xf8] sm:$0xf0] }
  0x1d   :  { %725 = vmatpush.bf16.msra.mxu3 %v1202_v27  ;;  %v928_v27 = vor.u32 %v1154_v22, %v925_v23  ;;  %v972_v62 = vor.u32 %v1168_v57, %v971_v56  ;;  %v976_v63 = vor.u32 %v1166_v58, %v973_v59  ;;  %v987_v4 = vld [vmem:[%s1692_s0 + $0x108] sm:$0xf]  ;;  %v1172_v5 = vld [vmem:[%s1692_s0 + $0x114] sm:$0xf0]  ;;  %v1170_v6 = vld [vmem:[%s1692_s0 + $0x10c] sm:$0xf] }
  0x1e   :  { %537 = vmatpush.bf16.msra.mxu0 %v1177_v28  ;;  %v931_v28 = vld [vmem:[%s1692_s0 + $0xa0] sm:$0xf]  ;;  %v989_v7 = vld [vmem:[%s1692_s0 + $0x118] sm:$0xf0]  ;;  %v1175_v23 = vld [vmem:[%s1692_s0 + $0x12c] sm:$0xf0] }
  0x1f   :  { %600 = vmatpush.bf16.msra.mxu1 %v1185_v29  ;;  %v1159_v29 = vld [vmem:[%s1692_s0 + $0xac] sm:$0xf0]  ;;  %v1604_v10 = vld [vmem:[%s1691_s2] ss:$0 sm:$0xff] }
  0x20   :  { %663 = vmatpush.bf16.msra.mxu2 %v1193_v30  ;;  %v1157_v30 = vld [vmem:[%s1692_s0 + $0xa4] sm:$0xf]  ;;  %v932_v36 = vor.u32 %v1159_v29, %v931_v28  ;;  %v995_v22 = vld [vmem:[%s1692_s0 + $0x120] sm:$0xf]  ;;  %v1176_v28 = vld [vmem:[%s1692_s0 + $0x134] sm:$0xf0] }
  0x21   :  { %726 = vmatpush.bf16.msra.mxu3 %v1201_v31  ;;  %538 = vmatmul.bf16.vlgmr.msra.gmra.mxu0 %v852_v40  ;;  %v933_v31 = vld [vmem:[%s1692_s0 + $0xb0] sm:$0xf0]  ;;  %v947_v40 = vld [vmem:[%s1692_s0 + $0xc0] sm:$0xf]  ;;  %v1174_v29 = vld [vmem:[%s1692_s0 + $0x12c] sm:$0xf]  ;;  %v996_v34 = vor.u32 %v1175_v23, %v995_v22 }
  0x22   :  { %601 = vmatmul.bf16.vlgmr.msra.gmra.mxu1 %v856_v41  ;;  %v936_v37 = vor.u32 %v1157_v30, %v933_v31  ;;  %v1163_v41 = vld [vmem:[%s1692_s0 + $0xcc] sm:$0xf0]  ;;  %v1005_v30 = vld [vmem:[%s1692_s0 + $0x138] sm:$0xf0] }
  0x23   :  { %664 = vmatmul.bf16.vlgmr.msra.gmra.mxu2 %v860_v42  ;;  %v1161_v42 = vld [vmem:[%s1692_s0 + $0xc4] sm:$0xf]  ;;  %v948_v48 = vor.u32 %v1163_v41, %v947_v40  ;;  %v1008_v41 = vor.u32 %v1174_v29, %v1005_v30 }
  0x24   :  { %727 = vmatmul.bf16.vlgmr.msra.gmra.mxu3 %v864_v43  ;;  %v949_v43 = vld [vmem:[%s1692_s0 + $0xd0] sm:$0xf0] }
  0x25   :  { %v952_v49 = vor.u32 %v1161_v42, %v949_v43 }
  0x31   :  { %543 = vmatmul.bf16.gmra.mxu0 %v868_v52  ;;  %v963_v52 = vld [vmem:[%s1692_s0 + $0xe0] sm:$0xf] }
  0x32   :  { %606 = vmatmul.bf16.gmra.mxu1 %v872_v53  ;;  %v1167_v53 = vld [vmem:[%s1692_s0 + $0xec] sm:$0xf0] }
  0x33   :  { %669 = vmatmul.bf16.gmra.mxu2 %v876_v54  ;;  %v1165_v54 = vld [vmem:[%s1692_s0 + $0xe4] sm:$0xf]  ;;  %v964_v60 = vor.u32 %v1167_v53, %v963_v52  ;;  %v55_v53 = vld [vmem:[%s1692_s0 + $0x148] sm:$0xff] }
  0x34   :  { %732 = vmatmul.bf16.gmra.mxu3 %v880_v55  ;;  %v965_v55 = vld [vmem:[%s1692_s0 + $0xf0] sm:$0xf0]  ;;  %v54_v52 = vld [vmem:[%s1692_s0 + $0x140] sm:$0xff]  ;;  %v248_v58 = vunpack.c.l.b16 %v55_v53  ;;  %v249_v59 = vunpack.c.h.b16 %v55_v53 }
  0x35   :  { %v968_v61 = vor.u32 %v1165_v54, %v965_v55  ;;  %v246_v55 = vunpack.c.l.b16 %v54_v52  ;;  %v247_v56 = vunpack.c.h.b16 %v54_v52 }
  0x41   :  { %548 = vmatmul.bf16.gmra.mxu0 %v884_v0  ;;  %v979_v0 = vld [vmem:[%s1692_s0 + $0x100] sm:$0xf] }
  0x42   :  { %611 = vmatmul.bf16.gmra.mxu1 %v888_v1  ;;  %v1171_v1 = vld [vmem:[%s1692_s0 + $0x10c] sm:$0xf0] }
  0x43   :  { %674 = vmatmul.bf16.gmra.mxu2 %v892_v2  ;;  %v1169_v2 = vld [vmem:[%s1692_s0 + $0x104] sm:$0xf]  ;;  %v980_v8 = vor.u32 %v1171_v1, %v979_v0  ;;  %v291_v0 = vpack.c.b16 %v247_v56, %v247_v56 }
  0x44   :  { %737 = vmatmul.bf16.gmra.mxu3 %v896_v3  ;;  %v981_v3 = vld [vmem:[%s1692_s0 + $0x110] sm:$0xf0] }
  0x45   :  { %v984_v9 = vor.u32 %v1169_v2, %v981_v3 }
  0x51   :  { %553 = vmatmul.bf16.gmra.mxu0 %v900_v12 }
  0x52   :  { %616 = vmatmul.bf16.gmra.mxu1 %v904_v13  ;;  %v988_v13 = vor.u32 %v1172_v5, %v987_v4  ;;  %v292_v5 = vpack.c.b16 %v248_v58, %v248_v58 }
  0x53   :  { %679 = vmatmul.bf16.gmra.mxu2 %v908_v14  ;;  %v992_v14 = vor.u32 %v1170_v6, %v989_v7  ;;  %v293_v6 = vpack.c.b16 %v249_v59, %v249_v59 }
  0x54   :  { %742 = vmatmul.bf16.gmra.mxu3 %v912_v15 }
  0x61   :  { %558 = vmatmul.bf16.gmra.mxu0 %v916_v24 }
  0x62   :  { %621 = vmatmul.bf16.gmra.mxu1 %v920_v25  ;;  %v1173_v25 = vld [vmem:[%s1692_s0 + $0x124] sm:$0xf] }
  0x63   :  { %684 = vmatmul.bf16.gmra.mxu2 %v924_v26  ;;  %v997_v26 = vld [vmem:[%s1692_s0 + $0x130] sm:$0xf0] }
  0x64   :  { %747 = vmatmul.bf16.gmra.mxu3 %v928_v27  ;;  %v1003_v27 = vld [vmem:[%s1692_s0 + $0x128] sm:$0xf]  ;;  %v1000_v35 = vor.u32 %v1173_v25, %v997_v26 }
  0x65   :  { %v1004_v40 = vor.u32 %v1176_v28, %v1003_v27 }
  0x71   :  { %563 = vmatmul.bf16.gmra.mxu0 %v932_v36 }
  0x72   :  { %626 = vmatmul.bf16.gmra.mxu1 %v936_v37 }
  0x73   :  { %689 = vmatmul.bf16.gmra.mxu2 %v940_v38 }
  0x74   :  { %752 = vmatmul.bf16.gmra.mxu3 %v944_v39 }
  0x81   :  { %568 = vmatmul.bf16.gmra.mxu0 %v948_v48 }
  0x82   :  { %631 = vmatmul.bf16.gmra.mxu1 %v952_v49 }
  0x83   :  { %694 = vmatmul.bf16.gmra.mxu2 %v956_v50 }
  0x84   :  { %757 = vmatmul.bf16.gmra.mxu3 %v960_v51 }
  0x91   :  { %573 = vmatmul.bf16.gmra.mxu0 %v964_v60 }
  0x92   :  { %636 = vmatmul.bf16.gmra.mxu1 %v968_v61 }
  0x93   :  { %699 = vmatmul.bf16.gmra.mxu2 %v972_v62 }
  0x94   :  { %762 = vmatmul.bf16.gmra.mxu3 %v976_v63  ;;  %v290_v63 = vpack.c.b16 %v246_v55, %v246_v55 }
  0x9e   :  { %v539_v11 = vpop.f32.mrf.mxu0 }
  0x9f   :  { %v602_v12 = vpop.f32.mrf.mxu1  ;;  %v540_v15 = vadd.f32 %v1604_v10, %v539_v11 }
  0xa1   :  { %578 = vmatmul.bf16.gmra.mxu0 %v980_v8  ;;  %v603_v18 = vadd.f32 %v602_v12, %v540_v15 }
  0xa2   :  { %641 = vmatmul.bf16.gmra.mxu1 %v984_v9 }
  0xa3   :  { %704 = vmatmul.bf16.gmra.mxu2 %v988_v13 }
  0xa4   :  { %767 = vmatmul.bf16.gmra.mxu3 %v992_v14 }
  0xa6   :  { %v665_v16 = vpop.f32.mrf.mxu2  ;;  %v541_v19 = vpop.f32.mrf.mxu0 }
  0xa7   :  { %v728_v17 = vpop.f32.mrf.mxu3  ;;  %v604_v20 = vpop.f32.mrf.mxu1  ;;  %v542_v21 = vadd.f32 %v1604_v10, %v541_v19  ;;  %v666_v24 = vadd.f32 %v665_v16, %v603_v18 }
  0xa9   :  { %v605_v31 = vadd.f32 %v604_v20, %v542_v21  ;;  %v729_v36 = vadd.f32 %v728_v17, %v666_v24 }
  0xab   :  { %v782_v43 = vmax.f32 %v729_v36, 0.0 }
  0xae   :  { %v667_v32 = vpop.f32.mrf.mxu2  ;;  %v544_v38 = vpop.f32.mrf.mxu0 }
  0xaf   :  { %v730_v33 = vpop.f32.mrf.mxu3  ;;  %v668_v37 = vadd.f32 %v667_v32, %v605_v31  ;;  %v607_v39 = vpop.f32.mrf.mxu1  ;;  %v545_v45 = vadd.f32 %v1604_v10, %v544_v38 }
  0xb1   :  { %v731_v42 = vadd.f32 %v730_v33, %v668_v37  ;;  %583 = vmatmul.bf16.gmra.mxu0 %v996_v34  ;;  %v608_v49 = vadd.f32 %v607_v39, %v545_v45 }
  0xb2   :  { %646 = vmatmul.bf16.gmra.mxu1 %v1000_v35 }
  0xb3   :  { %v783_v44 = vmax.f32 %v731_v42, 0.0  ;;  %709 = vmatmul.bf16.gmra.mxu2 %v1004_v40 }
  0xb4   :  { %772 = vmatmul.bf16.gmra.mxu3 %v1008_v41 }
  0xb5   :  { %v1212_v46 = vpack.c.bf16 %v783_v44, %v782_v43 }
  0xb6   :  { %v670_v47 = vpop.f32.mrf.mxu2  ;;  %v546_v50 = vpop.f32.mrf.mxu0 }
  0xb7   :  { %v733_v48 = vpop.f32.mrf.mxu3  ;;  %1213 = vst [vmem:[%s1693_s3] sm:$0xff] %v1212_v46   ;;  %v609_v51 = vpop.f32.mrf.mxu1  ;;  %v547_v54 = vadd.f32 %v1604_v10, %v546_v50  ;;  %v671_v57 = vadd.f32 %v670_v47, %v608_v49 }
  0xb9   :  { %v610_v60 = vadd.f32 %v609_v51, %v547_v54  ;;  %v734_v1 = vadd.f32 %v733_v48, %v671_v57 }
  0xbb   :  { %v784_v8 = vmax.f32 %v734_v1, 0.0 }
  0xbe   :  { %v672_v61 = vpop.f32.mrf.mxu2  ;;  %v549_v3 = vpop.f32.mrf.mxu0 }
  0xbf   :  { %v735_v62 = vpop.f32.mrf.mxu3  ;;  %v673_v2 = vadd.f32 %v672_v61, %v610_v60  ;;  %v612_v4 = vpop.f32.mrf.mxu1  ;;  %v550_v11 = vadd.f32 %v1604_v10, %v549_v3 }
  0xc1   :  { %v736_v7 = vadd.f32 %v735_v62, %v673_v2  ;;  %588 = vmatmul.bf16.gmra.mxu0 %v290_v63  ;;  %v613_v15 = vadd.f32 %v612_v4, %v550_v11 }
  0xc2   :  { %651 = vmatmul.bf16.gmra.mxu1 %v291_v0 }
  0xc3   :  { %v785_v9 = vmax.f32 %v736_v7, 0.0  ;;  %714 = vmatmul.bf16.gmra.mxu2 %v292_v5 }
  0xc4   :  { %777 = vmatmul.bf16.gmra.mxu3 %v293_v6 }
  0xc5   :  { %v1217_v12 = vpack.c.bf16 %v785_v9, %v784_v8 }
  0xc6   :  { %v675_v13 = vpop.f32.mrf.mxu2  ;;  %v551_v16 = vpop.f32.mrf.mxu0 }
  0xc7   :  { %v738_v14 = vpop.f32.mrf.mxu3  ;;  %1259 = vst [vmem:[%s1693_s3 + $0x8] sm:$0xff] %v1217_v12   ;;  %v614_v17 = vpop.f32.mrf.mxu1  ;;  %v552_v18 = vadd.f32 %v1604_v10, %v551_v16  ;;  %v676_v19 = vadd.f32 %v675_v13, %v613_v15 }
  0xc9   :  { %v615_v20 = vadd.f32 %v614_v17, %v552_v18  ;;  %v739_v23 = vadd.f32 %v738_v14, %v676_v19 }
  0xcb   :  { %v786_v28 = vmax.f32 %v739_v23, 0.0 }
  0xce   :  { %v677_v21 = vpop.f32.mrf.mxu2  ;;  %v554_v25 = vpop.f32.mrf.mxu0 }
  0xcf   :  { %v740_v22 = vpop.f32.mrf.mxu3  ;;  %v678_v24 = vadd.f32 %v677_v21, %v615_v20  ;;  %v617_v26 = vpop.f32.mrf.mxu1  ;;  %v555_v30 = vadd.f32 %v1604_v10, %v554_v25 }
  0xd1   :  { %v741_v27 = vadd.f32 %v740_v22, %v678_v24  ;;  %v618_v34 = vadd.f32 %v617_v26, %v555_v30 }
  0xd3   :  { %v787_v29 = vmax.f32 %v741_v27, 0.0 }
  0xd5   :  { %v1222_v31 = vpack.c.bf16 %v787_v29, %v786_v28 }
  0xd6   :  { %v680_v32 = vpop.f32.mrf.mxu2  ;;  %v556_v35 = vpop.f32.mrf.mxu0 }
  0xd7   :  { %v743_v33 = vpop.f32.mrf.mxu3  ;;  %1260 = vst [vmem:[%s1693_s3 + $0x10] sm:$0xff] %v1222_v31   ;;  %v619_v36 = vpop.f32.mrf.mxu1  ;;  %v557_v37 = vadd.f32 %v1604_v10, %v556_v35  ;;  %v681_v38 = vadd.f32 %v680_v32, %v618_v34 }
  0xd9   :  { %v620_v39 = vadd.f32 %v619_v36, %v557_v37  ;;  %v744_v42 = vadd.f32 %v743_v33, %v681_v38 }
  0xdb   :  { %v788_v47 = vmax.f32 %v744_v42, 0.0 }
  0xde   :  { %v682_v40 = vpop.f32.mrf.mxu2  ;;  %v559_v44 = vpop.f32.mrf.mxu0 }
  0xdf   :  { %v745_v41 = vpop.f32.mrf.mxu3  ;;  %v683_v43 = vadd.f32 %v682_v40, %v620_v39  ;;  %v622_v45 = vpop.f32.mrf.mxu1  ;;  %v560_v49 = vadd.f32 %v1604_v10, %v559_v44 }
  0xe1   :  { %v746_v46 = vadd.f32 %v745_v41, %v683_v43  ;;  %v623_v53 = vadd.f32 %v622_v45, %v560_v49 }
  0xe3   :  { %v789_v48 = vmax.f32 %v746_v46, 0.0 }
  0xe5   :  { %v1227_v50 = vpack.c.bf16 %v789_v48, %v788_v47 }
  0xe6   :  { %v685_v51 = vpop.f32.mrf.mxu2  ;;  %v561_v54 = vpop.f32.mrf.mxu0 }
  0xe7   :  { %v748_v52 = vpop.f32.mrf.mxu3  ;;  %1261 = vst [vmem:[%s1693_s3 + $0x18] sm:$0xff] %v1227_v50   ;;  %v624_v55 = vpop.f32.mrf.mxu1  ;;  %v562_v56 = vadd.f32 %v1604_v10, %v561_v54  ;;  %v686_v57 = vadd.f32 %v685_v51, %v623_v53 }
  0xe9   :  { %v625_v58 = vadd.f32 %v624_v55, %v562_v56  ;;  %v749_v61 = vadd.f32 %v748_v52, %v686_v57 }
  0xeb   :  { %v790_v2 = vmax.f32 %v749_v61, 0.0 }
  0xee   :  { %v687_v59 = vpop.f32.mrf.mxu2  ;;  %v564_v63 = vpop.f32.mrf.mxu0 }
  0xef   :  { %v750_v60 = vpop.f32.mrf.mxu3  ;;  %v688_v62 = vadd.f32 %v687_v59, %v625_v58  ;;  %v627_v0 = vpop.f32.mrf.mxu1  ;;  %v565_v4 = vadd.f32 %v1604_v10, %v564_v63 }
  0xf1   :  { %v751_v1 = vadd.f32 %v750_v60, %v688_v62  ;;  %v628_v8 = vadd.f32 %v627_v0, %v565_v4 }
  0xf3   :  { %v791_v3 = vmax.f32 %v751_v1, 0.0 }
  0xf5   :  { %v1232_v5 = vpack.c.bf16 %v791_v3, %v790_v2 }
  0xf6   :  { %v690_v6 = vpop.f32.mrf.mxu2  ;;  %v566_v9 = vpop.f32.mrf.mxu0 }
  0xf7   :  { %v753_v7 = vpop.f32.mrf.mxu3  ;;  %1262 = vst [vmem:[%s1693_s3 + $0x20] sm:$0xff] %v1232_v5   ;;  %v629_v11 = vpop.f32.mrf.mxu1  ;;  %v567_v12 = vadd.f32 %v1604_v10, %v566_v9  ;;  %v691_v13 = vadd.f32 %v690_v6, %v628_v8 }
  0xf9   :  { %v630_v14 = vadd.f32 %v629_v11, %v567_v12  ;;  %v754_v17 = vadd.f32 %v753_v7, %v691_v13 }
  0xfb   :  { %v792_v22 = vmax.f32 %v754_v17, 0.0 }
  0xfe   :  { %v692_v15 = vpop.f32.mrf.mxu2  ;;  %v569_v19 = vpop.f32.mrf.mxu0 }
  0xff   :  { %v755_v16 = vpop.f32.mrf.mxu3  ;;  %v693_v18 = vadd.f32 %v692_v15, %v630_v14  ;;  %v632_v20 = vpop.f32.mrf.mxu1  ;;  %v570_v24 = vadd.f32 %v1604_v10, %v569_v19 }
 0x101   :  { %v756_v21 = vadd.f32 %v755_v16, %v693_v18  ;;  %v633_v28 = vadd.f32 %v632_v20, %v570_v24 }
 0x103   :  { %v793_v23 = vmax.f32 %v756_v21, 0.0 }
 0x105   :  { %v1237_v25 = vpack.c.bf16 %v793_v23, %v792_v22 }
 0x106   :  { %v695_v26 = vpop.f32.mrf.mxu2  ;;  %v571_v29 = vpop.f32.mrf.mxu0 }
 0x107   :  { %v758_v27 = vpop.f32.mrf.mxu3  ;;  %1263 = vst [vmem:[%s1693_s3 + $0x28] sm:$0xff] %v1237_v25   ;;  %v634_v30 = vpop.f32.mrf.mxu1  ;;  %v572_v31 = vadd.f32 %v1604_v10, %v571_v29  ;;  %v696_v32 = vadd.f32 %v695_v26, %v633_v28 }
 0x109   :  { %v635_v33 = vadd.f32 %v634_v30, %v572_v31  ;;  %v759_v36 = vadd.f32 %v758_v27, %v696_v32 }
 0x10b   :  { %v794_v41 = vmax.f32 %v759_v36, 0.0 }
 0x10e   :  { %v697_v34 = vpop.f32.mrf.mxu2  ;;  %v574_v38 = vpop.f32.mrf.mxu0 }
 0x10f   :  { %v760_v35 = vpop.f32.mrf.mxu3  ;;  %v698_v37 = vadd.f32 %v697_v34, %v635_v33  ;;  %v637_v39 = vpop.f32.mrf.mxu1  ;;  %v575_v43 = vadd.f32 %v1604_v10, %v574_v38 }
 0x111   :  { %v761_v40 = vadd.f32 %v760_v35, %v698_v37  ;;  %v638_v47 = vadd.f32 %v637_v39, %v575_v43 }
 0x113   :  { %v795_v42 = vmax.f32 %v761_v40, 0.0 }
 0x115   :  { %v1242_v44 = vpack.c.bf16 %v795_v42, %v794_v41 }
 0x116   :  { %v700_v45 = vpop.f32.mrf.mxu2  ;;  %v576_v48 = vpop.f32.mrf.mxu0 }
 0x117   :  { %v763_v46 = vpop.f32.mrf.mxu3  ;;  %1264 = vst [vmem:[%s1693_s3 + $0x30] sm:$0xff] %v1242_v44   ;;  %v639_v49 = vpop.f32.mrf.mxu1  ;;  %v577_v50 = vadd.f32 %v1604_v10, %v576_v48  ;;  %v701_v51 = vadd.f32 %v700_v45, %v638_v47 }
 0x119   :  { %v640_v52 = vadd.f32 %v639_v49, %v577_v50  ;;  %v764_v55 = vadd.f32 %v763_v46, %v701_v51 }
 0x11b   :  { %v796_v60 = vmax.f32 %v764_v55, 0.0 }
 0x11e   :  { %v702_v53 = vpop.f32.mrf.mxu2  ;;  %v579_v57 = vpop.f32.mrf.mxu0 }
 0x11f   :  { %v765_v54 = vpop.f32.mrf.mxu3  ;;  %v703_v56 = vadd.f32 %v702_v53, %v640_v52  ;;  %v642_v58 = vpop.f32.mrf.mxu1  ;;  %v580_v62 = vadd.f32 %v1604_v10, %v579_v57 }
 0x121   :  { %v766_v59 = vadd.f32 %v765_v54, %v703_v56  ;;  %v643_v2 = vadd.f32 %v642_v58, %v580_v62 }
 0x123   :  { %v797_v61 = vmax.f32 %v766_v59, 0.0 }
 0x125   :  { %v1247_v63 = vpack.c.bf16 %v797_v61, %v796_v60 }
 0x126   :  { %v705_v0 = vpop.f32.mrf.mxu2  ;;  %v581_v3 = vpop.f32.mrf.mxu0 }
 0x127   :  { %v768_v1 = vpop.f32.mrf.mxu3  ;;  %1265 = vst [vmem:[%s1693_s3 + $0x38] sm:$0xff] %v1247_v63   ;;  %v644_v4 = vpop.f32.mrf.mxu1  ;;  %v582_v5 = vadd.f32 %v1604_v10, %v581_v3  ;;  %v706_v6 = vadd.f32 %v705_v0, %v643_v2 }
 0x129   :  { %v645_v7 = vadd.f32 %v644_v4, %v582_v5  ;;  %v769_v11 = vadd.f32 %v768_v1, %v706_v6 }
 0x12b   :  { %v798_v16 = vmax.f32 %v769_v11, 0.0 }
 0x12e   :  { %v707_v8 = vpop.f32.mrf.mxu2  ;;  %v584_v13 = vpop.f32.mrf.mxu0 }
 0x12f   :  { %v770_v9 = vpop.f32.mrf.mxu3  ;;  %v708_v12 = vadd.f32 %v707_v8, %v645_v7  ;;  %v647_v14 = vpop.f32.mrf.mxu1  ;;  %v585_v18 = vadd.f32 %v1604_v10, %v584_v13 }
 0x131   :  { %v771_v15 = vadd.f32 %v770_v9, %v708_v12  ;;  %v648_v22 = vadd.f32 %v647_v14, %v585_v18 }
 0x133   :  { %v799_v17 = vmax.f32 %v771_v15, 0.0 }
 0x135   :  { %v1252_v19 = vpack.c.bf16 %v799_v17, %v798_v16 }
 0x136   :  { %v710_v20 = vpop.f32.mrf.mxu2  ;;  %v586_v23 = vpop.f32.mrf.mxu0 }
 0x137   :  { %v773_v21 = vpop.f32.mrf.mxu3  ;;  %1266 = vst [vmem:[%s1693_s3 + $0x40] sm:$0xff] %v1252_v19   ;;  %v649_v24 = vpop.f32.mrf.mxu1  ;;  %v587_v25 = vadd.f32 %v1604_v10, %v586_v23  ;;  %v711_v26 = vadd.f32 %v710_v20, %v648_v22 }
 0x139   :  { %v650_v27 = vadd.f32 %v649_v24, %v587_v25  ;;  %v774_v30 = vadd.f32 %v773_v21, %v711_v26 }
 0x13b   :  { %v800_v36 = vmax.f32 %v774_v30, 0.0 }
 0x13e   :  { %v712_v28 = vpop.f32.mrf.mxu2  ;;  %v589_v32 = vpop.f32.mrf.mxu0 }
 0x13f   :  { %v775_v29 = vpop.f32.mrf.mxu3  ;;  %v713_v31 = vadd.f32 %v712_v28, %v650_v27  ;;  %v652_v33 = vpop.f32.mrf.mxu1  ;;  %v590_v34 = vadd.f32 %v1604_v10, %v589_v32 }
 0x141   :  { %v776_v35 = vadd.f32 %v775_v29, %v713_v31  ;;  %v653_v38 = vadd.f32 %v652_v33, %v590_v34 }
 0x143   :  { %v801_v37 = vmax.f32 %v776_v35, 0.0 }
 0x145   :  { %v1257_v39 = vpack.c.bf16 %v801_v37, %v800_v36 }
 0x146   :  { %v715_v40 = vpop.f32.mrf.mxu2  ;;  %v591_v43 = vpop.f32.mrf.mxu0 }
 0x147   :  { %v778_v41 = vpop.f32.mrf.mxu3  ;;  %1267 = vst [vmem:[%s1693_s3 + $0x48] sm:$0xff] %v1257_v39   ;;  %v716_v42 = vadd.f32 %v715_v40, %v653_v38  ;;  %v654_v44 = vpop.f32.mrf.mxu1 }
 0x149   :  { %v779_v45 = vadd.f32 %v778_v41, %v716_v42 }
 0x14b   :  { %v802_v46 = vmax.f32 %v779_v45, 0.0 }
 0x14d   :  { %v823_v47 = vpack.c.bf16 %v802_v46, %v802_v46 }
 0x14e   :  { %v717_v48 = vpop.f32.mrf.mxu2 }
 0x14f   :  { %v780_v49 = vpop.f32.mrf.mxu3  ;;  %844 = vst [vmem:[%s1693_s3 + $0x50] sm:$0xf] %v823_v47 }

// kernel: cnn_embedding_forward.6
= control target key start
LH: loop header
LB: loop body
LE: loop exit
PB: predicated region body
PF: predicated region fallthrough
CT: control target
= control target key end

     0   :  { %s1618_s1 = inlined_call_operand.vmem [shape: bf16[640,128], index: 1, kind: input, shape index: {}]   ;;  %s1619_s2 = inlined_call_operand.vmem [shape: f32[1,128], index: 2, kind: input, shape index: {}]   ;;  %s1620_s0 = inlined_call_operand.vmem [shape: bf16[104,640], index: 0, kind: input, shape index: {}]   ;;  %s1621_s3 = inlined_call_operand.vmem [shape: bf16[104,128], index: 3, kind: output, shape index: {}]  }
   0x1   :  { %v1126_v0 = vld [vmem:[%s1618_s1 + $0x38] sm:$0xff]  ;;  %v1125_v1 = vld [vmem:[%s1618_s1 + $0x30] sm:$0xff]  ;;  %v1124_v2 = vld [vmem:[%s1618_s1 + $0x28] sm:$0xff] }
   0x2   :  { %1194 = vmatpush.bf16.msra.mxu1 %v1126_v0  ;;  %1195 = vmatpush.bf16.msra.mxu2 %v1126_v0  ;;  %v1123_v3 = vld [vmem:[%s1618_s1 + $0x20] sm:$0xff]  ;;  %v1122_v4 = vld [vmem:[%s1618_s1 + $0x18] sm:$0xff]  ;;  %v1121_v5 = vld [vmem:[%s1618_s1 + $0x10] sm:$0xff] }
   0x3   :  { %1196 = vmatpush.bf16.msra.mxu3 %v1126_v0  ;;  %551 = vmatpush.bf16.msra.mxu0 %v1126_v0  ;;  %v1120_v6 = vld [vmem:[%s1618_s1 + $0x8] sm:$0xff]  ;;  %v1263_v7 = vld [vmem:[%s1620_s0 + $0xf0] sm:$0xff]  ;;  %v1119_v8 = vld [vmem:[%s1618_s1] sm:$0xff] }
   0x4   :  { %v851_v9 = vld [vmem:[%s1620_s0 + $0x50] sm:$0xf]  ;;  %v1101_v10 = vld [vmem:[%s1620_s0 + $0x60] sm:$0xf0]  ;;  %v891_v11 = vld [vmem:[%s1620_s0 + $0xa0] sm:$0xf]  ;;  %v236_v15 = vunpack.c.l.b16 %v1263_v7 }
   0x5   :  { %v1111_v12 = vld [vmem:[%s1620_s0 + $0xb0] sm:$0xf0]  ;;  %v811_v13 = vld [vmem:[%s1620_s0] sm:$0xf]  ;;  %v1150_v16 = vld [vmem:[%s1618_s1 + $0xf8] sm:$0xff]  ;;  %v852_v18 = vor.u32 %v1101_v10, %v851_v9 }
   0x6   :  { %1197 = vmatpush.bf16.msra.mxu1 %v1125_v1  ;;  %1198 = vmatpush.bf16.msra.mxu2 %v1125_v1  ;;  %v1091_v14 = vld [vmem:[%s1620_s0 + $0x10] sm:$0xf0]  ;;  %v1142_v17 = vld [vmem:[%s1618_s1 + $0xb8] sm:$0xff]  ;;  %v892_v19 = vor.u32 %v1111_v12, %v891_v11  ;;  %v271_v23 = vpack.c.b16 %v236_v15, %v236_v15  ;;  %v1148_v28 = vld [vmem:[%s1618_s1 + $0xe8] sm:$0xff] }
   0x7   :  { %1199 = vmatpush.bf16.msra.mxu3 %v1125_v1  ;;  %552 = vmatpush.bf16.msra.mxu0 %v1125_v1  ;;  %v812_v20 = vor.u32 %v1091_v14, %v811_v13  ;;  %v1134_v21 = vld [vmem:[%s1618_s1 + $0x78] sm:$0xff]  ;;  %v1149_v24 = vld [vmem:[%s1618_s1 + $0xf0] sm:$0xff]  ;;  %v1140_v29 = vld [vmem:[%s1618_s1 + $0xa8] sm:$0xff] }
   0x8   :  { %v1158_v22 = vld [vmem:[%s1618_s1 + $0x138] sm:$0xff]  ;;  %v1141_v25 = vld [vmem:[%s1618_s1 + $0xb0] sm:$0xff]  ;;  %v1132_v30 = vld [vmem:[%s1618_s1 + $0x68] sm:$0xff] }
   0x9   :  { %v1133_v26 = vld [vmem:[%s1618_s1 + $0x70] sm:$0xff]  ;;  %v1156_v31 = vld [vmem:[%s1618_s1 + $0x128] sm:$0xff]  ;;  %v1147_v32 = vld [vmem:[%s1618_s1 + $0xe0] sm:$0xff] }
   0xa   :  { %1200 = vmatpush.bf16.msra.mxu1 %v1124_v2  ;;  %1201 = vmatpush.bf16.msra.mxu2 %v1124_v2  ;;  %v1157_v27 = vld [vmem:[%s1618_s1 + $0x130] sm:$0xff]  ;;  %v1139_v33 = vld [vmem:[%s1618_s1 + $0xa0] sm:$0xff]  ;;  %v871_v35 = vld [vmem:[%s1620_s0 + $0x78] sm:$0xf] }
   0xb   :  { %1202 = vmatpush.bf16.msra.mxu3 %v1124_v2  ;;  %553 = vmatpush.bf16.msra.mxu0 %v1124_v2  ;;  %v1131_v34 = vld [vmem:[%s1618_s1 + $0x60] sm:$0xff]  ;;  %v1106_v36 = vld [vmem:[%s1620_s0 + $0x88] sm:$0xf0]  ;;  %v911_v37 = vld [vmem:[%s1620_s0 + $0xc8] sm:$0xf] }
   0xc   :  { %v1116_v38 = vld [vmem:[%s1620_s0 + $0xd8] sm:$0xf0]  ;;  %v1155_v39 = vld [vmem:[%s1618_s1 + $0x120] sm:$0xff]  ;;  %v831_v40 = vld [vmem:[%s1620_s0 + $0x28] sm:$0xf]  ;;  %v872_v44 = vor.u32 %v1106_v36, %v871_v35 }
   0xd   :  { %v1096_v41 = vld [vmem:[%s1620_s0 + $0x38] sm:$0xf0]  ;;  %v912_v45 = vor.u32 %v1116_v38, %v911_v37  ;;  %v1145_v49 = vld [vmem:[%s1618_s1 + $0xd0] sm:$0xff]  ;;  %v1144_v53 = vld [vmem:[%s1618_s1 + $0xc8] sm:$0xff] }
   0xe   :  { %1203 = vmatpush.bf16.msra.mxu1 %v1123_v3  ;;  %1204 = vmatpush.bf16.msra.mxu2 %v1123_v3  ;;  %v1146_v42 = vld [vmem:[%s1618_s1 + $0xd8] sm:$0xff]  ;;  %v832_v46 = vor.u32 %v1096_v41, %v831_v40  ;;  %v1137_v50 = vld [vmem:[%s1618_s1 + $0x90] sm:$0xff]  ;;  %v1136_v54 = vld [vmem:[%s1618_s1 + $0x88] sm:$0xff] }
   0xf   :  { %1205 = vmatpush.bf16.msra.mxu3 %v1123_v3  ;;  %554 = vmatpush.bf16.msra.mxu0 %v1123_v3  ;;  %v1138_v43 = vld [vmem:[%s1618_s1 + $0x98] sm:$0xff]  ;;  %v1129_v51 = vld [vmem:[%s1618_s1 + $0x50] sm:$0xff]  ;;  %v1128_v55 = vld [vmem:[%s1618_s1 + $0x48] sm:$0xff] }
  0x10   :  { %v1130_v47 = vld [vmem:[%s1618_s1 + $0x58] sm:$0xff]  ;;  %v1153_v52 = vld [vmem:[%s1618_s1 + $0x110] sm:$0xff]  ;;  %v1143_v56 = vld [vmem:[%s1618_s1 + $0xc0] sm:$0xff] }
  0x11   :  { %v1154_v48 = vld [vmem:[%s1618_s1 + $0x118] sm:$0xff]  ;;  %v1152_v57 = vld [vmem:[%s1618_s1 + $0x108] sm:$0xff]  ;;  %v1135_v58 = vld [vmem:[%s1618_s1 + $0x80] sm:$0xff] }
  0x12   :  { %1206 = vmatpush.bf16.msra.mxu1 %v1122_v4  ;;  %1207 = vmatpush.bf16.msra.mxu2 %v1122_v4  ;;  %v1090_v59 = vld [vmem:[%s1620_s0 + $0xc] sm:$0xf]  ;;  %v821_v60 = vld [vmem:[%s1620_s0 + $0x1c] sm:$0xf0]  ;;  %v1089_v62 = vld [vmem:[%s1620_s0 + $0x4] sm:$0xf] }
  0x13   :  { %1208 = vmatpush.bf16.msra.mxu3 %v1122_v4  ;;  %555 = vmatpush.bf16.msra.mxu0 %v1122_v4  ;;  %v1127_v61 = vld [vmem:[%s1618_s1 + $0x40] sm:$0xff]  ;;  %v813_v63 = vld [vmem:[%s1620_s0 + $0x14] sm:$0xf0]  ;;  %v819_v0 = vld [vmem:[%s1620_s0 + $0x8] sm:$0xf]  ;;  %v824_v2 = vor.u32 %v1090_v59, %v821_v60 }
  0x14   :  { %v1092_v1 = vld [vmem:[%s1620_s0 + $0x18] sm:$0xf0]  ;;  %v1151_v3 = vld [vmem:[%s1618_s1 + $0x100] sm:$0xff]  ;;  %v827_v4 = vld [vmem:[%s1620_s0 + $0x10] sm:$0xf] }
  0x15   :  { %v1095_v10 = vld [vmem:[%s1620_s0 + $0x34] sm:$0xf]  ;;  %v841_v11 = vld [vmem:[%s1620_s0 + $0x44] sm:$0xf0]  ;;  %v1094_v12 = vld [vmem:[%s1620_s0 + $0x2c] sm:$0xf] }
  0x16   :  { %1209 = vmatpush.bf16.msra.mxu1 %v1121_v5  ;;  %1210 = vmatpush.bf16.msra.mxu2 %v1121_v5  ;;  %v833_v13 = vld [vmem:[%s1620_s0 + $0x3c] sm:$0xf0]  ;;  %v839_v14 = vld [vmem:[%s1620_s0 + $0x30] sm:$0xf]  ;;  %v1097_v15 = vld [vmem:[%s1620_s0 + $0x40] sm:$0xf0] }
  0x17   :  { %1211 = vmatpush.bf16.msra.mxu3 %v1121_v5  ;;  %556 = vmatpush.bf16.msra.mxu0 %v1121_v5  ;;  %v1093_v5 = vld [vmem:[%s1620_s0 + $0x20] sm:$0xf0]  ;;  %v881_v35 = vld [vmem:[%s1620_s0 + $0x94] sm:$0xf0]  ;;  %v1104_v36 = vld [vmem:[%s1620_s0 + $0x7c] sm:$0xf] }
  0x18   :  { %v828_v9 = vor.u32 %v1093_v5, %v827_v4  ;;  %v873_v37 = vld [vmem:[%s1620_s0 + $0x8c] sm:$0xf0]  ;;  %v879_v38 = vld [vmem:[%s1620_s0 + $0x80] sm:$0xf]  ;;  %v887_v41 = vld [vmem:[%s1620_s0 + $0x88] sm:$0xf] }
  0x19   :  { %v921_v59 = vld [vmem:[%s1620_s0 + $0xe4] sm:$0xf0]  ;;  %v1114_v60 = vld [vmem:[%s1620_s0 + $0xcc] sm:$0xf] }
  0x1a   :  { %1212 = vmatpush.bf16.msra.mxu1 %v1120_v6  ;;  %1213 = vmatpush.bf16.msra.mxu2 %v1120_v6 }
  0x1b   :  { %1214 = vmatpush.bf16.msra.mxu3 %v1120_v6  ;;  %557 = vmatpush.bf16.msra.mxu0 %v1120_v6  ;;  %v816_v6 = vor.u32 %v1089_v62, %v813_v63  ;;  %v919_v62 = vld [vmem:[%s1620_s0 + $0xd0] sm:$0xf]  ;;  %v1117_v63 = vld [vmem:[%s1620_s0 + $0xe0] sm:$0xf0] }
  0x1c   :  { %v920_v4 = vor.u32 %v1117_v63, %v919_v62 }
  0x1e   :  { %1215 = vmatpush.bf16.msra.mxu1 %v1119_v8  ;;  %1216 = vmatpush.bf16.msra.mxu2 %v1119_v8 }
  0x1f   :  { %1217 = vmatpush.bf16.msra.mxu3 %v1119_v8  ;;  %558 = vmatpush.bf16.msra.mxu0 %v1119_v8  ;;  %v820_v8 = vor.u32 %v1092_v1, %v819_v0  ;;  %v927_v1 = vld [vmem:[%s1620_s0 + $0xd8] sm:$0xf] }
  0x21   :  { %569 = vmatmul.bf16.vlgmr.msra.gmra.mxu1 %v852_v18  ;;  %579 = vmatmul.bf16.vlgmr.msra.gmra.mxu2 %v892_v19  ;;  %v1098_v18 = vld [vmem:[%s1620_s0 + $0x48] sm:$0xf0]  ;;  %v836_v19 = vor.u32 %v1094_v12, %v833_v13 }
  0x22   :  { %637 = vmatpush.bf16.msrb.mxu2 %v1142_v17  ;;  %559 = vmatmul.bf16.vlgmr.msra.gmra.mxu0 %v812_v20  ;;  %v847_v17 = vld [vmem:[%s1620_s0 + $0x38] sm:$0xf]  ;;  %v840_v20 = vor.u32 %v1097_v15, %v839_v14 }
  0x23   :  { %680 = vmatpush.bf16.msrb.mxu3 %v1150_v16  ;;  %594 = vmatpush.bf16.msrb.mxu1 %v1134_v21  ;;  %v844_v16 = vor.u32 %v1095_v10, %v841_v11  ;;  %v848_v21 = vor.u32 %v1098_v18, %v847_v17  ;;  %v237_v10 = vunpack.c.h.b16 %v1263_v7 }
  0x24   :  { %723 = vmatpush.bf16.msrb.mxu0 %v1158_v22  ;;  %589 = vmatmul.bf16.vlgmr.msra.gmra.mxu3 %v271_v23  ;;  %v1100_v22 = vld [vmem:[%s1620_s0 + $0x5c] sm:$0xf]  ;;  %v861_v23 = vld [vmem:[%s1620_s0 + $0x6c] sm:$0xf0] }
  0x25   :  { %v272_v14 = vpack.c.b16 %v237_v10, %v237_v10 }
  0x26   :  { %638 = vmatpush.bf16.msrb.mxu2 %v1141_v25  ;;  %v853_v25 = vld [vmem:[%s1620_s0 + $0x64] sm:$0xf0] }
  0x27   :  { %681 = vmatpush.bf16.msrb.mxu3 %v1149_v24  ;;  %595 = vmatpush.bf16.msrb.mxu1 %v1133_v26  ;;  %v1099_v24 = vld [vmem:[%s1620_s0 + $0x54] sm:$0xf]  ;;  %v859_v26 = vld [vmem:[%s1620_s0 + $0x58] sm:$0xf] }
  0x28   :  { %724 = vmatpush.bf16.msrb.mxu0 %v1157_v27  ;;  %v1102_v27 = vld [vmem:[%s1620_s0 + $0x68] sm:$0xf0] }
  0x2a   :  { %639 = vmatpush.bf16.msrb.mxu2 %v1140_v29  ;;  %v867_v29 = vld [vmem:[%s1620_s0 + $0x60] sm:$0xf] }
  0x2b   :  { %682 = vmatpush.bf16.msrb.mxu3 %v1148_v28  ;;  %596 = vmatpush.bf16.msrb.mxu1 %v1132_v30  ;;  %v864_v28 = vor.u32 %v1100_v22, %v861_v23  ;;  %v1103_v30 = vld [vmem:[%s1620_s0 + $0x70] sm:$0xf0] }
  0x2c   :  { %725 = vmatpush.bf16.msrb.mxu0 %v1156_v31  ;;  %v856_v31 = vor.u32 %v1099_v24, %v853_v25 }
  0x2e   :  { %640 = vmatpush.bf16.msrb.mxu2 %v1139_v33  ;;  %v868_v33 = vor.u32 %v1103_v30, %v867_v29 }
  0x2f   :  { %683 = vmatpush.bf16.msrb.mxu3 %v1147_v32  ;;  %597 = vmatpush.bf16.msrb.mxu1 %v1131_v34  ;;  %v860_v32 = vor.u32 %v1102_v27, %v859_v26  ;;  %v1105_v34 = vld [vmem:[%s1620_s0 + $0x84] sm:$0xf] }
  0x30   :  { %726 = vmatpush.bf16.msrb.mxu0 %v1155_v39  ;;  %v1107_v39 = vld [vmem:[%s1620_s0 + $0x90] sm:$0xf0]  ;;  %v884_v40 = vor.u32 %v1105_v34, %v881_v35 }
  0x31   :  { %574 = vmatmul.bf16.gmra.mxu1 %v872_v44  ;;  %584 = vmatmul.bf16.gmra.mxu2 %v912_v45  ;;  %v880_v44 = vor.u32 %v1107_v39, %v879_v38 }
  0x32   :  { %641 = vmatpush.bf16.msrb.mxu2 %v1138_v43  ;;  %564 = vmatmul.bf16.gmra.mxu0 %v832_v46  ;;  %v876_v43 = vor.u32 %v1104_v36, %v873_v37  ;;  %v1110_v46 = vld [vmem:[%s1620_s0 + $0xac] sm:$0xf] }
  0x33   :  { %684 = vmatpush.bf16.msrb.mxu3 %v1146_v42  ;;  %598 = vmatpush.bf16.msrb.mxu1 %v1130_v47  ;;  %v1108_v42 = vld [vmem:[%s1620_s0 + $0x98] sm:$0xf0]  ;;  %v901_v47 = vld [vmem:[%s1620_s0 + $0xbc] sm:$0xf0] }
  0x34   :  { %727 = vmatpush.bf16.msrb.mxu0 %v1154_v48  ;;  %v888_v45 = vor.u32 %v1108_v42, %v887_v41  ;;  %v1109_v48 = vld [vmem:[%s1620_s0 + $0xa4] sm:$0xf] }
  0x36   :  { %642 = vmatpush.bf16.msrb.mxu2 %v1137_v50  ;;  %v899_v50 = vld [vmem:[%s1620_s0 + $0xa8] sm:$0xf] }
  0x37   :  { %685 = vmatpush.bf16.msrb.mxu3 %v1145_v49  ;;  %599 = vmatpush.bf16.msrb.mxu1 %v1129_v51  ;;  %v893_v49 = vld [vmem:[%s1620_s0 + $0xb4] sm:$0xf0]  ;;  %v1112_v51 = vld [vmem:[%s1620_s0 + $0xb8] sm:$0xf0] }
  0x38   :  { %728 = vmatpush.bf16.msrb.mxu0 %v1153_v52  ;;  %v904_v52 = vor.u32 %v1110_v46, %v901_v47 }
  0x3a   :  { %643 = vmatpush.bf16.msrb.mxu2 %v1136_v54  ;;  %v1113_v54 = vld [vmem:[%s1620_s0 + $0xc0] sm:$0xf0] }
  0x3b   :  { %686 = vmatpush.bf16.msrb.mxu3 %v1144_v53  ;;  %600 = vmatpush.bf16.msrb.mxu1 %v1128_v55  ;;  %v907_v53 = vld [vmem:[%s1620_s0 + $0xb0] sm:$0xf]  ;;  %v896_v55 = vor.u32 %v1109_v48, %v893_v49 }
  0x3c   :  { %729 = vmatpush.bf16.msrb.mxu0 %v1152_v57  ;;  %v908_v57 = vor.u32 %v1113_v54, %v907_v53 }
  0x3e   :  { %644 = vmatpush.bf16.msrb.mxu2 %v1135_v58  ;;  %v1115_v58 = vld [vmem:[%s1620_s0 + $0xd4] sm:$0xf] }
  0x3f   :  { %687 = vmatpush.bf16.msrb.mxu3 %v1143_v56  ;;  %601 = vmatpush.bf16.msrb.mxu1 %v1127_v61  ;;  %v900_v56 = vor.u32 %v1112_v51, %v899_v50  ;;  %v913_v61 = vld [vmem:[%s1620_s0 + $0xdc] sm:$0xf0]  ;;  %v924_v0 = vor.u32 %v1115_v58, %v921_v59 }
  0x40   :  { %730 = vmatpush.bf16.msrb.mxu0 %v1151_v3  ;;  %v916_v3 = vor.u32 %v1114_v60, %v913_v61 }
  0x41   :  { %645 = vmatmul.bf16.vlgmr.msrb.gmra.mxu2 %v820_v8 }
  0x42   :  { %688 = vmatmul.bf16.vlgmr.msrb.gmra.mxu3 %v824_v2  ;;  %602 = vmatmul.bf16.vlgmr.msrb.gmra.mxu1 %v816_v6  ;;  %v1118_v2 = vld [vmem:[%s1620_s0 + $0xe8] sm:$0xf0]  ;;  %v51_v6 = vld [vmem:[%s1620_s0 + $0xf8] sm:$0xff] }
  0x43   :  { %731 = vmatmul.bf16.vlgmr.msrb.gmra.mxu0 %v828_v9  ;;  %v928_v5 = vor.u32 %v1118_v2, %v927_v1  ;;  %v239_v8 = vunpack.c.h.b16 %v51_v6  ;;  %v52_v9 = vld [vmem:[%s1620_s0 + $0x100] sm:$0xf]  ;;  %v238_v11 = vunpack.c.l.b16 %v51_v6 }
  0x44   :  { %v240_v12 = vunpack.c.l.b16 %v52_v9 }
  0x45   :  { %v274_v13 = vpack.c.b16 %v239_v8, %v239_v8  ;;  %v273_v15 = vpack.c.b16 %v238_v11, %v238_v11 }
  0x46   :  { %v275_v17 = vpack.c.b16 %v240_v12, %v240_v12 }
  0x51   :  { %650 = vmatmul.bf16.gmra.mxu2 %v840_v20 }
  0x52   :  { %693 = vmatmul.bf16.gmra.mxu3 %v844_v16  ;;  %607 = vmatmul.bf16.gmra.mxu1 %v836_v19  ;;  %v1557_v19 = vld [vmem:[%s1619_s2] ss:$0 sm:$0xff] }
  0x53   :  { %736 = vmatmul.bf16.gmra.mxu0 %v848_v21 }
  0x61   :  { %655 = vmatmul.bf16.gmra.mxu2 %v860_v32 }
  0x62   :  { %698 = vmatmul.bf16.gmra.mxu3 %v864_v28  ;;  %612 = vmatmul.bf16.gmra.mxu1 %v856_v31 }
  0x63   :  { %741 = vmatmul.bf16.gmra.mxu0 %v868_v33 }
  0x71   :  { %660 = vmatmul.bf16.gmra.mxu2 %v880_v44 }
  0x72   :  { %703 = vmatmul.bf16.gmra.mxu3 %v884_v40  ;;  %617 = vmatmul.bf16.gmra.mxu1 %v876_v43 }
  0x73   :  { %746 = vmatmul.bf16.gmra.mxu0 %v888_v45 }
  0x81   :  { %665 = vmatmul.bf16.gmra.mxu2 %v900_v56 }
  0x82   :  { %708 = vmatmul.bf16.gmra.mxu3 %v904_v52  ;;  %622 = vmatmul.bf16.gmra.mxu1 %v896_v55 }
  0x83   :  { %751 = vmatmul.bf16.gmra.mxu0 %v908_v57 }
  0x91   :  { %670 = vmatmul.bf16.gmra.mxu2 %v920_v4 }
  0x92   :  { %713 = vmatmul.bf16.gmra.mxu3 %v924_v0  ;;  %627 = vmatmul.bf16.gmra.mxu1 %v916_v3 }
  0x93   :  { %756 = vmatmul.bf16.gmra.mxu0 %v928_v5 }
  0x9e   :  { %v1552_v16 = vpop.f32.mrf.mxu1 }
  0x9f   :  { %v560_v18 = vpop.f32.mrf.mxu0 }
  0xa0   :  { %v561_v39 = vadd.f32 %v1557_v19, %v560_v18 }
  0xa1   :  { %675 = vmatmul.bf16.gmra.mxu2 %v273_v15  ;;  %v571_v15 = vadd.f32 %v1557_v19, %v1552_v16 }
  0xa2   :  { %718 = vmatmul.bf16.gmra.mxu3 %v274_v13  ;;  %632 = vmatmul.bf16.gmra.mxu1 %v272_v14 }
  0xa3   :  { %761 = vmatmul.bf16.gmra.mxu0 %v275_v17 }
  0xa4   :  { %v580_v20 = vpop.f32.mrf.mxu2 }
  0xa5   :  { %v1560_v7 = vadd.f32 %v1557_v19, %v580_v20 }
  0xa6   :  { %v1562_v21 = vpop.f32.mrf.mxu1 }
  0xa7   :  { %v590_v22 = vpop.f32.mrf.mxu3  ;;  %v562_v23 = vpop.f32.mrf.mxu0 }
  0xa8   :  { %v1565_v24 = vadd.f32 %v1557_v19, %v590_v22  ;;  %v563_v45 = vadd.f32 %v1557_v19, %v562_v23 }
  0xac   :  { %v582_v25 = vpop.f32.mrf.mxu2 }
  0xad   :  { %v1568_v26 = vadd.f32 %v1557_v19, %v582_v25 }
  0xae   :  { %v1570_v27 = vpop.f32.mrf.mxu1 }
  0xaf   :  { %v592_v28 = vpop.f32.mrf.mxu3  ;;  %v565_v29 = vpop.f32.mrf.mxu0 }
  0xb0   :  { %v566_v57 = vadd.f32 %v1557_v19, %v565_v29 }
  0xb4   :  { %v585_v30 = vpop.f32.mrf.mxu2 }
  0xb5   :  { %v1573_v31 = vadd.f32 %v1557_v19, %v585_v30  ;;  %v573_v30 = vadd.f32 %v1557_v19, %v1562_v21 }
  0xb6   :  { %v1575_v32 = vpop.f32.mrf.mxu1 }
  0xb7   :  { %v567_v33 = vpop.f32.mrf.mxu0 }
  0xb8   :  { %v568_v2 = vadd.f32 %v1557_v19, %v567_v33 }
  0xbc   :  { %v587_v34 = vpop.f32.mrf.mxu2 }
  0xbd   :  { %v1578_v35 = vadd.f32 %v1557_v19, %v587_v34 }
  0xbf   :  { %v603_v36 = vpop.f32.mrf.mxu1 }
  0xc0   :  { %v732_v37 = vpop.f32.mrf.mxu0  ;;  %v604_v41 = vadd.f32 %v603_v36, %v561_v39 }
  0xc4   :  { %v646_v40 = vpop.f32.mrf.mxu2 }
  0xc5   :  { %v689_v38 = vpop.f32.mrf.mxu3  ;;  %v647_v43 = vadd.f32 %v646_v40, %v604_v41 }
  0xc7   :  { %v605_v42 = vpop.f32.mrf.mxu1  ;;  %v690_v47 = vadd.f32 %v689_v38, %v647_v43 }
  0xc8   :  { %v734_v44 = vpop.f32.mrf.mxu0  ;;  %v606_v48 = vadd.f32 %v605_v42, %v563_v45 }
  0xc9   :  { %v733_v52 = vadd.f32 %v732_v37, %v690_v47 }
  0xcb   :  { %v766_v58 = vmax.f32 %v733_v52, 0.0  ;;  %v578_v52 = vadd.f32 %v1557_v19, %v1575_v32 }
  0xcc   :  { %v648_v49 = vpop.f32.mrf.mxu2 }
  0xcd   :  { %v691_v46 = vpop.f32.mrf.mxu3  ;;  %v649_v50 = vadd.f32 %v648_v49, %v606_v48 }
  0xcf   :  { %v608_v51 = vpop.f32.mrf.mxu1  ;;  %v692_v53 = vadd.f32 %v691_v46, %v649_v50 }
  0xd0   :  { %v737_v54 = vpop.f32.mrf.mxu0  ;;  %v609_v62 = vadd.f32 %v608_v51, %v566_v57 }
  0xd1   :  { %v735_v55 = vadd.f32 %v734_v44, %v692_v53  ;;  %v576_v44 = vadd.f32 %v1557_v19, %v1570_v27 }
  0xd3   :  { %v767_v59 = vmax.f32 %v735_v55, 0.0 }
  0xd4   :  { %v651_v60 = vpop.f32.mrf.mxu2 }
  0xd5   :  { %v694_v56 = vpop.f32.mrf.mxu3  ;;  %v1162_v61 = vpack.c.bf16 %v767_v59, %v766_v58  ;;  %v652_v0 = vadd.f32 %v651_v60, %v609_v62 }
  0xd7   :  { %v610_v63 = vpop.f32.mrf.mxu1  ;;  %1163 = vst [vmem:[%s1621_s3] sm:$0xff] %v1162_v61   ;;  %v695_v4 = vadd.f32 %v694_v56, %v652_v0 }
  0xd8   :  { %v739_v1 = vpop.f32.mrf.mxu0  ;;  %v611_v5 = vadd.f32 %v610_v63, %v568_v2 }
  0xd9   :  { %v738_v10 = vadd.f32 %v737_v54, %v695_v4 }
  0xdb   :  { %v768_v17 = vmax.f32 %v738_v10, 0.0 }
  0xdc   :  { %v653_v6 = vpop.f32.mrf.mxu2 }
  0xdd   :  { %v696_v3 = vpop.f32.mrf.mxu3  ;;  %v654_v8 = vadd.f32 %v653_v6, %v611_v5 }
  0xdf   :  { %v613_v9 = vpop.f32.mrf.mxu1  ;;  %v697_v11 = vadd.f32 %v696_v3, %v654_v8 }
  0xe0   :  { %v742_v12 = vpop.f32.mrf.mxu0  ;;  %v614_v23 = vadd.f32 %v613_v9, %v571_v15 }
  0xe1   :  { %v740_v13 = vadd.f32 %v739_v1, %v697_v11 }
  0xe3   :  { %v769_v18 = vmax.f32 %v740_v13, 0.0 }
  0xe4   :  { %v656_v20 = vpop.f32.mrf.mxu2 }
  0xe5   :  { %v699_v14 = vpop.f32.mrf.mxu3  ;;  %v1167_v22 = vpack.c.bf16 %v769_v18, %v768_v17  ;;  %v657_v28 = vadd.f32 %v656_v20, %v614_v23 }
  0xe7   :  { %v615_v25 = vpop.f32.mrf.mxu1  ;;  %1189 = vst [vmem:[%s1621_s3 + $0x8] sm:$0xff] %v1167_v22   ;;  %v700_v34 = vadd.f32 %v699_v14, %v657_v28 }
  0xe8   :  { %v744_v29 = vpop.f32.mrf.mxu0  ;;  %v616_v36 = vadd.f32 %v615_v25, %v573_v30 }
  0xe9   :  { %v743_v39 = vadd.f32 %v742_v12, %v700_v34 }
  0xeb   :  { %v770_v45 = vmax.f32 %v743_v39, 0.0 }
  0xec   :  { %v658_v37 = vpop.f32.mrf.mxu2 }
  0xed   :  { %v701_v33 = vpop.f32.mrf.mxu3  ;;  %v659_v16 = vadd.f32 %v658_v37, %v616_v36 }
  0xef   :  { %v618_v38 = vpop.f32.mrf.mxu1  ;;  %v702_v40 = vadd.f32 %v701_v33, %v659_v16 }
  0xf0   :  { %v747_v41 = vpop.f32.mrf.mxu0  ;;  %v619_v49 = vadd.f32 %v618_v38, %v576_v44 }
  0xf1   :  { %v745_v42 = vadd.f32 %v744_v29, %v702_v40 }
  0xf3   :  { %v771_v46 = vmax.f32 %v745_v42, 0.0 }
  0xf4   :  { %v661_v47 = vpop.f32.mrf.mxu2 }
  0xf5   :  { %v704_v43 = vpop.f32.mrf.mxu3  ;;  %v1172_v48 = vpack.c.bf16 %v771_v46, %v770_v45  ;;  %v662_v50 = vadd.f32 %v661_v47, %v619_v49 }
  0xf7   :  { %v620_v21 = vpop.f32.mrf.mxu1  ;;  %1190 = vst [vmem:[%s1621_s3 + $0x10] sm:$0xff] %v1172_v48   ;;  %v705_v54 = vadd.f32 %v704_v43, %v662_v50 }
  0xf8   :  { %v749_v51 = vpop.f32.mrf.mxu0  ;;  %v621_v55 = vadd.f32 %v620_v21, %v578_v52 }
  0xf9   :  { %v748_v58 = vadd.f32 %v747_v41, %v705_v54 }
  0xfb   :  { %v772_v63 = vmax.f32 %v748_v58, 0.0 }
  0xfc   :  { %v663_v56 = vpop.f32.mrf.mxu2 }
  0xfd   :  { %v706_v53 = vpop.f32.mrf.mxu3  ;;  %v664_v27 = vadd.f32 %v663_v56, %v621_v55 }
  0xff   :  { %v623_v57 = vpop.f32.mrf.mxu1  ;;  %v707_v59 = vadd.f32 %v706_v53, %v664_v27 }
 0x100   :  { %v752_v60 = vpop.f32.mrf.mxu0  ;;  %v624_v3 = vadd.f32 %v623_v57, %v1560_v7 }
 0x101   :  { %v750_v61 = vadd.f32 %v749_v51, %v707_v59 }
 0x103   :  { %v773_v0 = vmax.f32 %v750_v61, 0.0 }
 0x104   :  { %v666_v1 = vpop.f32.mrf.mxu2 }
 0x105   :  { %v709_v62 = vpop.f32.mrf.mxu3  ;;  %v1177_v2 = vpack.c.bf16 %v773_v0, %v772_v63  ;;  %v667_v19 = vadd.f32 %v666_v1, %v624_v3 }
 0x107   :  { %v625_v4 = vpop.f32.mrf.mxu1  ;;  %1191 = vst [vmem:[%s1621_s3 + $0x18] sm:$0xff] %v1177_v2   ;;  %v710_v6 = vadd.f32 %v709_v62, %v667_v19 }
 0x108   :  { %v754_v32 = vpop.f32.mrf.mxu0  ;;  %v626_v8 = vadd.f32 %v625_v4, %v1568_v26 }
 0x109   :  { %v753_v12 = vadd.f32 %v752_v60, %v710_v6 }
 0x10b   :  { %v774_v7 = vmax.f32 %v753_v12, 0.0 }
 0x10c   :  { %v668_v9 = vpop.f32.mrf.mxu2 }
 0x10d   :  { %v711_v5 = vpop.f32.mrf.mxu3  ;;  %v669_v10 = vadd.f32 %v668_v9, %v626_v8 }
 0x10f   :  { %v628_v11 = vpop.f32.mrf.mxu1  ;;  %v712_v13 = vadd.f32 %v711_v5, %v669_v10 }
 0x110   :  { %v757_v14 = vpop.f32.mrf.mxu0  ;;  %v629_v23 = vadd.f32 %v628_v11, %v1573_v31 }
 0x111   :  { %v755_v15 = vadd.f32 %v754_v32, %v712_v13 }
 0x113   :  { %v775_v18 = vmax.f32 %v755_v15, 0.0 }
 0x114   :  { %v671_v20 = vpop.f32.mrf.mxu2 }
 0x115   :  { %v714_v17 = vpop.f32.mrf.mxu3  ;;  %v1182_v22 = vpack.c.bf16 %v775_v18, %v774_v7  ;;  %v672_v26 = vadd.f32 %v671_v20, %v629_v23 }
 0x117   :  { %v630_v25 = vpop.f32.mrf.mxu1  ;;  %1192 = vst [vmem:[%s1621_s3 + $0x20] sm:$0xff] %v1182_v22   ;;  %v715_v30 = vadd.f32 %v714_v17, %v672_v26 }
 0x118   :  { %v759_v28 = vpop.f32.mrf.mxu0  ;;  %v631_v33 = vadd.f32 %v630_v25, %v1578_v35 }
 0x119   :  { %v758_v16 = vadd.f32 %v757_v14, %v715_v30 }
 0x11b   :  { %v776_v31 = vmax.f32 %v758_v16, 0.0 }
 0x11c   :  { %v673_v34 = vpop.f32.mrf.mxu2 }
 0x11d   :  { %v716_v29 = vpop.f32.mrf.mxu3  ;;  %v674_v36 = vadd.f32 %v673_v34, %v631_v33 }
 0x11f   :  { %v633_v37 = vpop.f32.mrf.mxu1  ;;  %v717_v38 = vadd.f32 %v716_v29, %v674_v36 }
 0x120   :  { %v762_v39 = vpop.f32.mrf.mxu0  ;;  %v634_v43 = vadd.f32 %v633_v37, %v1565_v24 }
 0x121   :  { %v760_v40 = vadd.f32 %v759_v28, %v717_v38 }
 0x123   :  { %v777_v42 = vmax.f32 %v760_v40, 0.0 }
 0x124   :  { %v676_v44 = vpop.f32.mrf.mxu2 }
 0x125   :  { %v719_v41 = vpop.f32.mrf.mxu3  ;;  %v1187_v45 = vpack.c.bf16 %v777_v42, %v776_v31  ;;  %v677_v46 = vadd.f32 %v676_v44, %v634_v43 }
 0x127   :  { %v635_v47 = vpop.f32.mrf.mxu1  ;;  %1193 = vst [vmem:[%s1621_s3 + $0x28] sm:$0xff] %v1187_v45   ;;  %v720_v35 = vadd.f32 %v719_v41, %v677_v46 }
 0x128   :  { %v764_v48 = vpop.f32.mrf.mxu0 }
 0x129   :  { %v763_v49 = vadd.f32 %v762_v39, %v720_v35 }
 0x12b   :  { %v778_v50 = vmax.f32 %v763_v49, 0.0 }
 0x12c   :  { %v678_v51 = vpop.f32.mrf.mxu2 }
 0x12d   :  { %v721_v21 = vpop.f32.mrf.mxu3  ;;  %v791_v52 = vpack.c.bf16 %v778_v50, %v778_v50 }
 0x12f   :  { %804 = vst [vmem:[%s1621_s3 + $0x30] sm:$0xf] %v791_v52 }

// kernel: cnn_embedding_forward.7
= control target key start
LH: loop header
LB: loop body
LE: loop exit
PB: predicated region body
PF: predicated region fallthrough
CT: control target
= control target key end

     0   :  { %s1957_s1 = inlined_call_operand.vmem [shape: bf16[1664,128], index: 1, kind: input, shape index: {}]   ;;  %s1958_s2 = inlined_call_operand.vmem [shape: f32[1,128], index: 2, kind: input, shape index: {}]   ;;  %s1959_s0 = inlined_call_operand.vmem [shape: bf16[8,1664], index: 0, kind: input, shape index: {}]   ;;  %s1960_s3 = inlined_call_operand.vmem [shape: f32[8,128], index: 3, kind: output, shape index: {}]  }
   0x1   :  { %v1500_v0 = vld [vmem:[%s1957_s1 + $0x38] sm:$0xff]  ;;  %v1499_v4 = vld [vmem:[%s1957_s1 + $0x30] sm:$0xff]  ;;  %v1498_v8 = vld [vmem:[%s1957_s1 + $0x28] sm:$0xff] }
   0x2   :  { %v1516_v1 = vld [vmem:[%s1957_s1 + $0xb8] sm:$0xff]  ;;  %903 = vmatpush.bf16.msra.mxu0 %v1500_v0  ;;  %v1515_v5 = vld [vmem:[%s1957_s1 + $0xb0] sm:$0xff]  ;;  %v1514_v9 = vld [vmem:[%s1957_s1 + $0xa8] sm:$0xff] }
   0x3   :  { %v1508_v2 = vld [vmem:[%s1957_s1 + $0x78] sm:$0xff]  ;;  %929 = vmatpush.bf16.msra.mxu2 %v1516_v1  ;;  %v1507_v6 = vld [vmem:[%s1957_s1 + $0x70] sm:$0xff]  ;;  %v1506_v10 = vld [vmem:[%s1957_s1 + $0x68] sm:$0xff] }
   0x4   :  { %v1524_v3 = vld [vmem:[%s1957_s1 + $0xf8] sm:$0xff]  ;;  %916 = vmatpush.bf16.msra.mxu1 %v1508_v2  ;;  %v1523_v7 = vld [vmem:[%s1957_s1 + $0xf0] sm:$0xff]  ;;  %v1522_v11 = vld [vmem:[%s1957_s1 + $0xe8] sm:$0xff] }
   0x5   :  { %942 = vmatpush.bf16.msra.mxu3 %v1524_v3  ;;  %v1497_v12 = vld [vmem:[%s1957_s1 + $0x20] sm:$0xff]  ;;  %v1496_v16 = vld [vmem:[%s1957_s1 + $0x18] sm:$0xff]  ;;  %v1495_v20 = vld [vmem:[%s1957_s1 + $0x10] sm:$0xff] }
   0x6   :  { %904 = vmatpush.bf16.msra.mxu0 %v1499_v4  ;;  %v1513_v13 = vld [vmem:[%s1957_s1 + $0xa0] sm:$0xff]  ;;  %v1512_v17 = vld [vmem:[%s1957_s1 + $0x98] sm:$0xff]  ;;  %v1511_v21 = vld [vmem:[%s1957_s1 + $0x90] sm:$0xff] }
   0x7   :  { %930 = vmatpush.bf16.msra.mxu2 %v1515_v5  ;;  %v1505_v14 = vld [vmem:[%s1957_s1 + $0x60] sm:$0xff]  ;;  %v1504_v18 = vld [vmem:[%s1957_s1 + $0x58] sm:$0xff]  ;;  %v1503_v22 = vld [vmem:[%s1957_s1 + $0x50] sm:$0xff] }
   0x8   :  { %917 = vmatpush.bf16.msra.mxu1 %v1507_v6  ;;  %v1521_v15 = vld [vmem:[%s1957_s1 + $0xe0] sm:$0xff]  ;;  %v1520_v19 = vld [vmem:[%s1957_s1 + $0xd8] sm:$0xff]  ;;  %v1519_v23 = vld [vmem:[%s1957_s1 + $0xd0] sm:$0xff] }
   0x9   :  { %943 = vmatpush.bf16.msra.mxu3 %v1523_v7  ;;  %v1494_v24 = vld [vmem:[%s1957_s1 + $0x8] sm:$0xff]  ;;  %v14_v29 = vld [vmem:[%s1959_s0] sm:$0xff]  ;;  %v1532_v34 = vld [vmem:[%s1957_s1 + $0x138] sm:$0xff] }
   0xa   :  { %905 = vmatpush.bf16.msra.mxu0 %v1498_v8  ;;  %v1510_v25 = vld [vmem:[%s1957_s1 + $0x88] sm:$0xff]  ;;  %v1493_v30 = vld [vmem:[%s1957_s1] sm:$0xff]  ;;  %v240_v33 = vunpack.c.l.b16 %v14_v29  ;;  %v1548_v35 = vld [vmem:[%s1957_s1 + $0x1b8] sm:$0xff]  ;;  %v241_v39 = vunpack.c.h.b16 %v14_v29 }
   0xb   :  { %931 = vmatpush.bf16.msra.mxu2 %v1514_v9  ;;  %v1502_v26 = vld [vmem:[%s1957_s1 + $0x48] sm:$0xff]  ;;  %v1509_v31 = vld [vmem:[%s1957_s1 + $0x80] sm:$0xff]  ;;  %v1540_v40 = vld [vmem:[%s1957_s1 + $0x178] sm:$0xff] }
   0xc   :  { %918 = vmatpush.bf16.msra.mxu1 %v1506_v10  ;;  %v1518_v27 = vld [vmem:[%s1957_s1 + $0xc8] sm:$0xff]  ;;  %v1501_v36 = vld [vmem:[%s1957_s1 + $0x40] sm:$0xff]  ;;  %v1556_v41 = vld [vmem:[%s1957_s1 + $0x1f8] sm:$0xff]  ;;  %v253_v43 = vpack.c.b16 %v240_v33, %v240_v33  ;;  %v254_v47 = vpack.c.b16 %v241_v39, %v241_v39 }
   0xd   :  { %944 = vmatpush.bf16.msra.mxu3 %v1522_v11  ;;  %v15_v28 = vld [vmem:[%s1959_s0 + $0x8] sm:$0xff]  ;;  %v1517_v37 = vld [vmem:[%s1957_s1 + $0xc0] sm:$0xff]  ;;  %v1531_v44 = vld [vmem:[%s1957_s1 + $0x130] sm:$0xff] }
   0xe   :  { %906 = vmatpush.bf16.msra.mxu0 %v1497_v12  ;;  %v242_v32 = vunpack.c.l.b16 %v15_v28  ;;  %v243_v38 = vunpack.c.h.b16 %v15_v28  ;;  %v1547_v45 = vld [vmem:[%s1957_s1 + $0x1b0] sm:$0xff]  ;;  %v1530_v50 = vld [vmem:[%s1957_s1 + $0x128] sm:$0xff]  ;;  %v1529_v54 = vld [vmem:[%s1957_s1 + $0x120] sm:$0xff] }
   0xf   :  { %932 = vmatpush.bf16.msra.mxu2 %v1513_v13  ;;  %v1539_v48 = vld [vmem:[%s1957_s1 + $0x170] sm:$0xff]  ;;  %v1546_v51 = vld [vmem:[%s1957_s1 + $0x1a8] sm:$0xff]  ;;  %v1545_v55 = vld [vmem:[%s1957_s1 + $0x1a0] sm:$0xff] }
  0x10   :  { %919 = vmatpush.bf16.msra.mxu1 %v1505_v14  ;;  %v255_v42 = vpack.c.b16 %v242_v32, %v242_v32  ;;  %v256_v46 = vpack.c.b16 %v243_v38, %v243_v38  ;;  %v1555_v49 = vld [vmem:[%s1957_s1 + $0x1f0] sm:$0xff]  ;;  %v1538_v52 = vld [vmem:[%s1957_s1 + $0x168] sm:$0xff]  ;;  %v1537_v56 = vld [vmem:[%s1957_s1 + $0x160] sm:$0xff] }
  0x11   :  { %945 = vmatpush.bf16.msra.mxu3 %v1521_v15  ;;  %v1554_v53 = vld [vmem:[%s1957_s1 + $0x1e8] sm:$0xff]  ;;  %v1553_v57 = vld [vmem:[%s1957_s1 + $0x1e0] sm:$0xff]  ;;  %v1528_v58 = vld [vmem:[%s1957_s1 + $0x118] sm:$0xff] }
  0x12   :  { %907 = vmatpush.bf16.msra.mxu0 %v1496_v16  ;;  %v1544_v59 = vld [vmem:[%s1957_s1 + $0x198] sm:$0xff]  ;;  %v1527_v62 = vld [vmem:[%s1957_s1 + $0x110] sm:$0xff]  ;;  %v1526_v2 = vld [vmem:[%s1957_s1 + $0x108] sm:$0xff] }
  0x13   :  { %933 = vmatpush.bf16.msra.mxu2 %v1512_v17  ;;  %v1536_v60 = vld [vmem:[%s1957_s1 + $0x158] sm:$0xff]  ;;  %v1543_v63 = vld [vmem:[%s1957_s1 + $0x190] sm:$0xff]  ;;  %v1542_v3 = vld [vmem:[%s1957_s1 + $0x188] sm:$0xff] }
  0x14   :  { %920 = vmatpush.bf16.msra.mxu1 %v1504_v18  ;;  %v1552_v61 = vld [vmem:[%s1957_s1 + $0x1d8] sm:$0xff]  ;;  %v1535_v0 = vld [vmem:[%s1957_s1 + $0x150] sm:$0xff]  ;;  %v1534_v6 = vld [vmem:[%s1957_s1 + $0x148] sm:$0xff] }
  0x15   :  { %946 = vmatpush.bf16.msra.mxu3 %v1520_v19  ;;  %v1551_v1 = vld [vmem:[%s1957_s1 + $0x1d0] sm:$0xff]  ;;  %v17_v4 = vld [vmem:[%s1959_s0 + $0x18] sm:$0xff]  ;;  %v1550_v7 = vld [vmem:[%s1957_s1 + $0x1c8] sm:$0xff] }
  0x16   :  { %908 = vmatpush.bf16.msra.mxu0 %v1495_v20  ;;  %v16_v5 = vld [vmem:[%s1959_s0 + $0x10] sm:$0xff]  ;;  %v1525_v8 = vld [vmem:[%s1957_s1 + $0x100] sm:$0xff]  ;;  %v246_v10 = vunpack.c.l.b16 %v17_v4  ;;  %v1564_v12 = vld [vmem:[%s1957_s1 + $0x238] sm:$0xff]  ;;  %v247_v16 = vunpack.c.h.b16 %v17_v4 }
  0x17   :  { %934 = vmatpush.bf16.msra.mxu2 %v1511_v21  ;;  %v1541_v9 = vld [vmem:[%s1957_s1 + $0x180] sm:$0xff]  ;;  %v244_v11 = vunpack.c.l.b16 %v16_v5  ;;  %v1580_v13 = vld [vmem:[%s1957_s1 + $0x2b8] sm:$0xff]  ;;  %v245_v17 = vunpack.c.h.b16 %v16_v5  ;;  %v1562_v28 = vld [vmem:[%s1957_s1 + $0x228] sm:$0xff] }
  0x18   :  { %921 = vmatpush.bf16.msra.mxu1 %v1503_v22  ;;  %v1533_v14 = vld [vmem:[%s1957_s1 + $0x140] sm:$0xff]  ;;  %v1572_v18 = vld [vmem:[%s1957_s1 + $0x278] sm:$0xff]  ;;  %v259_v20 = vpack.c.b16 %v246_v10, %v246_v10  ;;  %v1563_v22 = vld [vmem:[%s1957_s1 + $0x230] sm:$0xff] }
  0x19   :  { %947 = vmatpush.bf16.msra.mxu3 %v1519_v23  ;;  %v1549_v15 = vld [vmem:[%s1957_s1 + $0x1c0] sm:$0xff]  ;;  %v1588_v19 = vld [vmem:[%s1957_s1 + $0x2f8] sm:$0xff]  ;;  %v257_v21 = vpack.c.b16 %v244_v11, %v244_v11  ;;  %v1579_v23 = vld [vmem:[%s1957_s1 + $0x2b0] sm:$0xff] }
  0x1a   :  { %909 = vmatpush.bf16.msra.mxu0 %v1494_v24  ;;  %v260_v24 = vpack.c.b16 %v247_v16, %v247_v16  ;;  %v1578_v29 = vld [vmem:[%s1957_s1 + $0x2a8] sm:$0xff]  ;;  %v1561_v32 = vld [vmem:[%s1957_s1 + $0x220] sm:$0xff]  ;;  %v1568_v38 = vld [vmem:[%s1957_s1 + $0x258] sm:$0xff] }
  0x1b   :  { %935 = vmatpush.bf16.msra.mxu2 %v1510_v25  ;;  %v258_v25 = vpack.c.b16 %v245_v17, %v245_v17  ;;  %v1577_v33 = vld [vmem:[%s1957_s1 + $0x2a0] sm:$0xff]  ;;  %v1584_v39 = vld [vmem:[%s1957_s1 + $0x2d8] sm:$0xff]  ;;  %v1590_v4 = vld [vmem:[%s1957_s1 + $0x308] sm:$0xff] }
  0x1c   :  { %922 = vmatpush.bf16.msra.mxu1 %v1502_v26  ;;  %v1571_v26 = vld [vmem:[%s1957_s1 + $0x270] sm:$0xff] }
  0x1d   :  { %948 = vmatpush.bf16.msra.mxu3 %v1518_v27  ;;  %v1587_v27 = vld [vmem:[%s1957_s1 + $0x2f0] sm:$0xff] }
  0x1e   :  { %910 = vmatpush.bf16.msra.mxu0 %v1493_v30  ;;  %v1570_v30 = vld [vmem:[%s1957_s1 + $0x268] sm:$0xff]  ;;  %v20_v5 = vld [vmem:[%s1959_s0 + $0x30] sm:$0xf] }
  0x1f   :  { %936 = vmatpush.bf16.msra.mxu2 %v1509_v31  ;;  %v1586_v31 = vld [vmem:[%s1957_s1 + $0x2e8] sm:$0xff] }
  0x20   :  { %923 = vmatpush.bf16.msra.mxu1 %v1501_v36  ;;  %v1560_v36 = vld [vmem:[%s1957_s1 + $0x218] sm:$0xff] }
  0x21   :  { %949 = vmatpush.bf16.msra.mxu3 %v1517_v37  ;;  %911 = vmatmul.bf16.vlgmr.msra.gmra.mxu0 %v253_v43  ;;  %v1576_v37 = vld [vmem:[%s1957_s1 + $0x298] sm:$0xff]  ;;  %v1583_v43 = vld [vmem:[%s1957_s1 + $0x2d0] sm:$0xff] }
  0x22   :  { %955 = vmatpush.bf16.msrb.mxu0 %v1532_v34  ;;  %937 = vmatmul.bf16.vlgmr.msra.gmra.mxu2 %v255_v42  ;;  %v1569_v34 = vld [vmem:[%s1957_s1 + $0x260] sm:$0xff]  ;;  %v1567_v42 = vld [vmem:[%s1957_s1 + $0x250] sm:$0xff] }
  0x23   :  { %981 = vmatpush.bf16.msrb.mxu2 %v1548_v35  ;;  %924 = vmatmul.bf16.vlgmr.msra.gmra.mxu1 %v254_v47  ;;  %v1585_v35 = vld [vmem:[%s1957_s1 + $0x2e0] sm:$0xff]  ;;  %v19_v47 = vld [vmem:[%s1959_s0 + $0x28] sm:$0xff] }
  0x24   :  { %968 = vmatpush.bf16.msrb.mxu1 %v1540_v40  ;;  %950 = vmatmul.bf16.vlgmr.msra.gmra.mxu3 %v256_v46  ;;  %v1559_v40 = vld [vmem:[%s1957_s1 + $0x210] sm:$0xff]  ;;  %v18_v46 = vld [vmem:[%s1959_s0 + $0x20] sm:$0xff] }
  0x25   :  { %994 = vmatpush.bf16.msrb.mxu3 %v1556_v41  ;;  %v1575_v41 = vld [vmem:[%s1957_s1 + $0x290] sm:$0xff] }
  0x26   :  { %956 = vmatpush.bf16.msrb.mxu0 %v1531_v44  ;;  %v1558_v44 = vld [vmem:[%s1957_s1 + $0x208] sm:$0xff] }
  0x27   :  { %982 = vmatpush.bf16.msrb.mxu2 %v1547_v45  ;;  %v1574_v45 = vld [vmem:[%s1957_s1 + $0x288] sm:$0xff] }
  0x28   :  { %969 = vmatpush.bf16.msrb.mxu1 %v1539_v48  ;;  %v1566_v48 = vld [vmem:[%s1957_s1 + $0x248] sm:$0xff] }
  0x29   :  { %995 = vmatpush.bf16.msrb.mxu3 %v1555_v49  ;;  %v1582_v49 = vld [vmem:[%s1957_s1 + $0x2c8] sm:$0xff] }
  0x2a   :  { %957 = vmatpush.bf16.msrb.mxu0 %v1530_v50  ;;  %v248_v50 = vunpack.c.l.b16 %v18_v46 }
  0x2b   :  { %983 = vmatpush.bf16.msrb.mxu2 %v1546_v51  ;;  %v250_v51 = vunpack.c.l.b16 %v19_v47 }
  0x2c   :  { %970 = vmatpush.bf16.msrb.mxu1 %v1538_v52  ;;  %v1557_v52 = vld [vmem:[%s1957_s1 + $0x200] sm:$0xff] }
  0x2d   :  { %996 = vmatpush.bf16.msrb.mxu3 %v1554_v53  ;;  %v1573_v53 = vld [vmem:[%s1957_s1 + $0x280] sm:$0xff] }
  0x2e   :  { %958 = vmatpush.bf16.msrb.mxu0 %v1529_v54  ;;  %v1596_v54 = vld [vmem:[%s1957_s1 + $0x338] sm:$0xff] }
  0x2f   :  { %984 = vmatpush.bf16.msrb.mxu2 %v1545_v55  ;;  %v249_v55 = vunpack.c.h.b16 %v18_v46 }
  0x30   :  { %971 = vmatpush.bf16.msrb.mxu1 %v1537_v56  ;;  %v251_v56 = vunpack.c.h.b16 %v19_v47 }
  0x31   :  { %997 = vmatpush.bf16.msrb.mxu3 %v1553_v57  ;;  %v1565_v57 = vld [vmem:[%s1957_s1 + $0x240] sm:$0xff] }
  0x32   :  { %959 = vmatpush.bf16.msrb.mxu0 %v1528_v58  ;;  %v1581_v58 = vld [vmem:[%s1957_s1 + $0x2c0] sm:$0xff] }
  0x33   :  { %985 = vmatpush.bf16.msrb.mxu2 %v1544_v59  ;;  %v261_v59 = vpack.c.b16 %v248_v50, %v248_v50 }
  0x34   :  { %972 = vmatpush.bf16.msrb.mxu1 %v1536_v60  ;;  %v263_v60 = vpack.c.b16 %v250_v51, %v250_v51 }
  0x35   :  { %998 = vmatpush.bf16.msrb.mxu3 %v1552_v61  ;;  %v262_v61 = vpack.c.b16 %v249_v55, %v249_v55 }
  0x36   :  { %960 = vmatpush.bf16.msrb.mxu0 %v1527_v62  ;;  %v264_v62 = vpack.c.b16 %v251_v56, %v251_v56 }
  0x37   :  { %986 = vmatpush.bf16.msrb.mxu2 %v1543_v63  ;;  %v1595_v63 = vld [vmem:[%s1957_s1 + $0x330] sm:$0xff] }
  0x38   :  { %973 = vmatpush.bf16.msrb.mxu1 %v1535_v0  ;;  %v1594_v0 = vld [vmem:[%s1957_s1 + $0x328] sm:$0xff] }
  0x39   :  { %999 = vmatpush.bf16.msrb.mxu3 %v1551_v1  ;;  %v1593_v1 = vld [vmem:[%s1957_s1 + $0x320] sm:$0xff] }
  0x3a   :  { %961 = vmatpush.bf16.msrb.mxu0 %v1526_v2  ;;  %v1592_v2 = vld [vmem:[%s1957_s1 + $0x318] sm:$0xff] }
  0x3b   :  { %987 = vmatpush.bf16.msrb.mxu2 %v1542_v3  ;;  %v1591_v3 = vld [vmem:[%s1957_s1 + $0x310] sm:$0xff] }
  0x3c   :  { %974 = vmatpush.bf16.msrb.mxu1 %v1534_v6  ;;  %v252_v6 = vunpack.c.l.b16 %v20_v5 }
  0x3d   :  { %1000 = vmatpush.bf16.msrb.mxu3 %v1550_v7  ;;  %v1589_v7 = vld [vmem:[%s1957_s1 + $0x300] sm:$0xff] }
  0x3e   :  { %962 = vmatpush.bf16.msrb.mxu0 %v1525_v8  ;;  %v265_v8 = vpack.c.b16 %v252_v6, %v252_v6 }
  0x3f   :  { %988 = vmatpush.bf16.msrb.mxu2 %v1541_v9 }
  0x40   :  { %975 = vmatpush.bf16.msrb.mxu1 %v1533_v14 }
  0x41   :  { %1001 = vmatpush.bf16.msrb.mxu3 %v1549_v15  ;;  %963 = vmatmul.bf16.vlgmr.msrb.gmra.mxu0 %v257_v21 }
  0x42   :  { %1007 = vmatpush.bf16.msra.mxu0 %v1564_v12  ;;  %989 = vmatmul.bf16.vlgmr.msrb.gmra.mxu2 %v259_v20 }
  0x43   :  { %1033 = vmatpush.bf16.msra.mxu2 %v1580_v13  ;;  %976 = vmatmul.bf16.vlgmr.msrb.gmra.mxu1 %v258_v25 }
  0x44   :  { %1020 = vmatpush.bf16.msra.mxu1 %v1572_v18  ;;  %1002 = vmatmul.bf16.vlgmr.msrb.gmra.mxu3 %v260_v24 }
  0x45   :  { %1046 = vmatpush.bf16.msra.mxu3 %v1588_v19 }
  0x46   :  { %1008 = vmatpush.bf16.msra.mxu0 %v1563_v22 }
  0x47   :  { %1034 = vmatpush.bf16.msra.mxu2 %v1579_v23  ;;  %v1597_v23 = vld [vmem:[%s1958_s2] ss:$0 sm:$0xff] }
  0x48   :  { %1021 = vmatpush.bf16.msra.mxu1 %v1571_v26 }
  0x49   :  { %1047 = vmatpush.bf16.msra.mxu3 %v1587_v27 }
  0x4a   :  { %1009 = vmatpush.bf16.msra.mxu0 %v1562_v28 }
  0x4b   :  { %1035 = vmatpush.bf16.msra.mxu2 %v1578_v29 }
  0x4c   :  { %1022 = vmatpush.bf16.msra.mxu1 %v1570_v30 }
  0x4d   :  { %1048 = vmatpush.bf16.msra.mxu3 %v1586_v31 }
  0x4e   :  { %1010 = vmatpush.bf16.msra.mxu0 %v1561_v32 }
  0x4f   :  { %1036 = vmatpush.bf16.msra.mxu2 %v1577_v33 }
  0x50   :  { %1023 = vmatpush.bf16.msra.mxu1 %v1569_v34 }
  0x51   :  { %1049 = vmatpush.bf16.msra.mxu3 %v1585_v35 }
  0x52   :  { %1011 = vmatpush.bf16.msra.mxu0 %v1560_v36 }
  0x53   :  { %1037 = vmatpush.bf16.msra.mxu2 %v1576_v37 }
  0x54   :  { %1024 = vmatpush.bf16.msra.mxu1 %v1568_v38 }
  0x55   :  { %1050 = vmatpush.bf16.msra.mxu3 %v1584_v39 }
  0x56   :  { %1012 = vmatpush.bf16.msra.mxu0 %v1559_v40 }
  0x57   :  { %1038 = vmatpush.bf16.msra.mxu2 %v1575_v41 }
  0x58   :  { %1025 = vmatpush.bf16.msra.mxu1 %v1567_v42 }
  0x59   :  { %1051 = vmatpush.bf16.msra.mxu3 %v1583_v43 }
  0x5a   :  { %1013 = vmatpush.bf16.msra.mxu0 %v1558_v44 }
  0x5b   :  { %1039 = vmatpush.bf16.msra.mxu2 %v1574_v45 }
  0x5c   :  { %1026 = vmatpush.bf16.msra.mxu1 %v1566_v48 }
  0x5d   :  { %1052 = vmatpush.bf16.msra.mxu3 %v1582_v49 }
  0x5e   :  { %1014 = vmatpush.bf16.msra.mxu0 %v1557_v52 }
  0x5f   :  { %1040 = vmatpush.bf16.msra.mxu2 %v1573_v53 }
  0x60   :  { %1027 = vmatpush.bf16.msra.mxu1 %v1565_v57 }
  0x61   :  { %1053 = vmatpush.bf16.msra.mxu3 %v1581_v58  ;;  %1015 = vmatmul.bf16.vlgmr.msra.gmra.mxu0 %v261_v59 }
  0x62   :  { %1059 = vmatpush.bf16.msrb.mxu0 %v1596_v54  ;;  %1041 = vmatmul.bf16.vlgmr.msra.gmra.mxu2 %v263_v60 }
  0x63   :  { %1028 = vmatmul.bf16.vlgmr.msra.gmra.mxu1 %v262_v61 }
  0x64   :  { %1054 = vmatmul.bf16.vlgmr.msra.gmra.mxu3 %v264_v62 }
  0x66   :  { %1060 = vmatpush.bf16.msrb.mxu0 %v1595_v63 }
  0x6a   :  { %1061 = vmatpush.bf16.msrb.mxu0 %v1594_v0 }
  0x6e   :  { %1062 = vmatpush.bf16.msrb.mxu0 %v1593_v1 }
  0x72   :  { %1063 = vmatpush.bf16.msrb.mxu0 %v1592_v2 }
  0x76   :  { %1064 = vmatpush.bf16.msrb.mxu0 %v1591_v3 }
  0x7a   :  { %1065 = vmatpush.bf16.msrb.mxu0 %v1590_v4 }
  0x7e   :  { %1066 = vmatpush.bf16.msrb.mxu0 %v1589_v7 }
  0x81   :  { %1067 = vmatmul.bf16.vlgmr.msrb.gmra.mxu0 %v265_v8 }
  0x9e   :  { %v912_v9 = vpop.f32.mrf.mxu0 }
  0x9f   :  { %v913_v26 = vadd.f32 %v1597_v23, %v912_v9 }
  0xa0   :  { %v925_v10 = vpop.f32.mrf.mxu1 }
  0xa1   :  { %v926_v27 = vadd.f32 %v925_v10, %v913_v26 }
  0xa5   :  { %v938_v11 = vpop.f32.mrf.mxu2 }
  0xa6   :  { %v914_v13 = vpop.f32.mrf.mxu0  ;;  %v939_v28 = vadd.f32 %v938_v11, %v926_v27 }
  0xa7   :  { %v951_v12 = vpop.f32.mrf.mxu3 }
  0xa8   :  { %v927_v14 = vpop.f32.mrf.mxu1  ;;  %v952_v30 = vadd.f32 %v951_v12, %v939_v28 }
  0xad   :  { %v940_v15 = vpop.f32.mrf.mxu2 }
  0xaf   :  { %v953_v16 = vpop.f32.mrf.mxu3 }
  0xbe   :  { %v964_v17 = vpop.f32.mrf.mxu0 }
  0xbf   :  { %v965_v32 = vadd.f32 %v964_v17, %v952_v30 }
  0xc0   :  { %v977_v18 = vpop.f32.mrf.mxu1 }
  0xc1   :  { %v978_v36 = vadd.f32 %v977_v18, %v965_v32 }
  0xc5   :  { %v990_v19 = vpop.f32.mrf.mxu2 }
  0xc6   :  { %v966_v21 = vpop.f32.mrf.mxu0  ;;  %v991_v38 = vadd.f32 %v990_v19, %v978_v36 }
  0xc7   :  { %v1003_v20 = vpop.f32.mrf.mxu3 }
  0xc8   :  { %v979_v22 = vpop.f32.mrf.mxu1  ;;  %v1004_v41 = vadd.f32 %v1003_v20, %v991_v38 }
  0xcd   :  { %v992_v24 = vpop.f32.mrf.mxu2 }
  0xcf   :  { %v1005_v25 = vpop.f32.mrf.mxu3 }
  0xde   :  { %v1016_v29 = vpop.f32.mrf.mxu0 }
  0xdf   :  { %v1017_v42 = vadd.f32 %v1016_v29, %v1004_v41 }
  0xe0   :  { %v1029_v31 = vpop.f32.mrf.mxu1 }
  0xe1   :  { %v1030_v43 = vadd.f32 %v1029_v31, %v1017_v42 }
  0xe5   :  { %v1042_v33 = vpop.f32.mrf.mxu2 }
  0xe6   :  { %v1018_v35 = vpop.f32.mrf.mxu0  ;;  %v1043_v44 = vadd.f32 %v1042_v33, %v1030_v43 }
  0xe7   :  { %v1055_v34 = vpop.f32.mrf.mxu3 }
  0xe8   :  { %v1031_v37 = vpop.f32.mrf.mxu1  ;;  %v1056_v45 = vadd.f32 %v1055_v34, %v1043_v44 }
  0xed   :  { %v1044_v39 = vpop.f32.mrf.mxu2 }
  0xef   :  { %v1057_v40 = vpop.f32.mrf.mxu3 }
  0xfe   :  { %v1068_v46 = vpop.f32.mrf.mxu0 }
  0xff   :  { %v1069_v47 = vadd.f32 %v1068_v46, %v1056_v45 }
 0x101   :  { %1072 = vst [vmem:[%s1960_s3] sm:$0xff] %v1069_v47 }
 0x106   :  { %v1070_v48 = vpop.f32.mrf.mxu0 }

</bundles_post_ra>
